<compile_context>
chip_gen: v7x
topology: tpu7x:2x2x1
jax: 0.10.0
libtpu: 0.0.40
codegen_flags: <defaults>
</compile_context>

<pallas_src>
import jax
import jax.numpy as jnp
from jax.experimental import pallas as pl
from jax.experimental.pallas import tpu as pltpu

OUT_CLASSES = 10

# Logical layer sizes of the PyTorch module and their lane-padded versions.
FC1_IN, FC1_OUT = 4 * 4 * 50, 500                 # 800 -> 500
FC2_OUT, FC3_OUT, FC4_OUT = 84, 20, 10
CONV_C_P = 128                                    # conv output channels 20/50 -> 128
CONV1_K_P = 32                                    # conv1 GEMM K: 25 -> 32
CONV2_K_P = 512                                   # conv2 GEMM K: 500 -> 512
FC1_IN_P = 16 * CONV_C_P                          # 2048 (consumes conv2's padded slab)
FC1_OUT_P = 512
FC2_OUT_P = FC3_OUT_P = FC4_OUT_P = 128

VMEM_LIMIT = 32 * 1024 * 1024


def _round_up(n, m):
    return (n + m - 1) // m * m


def _cdiv(a, b):
    return (a + b - 1) // b


def _pick_tile(rows, max_tile, sub):
    """Largest tile <= max_tile, rounded to `sub`, with >=2 grid steps when the
    row count permits (so both v7x TensorCores get work; no-op on v5e/v6e)."""
    tr = min(max_tile, _round_up(rows, sub))
    steps = _cdiv(rows, tr)
    if rows >= 2 * sub:
        steps = max(steps, 2)
    return _round_up(_cdiv(rows, steps), sub)


# ---------------------------------------------------------------------------
# Kernel 1: conv-as-GEMM (single MXU push) + 2x2 max-pool + bias + ReLU.
#   patches_ref : [4, TR, K]  bf16  (4 = pool-window positions)
#   w_ref       : [K, C]      bf16
#   b_ref       : [1, C]      f32
#   o_ref       : [TR, C]     bf16  (pooled, post-ReLU activations, lane-dense C=128)
# ---------------------------------------------------------------------------
def _conv_pool_kernel(patches_ref, w_ref, b_ref, o_ref):
    p, tr, k = patches_ref.shape
    x = patches_ref[...].reshape(p * tr, k)                    # bf16 [4*TR, K]
    y = jnp.dot(x, w_ref[...], preferred_element_type=jnp.float32)  # f32 [4*TR, C]
    acc = y[0:tr]
    for pos in range(1, p):                                    # 2x2 max-pool reduce
        acc = jnp.maximum(acc, y[pos * tr:(pos + 1) * tr])
    # bias + ReLU hoisted out of the pool reduction (commute with max)
    o_ref[...] = jnp.maximum(acc + b_ref[...], 0.0).astype(o_ref.dtype)


def conv_relu_pool(patches, w, b, *, tile_rows=1024):
    """patches: [4, R, K] bf16, w: [K, C] bf16, b: [1, C] f32 -> [R, C] bf16."""
    P, R, K = patches.shape
    C = w.shape[1]
    tr = _pick_tile(R, tile_rows, 16)
    r_pad = _round_up(R, tr)
    if r_pad != R:
        patches = jnp.pad(patches, ((0, 0), (0, r_pad - R), (0, 0)))
    grid = (r_pad // tr,)
    cost = pl.CostEstimate(
        flops=2 * P * r_pad * K * C,
        transcendentals=0,
        bytes_accessed=int(P * r_pad * K * 2 + K * C * 2 + C * 4 + r_pad * C * 2),
    )
    out = pl.pallas_call(
        _conv_pool_kernel,
        out_shape=jax.ShapeDtypeStruct((r_pad, C), jnp.bfloat16),
        grid_spec=pltpu.PrefetchScalarGridSpec(
            num_scalar_prefetch=0,
            grid=grid,
            in_specs=[
                pl.BlockSpec((P, tr, K), lambda i: (0, i, 0)),
                pl.BlockSpec((K, C), lambda i: (0, 0)),      # resident weights
                pl.BlockSpec((1, C), lambda i: (0, 0)),
            ],
            out_specs=pl.BlockSpec((tr, C), lambda i: (i, 0)),
        ),
        compiler_params=pltpu.CompilerParams(
            dimension_semantics=("parallel",),
            vmem_limit_bytes=VMEM_LIMIT,
        ),
        cost_estimate=cost,
    )(patches, w, b)
    return out[:R]


# ---------------------------------------------------------------------------
# Kernel 2: fused fc1 -> fc2 -> fc3 -> fc4 + masked log_softmax (lane-padded).
# All dots are bf16 x bf16 -> f32; elementwise work stays f32.
# ---------------------------------------------------------------------------
def _mlp_head_kernel(x_ref, w1_ref, b1_ref, w2_ref, b2_ref,
                     w3_ref, b3_ref, w4_ref, b4_ref, o_ref):
    def fc_relu(h_bf16, w_ref, b_ref):
        y = jnp.dot(h_bf16, w_ref[...], preferred_element_type=jnp.float32) + b_ref[...]
        return jnp.maximum(y, 0.0)

    h = fc_relu(x_ref[...], w1_ref, b1_ref)                       # x already bf16
    h = fc_relu(h.astype(jnp.bfloat16), w2_ref, b2_ref)
    h = fc_relu(h.astype(jnp.bfloat16), w3_ref, b3_ref)
    logits = jnp.dot(h.astype(jnp.bfloat16), w4_ref[...],
                     preferred_element_type=jnp.float32) + b4_ref[...]
    # Mask the padded logit columns (>= 10) so they do not affect the softmax.
    col = jax.lax.broadcasted_iota(jnp.int32, logits.shape, 1)
    logits = jnp.where(col < OUT_CLASSES, logits, jnp.float32(-1e30))
    m = jnp.max(logits, axis=-1, keepdims=True)
    s = logits - m
    lse = jnp.log(jnp.sum(jnp.exp(s), axis=-1, keepdims=True))
    o_ref[...] = (s - lse).astype(o_ref.dtype)


def mlp_head(feat, p, *, tile_rows=1024):
    """feat: [B, 2048] bf16 -> [B, 128] f32 log-probs (cols >= 10 are padding)."""
    B, K = feat.shape
    tb = _pick_tile(B, tile_rows, 16)
    b_pad = _round_up(B, tb)
    if b_pad != B:
        feat = jnp.pad(feat, ((0, b_pad - B), (0, 0)))
    grid = (b_pad // tb,)

    def full(arr):  # resident (constant index_map) full-array block
        return pl.BlockSpec(arr.shape, lambda i: (0, 0))

    weights = [p["w_fc1"], p["b_fc1"], p["w_fc2"], p["b_fc2"],
               p["w_fc3"], p["b_fc3"], p["w_fc4"], p["b_fc4"]]
    flops = 2 * b_pad * (FC1_IN_P * FC1_OUT_P + FC1_OUT_P * FC2_OUT_P
                         + FC2_OUT_P * FC3_OUT_P + FC3_OUT_P * FC4_OUT_P)
    wbytes = sum(int(w.size) * w.dtype.itemsize for w in weights)
    cost = pl.CostEstimate(
        flops=flops,
        transcendentals=b_pad * (FC4_OUT_P + 1),
        bytes_accessed=int(b_pad * K * 2 + wbytes + b_pad * FC4_OUT_P * 4),
    )
    out = pl.pallas_call(
        _mlp_head_kernel,
        out_shape=jax.ShapeDtypeStruct((b_pad, FC4_OUT_P), jnp.float32),
        grid_spec=pltpu.PrefetchScalarGridSpec(
            num_scalar_prefetch=0,
            grid=grid,
            in_specs=[pl.BlockSpec((tb, K), lambda i: (i, 0))]
                     + [full(w) for w in weights],
            out_specs=pl.BlockSpec((tb, FC4_OUT_P), lambda i: (i, 0)),
        ),
        compiler_params=pltpu.CompilerParams(
            dimension_semantics=("parallel",),
            vmem_limit_bytes=VMEM_LIMIT,
        ),
        cost_estimate=cost,
    )(feat, *weights)
    return out[:B]


# ---------------------------------------------------------------------------
# Wrapper-side layout plumbing (im2col + pool-window rearrangement).
# ---------------------------------------------------------------------------
def _extract_pool_patches(x, ksize, out_size, pool):
    """x: [B, H, W, C] -> [pool*pool, B*(out_size//pool)^2, ksize*ksize*C].

    Row r = b*ph*ph + i*ph + j holds, for pool position p = di*pool + dj, the
    flattened (ki, kj, c) conv-input patch of output pixel (pool*i+di, pool*j+dj).
    """
    B, _, _, C = x.shape
    cols = jnp.concatenate(
        [x[:, ki:ki + out_size, kj:kj + out_size, :]
         for ki in range(ksize) for kj in range(ksize)], axis=-1)
    K = ksize * ksize * C
    ph = out_size // pool
    cols = cols.reshape(B, ph, pool, ph, pool, K)
    cols = cols.transpose(2, 4, 0, 1, 3, 5).reshape(pool * pool, B * ph * ph, K)
    return cols


def mnist_forward(x, params):
    """x: [B, 1, 28, 28] (NCHW, as the PyTorch module). Returns [B, 10] log-probs."""
    x = jnp.transpose(x, (0, 2, 3, 1)).astype(jnp.bfloat16)      # NHWC, bf16 activations
    B = x.shape[0]

    # conv1(1->20, 5x5, stride 1) + ReLU + max_pool(2, 2); K 25->32, C 20->128
    p1 = _extract_pool_patches(x, 5, 24, 2)                      # [4, B*144, 25] bf16
    p1 = jnp.pad(p1, ((0, 0), (0, 0), (0, CONV1_K_P - p1.shape[-1])))
    pooled1 = conv_relu_pool(p1, params["w_conv1"], params["b_conv1"])   # [B*144, 128] bf16
    pooled1 = pooled1.reshape(B, 12, 12, CONV_C_P)

    # conv2(20->50, 5x5, stride 1) + ReLU + max_pool(2, 2); K 500->512, C 50->128
    p2 = _extract_pool_patches(pooled1[..., :20], 5, 8, 2)       # [4, B*16, 500] bf16
    p2 = jnp.pad(p2, ((0, 0), (0, 0), (0, CONV2_K_P - p2.shape[-1])))
    pooled2 = conv_relu_pool(p2, params["w_conv2"], params["b_conv2"])   # [B*16, 128] bf16

    # fc1 consumes conv2's lane-dense slab directly: feat pad is folded into w_fc1.
    feat = pooled2.reshape(B, 16 * CONV_C_P)                     # [B, 2048] bf16
    logp = mlp_head(feat, params)                                # [B, 128] f32 lane-dense
    return logp[:, :OUT_CLASSES]


# ---------------------------------------------------------------------------
# Parameters (PyTorch default-style init), stored in the kernel's layout:
# [in, out] weights, bf16, zero-padded to the lane-friendly sizes above.
# ---------------------------------------------------------------------------
def init_params(key):
    ks = jax.random.split(key, 12)

    def uniform(k, shape, fan_in):
        bnd = float(fan_in) ** -0.5
        return jax.random.uniform(k, shape, jnp.float32, -bnd, bnd)

    def pad2(w, rows, cols):
        return jnp.pad(w, ((0, rows - w.shape[0]), (0, cols - w.shape[1])))

    def pad_bias(b, cols):
        return jnp.pad(b, ((0, cols - b.shape[0]),)).reshape(1, cols)

    w_c1 = uniform(ks[0], (25, 20), 25)            # rows = ki*5+kj (c_in = 1)
    b_c1 = uniform(ks[1], (20,), 25)
    w_c2 = uniform(ks[2], (500, 50), 500)          # rows = (ki*5+kj)*20 + c_in
    b_c2 = uniform(ks[3], (50,), 500)
    w1 = uniform(ks[4], (FC1_IN, FC1_OUT), FC1_IN)   # rows = pixel*50 + ch (h,w,c order)
    b1 = uniform(ks[5], (FC1_OUT,), FC1_IN)
    w2 = uniform(ks[6], (FC1_OUT, FC2_OUT), FC1_OUT)
    b2 = uniform(ks[7], (FC2_OUT,), FC1_OUT)
    w3 = uniform(ks[8], (FC2_OUT, FC3_OUT), FC2_OUT)
    b3 = uniform(ks[9], (FC3_OUT,), FC2_OUT)
    w4 = uniform(ks[10], (FC3_OUT, FC4_OUT), FC3_OUT)
    b4 = uniform(ks[11], (FC4_OUT,), FC3_OUT)

    # fc1: scatter the logical (800, 500) weight into (16*128, 512) so it consumes
    # conv2's 128-channel lane-dense output slab directly (rows for ch >= 50 are 0).
    w1_p = jnp.pad(w1.reshape(16, 50, FC1_OUT),
                   ((0, 0), (0, CONV_C_P - 50), (0, FC1_OUT_P - FC1_OUT)))
    w1_p = w1_p.reshape(16 * CONV_C_P, FC1_OUT_P)

    return {
        "w_conv1": pad2(w_c1, CONV1_K_P, CONV_C_P).astype(jnp.bfloat16),
        "b_conv1": pad_bias(b_c1, CONV_C_P),
        "w_conv2": pad2(w_c2, CONV2_K_P, CONV_C_P).astype(jnp.bfloat16),
        "b_conv2": pad_bias(b_c2, CONV_C_P),
        "w_fc1": w1_p.astype(jnp.bfloat16),
        "b_fc1": pad_bias(b1, FC1_OUT_P),
        "w_fc2": pad2(w2, FC1_OUT_P, FC2_OUT_P).astype(jnp.bfloat16),
        "b_fc2": pad_bias(b2, FC2_OUT_P),
        "w_fc3": pad2(w3, FC2_OUT_P, FC3_OUT_P).astype(jnp.bfloat16),
        "b_fc3": pad_bias(b3, FC3_OUT_P),
        "w_fc4": pad2(w4, FC3_OUT_P, FC4_OUT_P).astype(jnp.bfloat16),
        "b_fc4": pad_bias(b4, FC4_OUT_P),
    }


# ---------------------------------------------------------------------------
# Pure-JAX reference mirroring the kernel's precision policy (bf16 weights and
# activations at dot inputs, f32 accumulation / elementwise, bf16 inter-layer
# activations) so the comparison isolates Pallas-lowering correctness.
# ---------------------------------------------------------------------------
def reference_forward(x, params):
    x = jnp.transpose(x, (0, 2, 3, 1)).astype(jnp.bfloat16)
    B = x.shape[0]

    def conv_pool_ref(patches, w, b):
        p, r, k = patches.shape
        y = jnp.dot(patches.reshape(p * r, k), w,
                    preferred_element_type=jnp.float32).reshape(p, r, -1)
        acc = jnp.max(y, axis=0)
        return jnp.maximum(acc + b, 0.0).astype(jnp.bfloat16)

    p1 = _extract_pool_patches(x, 5, 24, 2)
    p1 = jnp.pad(p1, ((0, 0), (0, 0), (0, CONV1_K_P - p1.shape[-1])))
    pooled1 = conv_pool_ref(p1, params["w_conv1"], params["b_conv1"])
    pooled1 = pooled1.reshape(B, 12, 12, CONV_C_P)

    p2 = _extract_pool_patches(pooled1[..., :20], 5, 8, 2)
    p2 = jnp.pad(p2, ((0, 0), (0, 0), (0, CONV2_K_P - p2.shape[-1])))
    pooled2 = conv_pool_ref(p2, params["w_conv2"], params["b_conv2"])
    feat = pooled2.reshape(B, 16 * CONV_C_P)

    def fc(h, w, b, relu=True):
        y = jnp.dot(h.astype(jnp.bfloat16), w,
                    preferred_element_type=jnp.float32) + b
        return jnp.maximum(y, 0.0) if relu else y

    h = fc(feat, params["w_fc1"], params["b_fc1"])
    h = fc(h, params["w_fc2"], params["b_fc2"])
    h = fc(h, params["w_fc3"], params["b_fc3"])
    logits = fc(h, params["w_fc4"], params["b_fc4"], relu=False)
    return jax.nn.log_softmax(logits[:, :OUT_CLASSES], axis=1)


if __name__ == "__main__":
    key = jax.random.PRNGKey(0)
    k_x, k_p = jax.random.split(key)

    B = 2
    x = jax.random.normal(k_x, (B, 1, 28, 28), jnp.float32)   # MNIST-shaped NCHW input
    params = init_params(k_p)

    fwd = jax.jit(mnist_forward)
    out = jax.block_until_ready(fwd(x, params))

    ref = reference_forward(x, params)
    assert out.shape == (B, OUT_CLASSES), out.shape
    assert bool(jnp.all(jnp.isfinite(out)))
    err = float(jnp.max(jnp.abs(out - ref)))
    assert err < 5e-3, err

    print("KERNEL_OK")
</pallas_src>

<mosaic_0001>
module attributes {stable_mosaic.version = 11 : i64} {
  func.func @_conv_pool_kernel(%arg0: i32, %arg1: memref<4x144x32xbf16, #tpu.memory_space<vmem>>, %arg2: memref<32x128xbf16, #tpu.memory_space<vmem>>, %arg3: memref<1x128xf32, #tpu.memory_space<vmem>>, %arg4: memref<144x128xbf16, #tpu.memory_space<vmem>>) attributes {dimension_semantics = [#tpu.dimension_semantics<parallel>], iteration_bounds = array<i64: 2>, scalar_prefetch = 0 : i64, scratch_operands = 0 : i64, tpu.core_type = #tpu.core_type<tc>, window_params = [{transform_indices = @transform_0, window_bounds = array<i64: 4, 144, 32>}, {pipeline_mode = #tpu.pipeline_mode<synchronous>, transform_indices = @transform_1, window_bounds = array<i64: 32, 128>}, {pipeline_mode = #tpu.pipeline_mode<synchronous>, transform_indices = @transform_2, window_bounds = array<i64: 1, 128>}, {transform_indices = @transform_3, window_bounds = array<i64: 144, 128>}]} {
    %c0 = arith.constant 0 : index
    %c0_0 = arith.constant 0 : index
    %c0_1 = arith.constant 0 : index
    %0 = vector.load %arg1[%c0, %c0_0, %c0_1] : memref<4x144x32xbf16, #tpu.memory_space<vmem>>, vector<4x144x32xbf16>
    %1 = vector.shape_cast %0 : vector<4x144x32xbf16> to vector<576x32xbf16>
    %c0_2 = arith.constant 0 : index
    %c0_3 = arith.constant 0 : index
    %2 = vector.load %arg2[%c0_2, %c0_3] : memref<32x128xbf16, #tpu.memory_space<vmem>>, vector<32x128xbf16>
    %cst = arith.constant dense<0.000000e+00> : vector<576x128xf32>
    %3 = tpu.matmul %1, %2, %cst {dimension_numbers = #tpu.dot_dimension_numbers<[1], [0], [0], [1], [0, 0, 1, 1], [], []>} : vector<576x32xbf16>, vector<32x128xbf16>, vector<576x128xf32> -> vector<576x128xf32>
    %4 = vector.extract_strided_slice %3 {offsets = [0, 0], sizes = [144, 128], strides = [1, 1]} : vector<576x128xf32> to vector<144x128xf32>
    %5 = vector.extract_strided_slice %3 {offsets = [144, 0], sizes = [144, 128], strides = [1, 1]} : vector<576x128xf32> to vector<144x128xf32>
    %6 = arith.maximumf %4, %5 : vector<144x128xf32>
    %7 = vector.extract_strided_slice %3 {offsets = [288, 0], sizes = [144, 128], strides = [1, 1]} : vector<576x128xf32> to vector<144x128xf32>
    %8 = arith.maximumf %6, %7 : vector<144x128xf32>
    %9 = vector.extract_strided_slice %3 {offsets = [432, 0], sizes = [144, 128], strides = [1, 1]} : vector<576x128xf32> to vector<144x128xf32>
    %10 = arith.maximumf %8, %9 : vector<144x128xf32>
    %c0_4 = arith.constant 0 : index
    %c0_5 = arith.constant 0 : index
    %11 = vector.load %arg3[%c0_4, %c0_5] : memref<1x128xf32, #tpu.memory_space<vmem>>, vector<1x128xf32>
    %12 = vector.broadcast %11 : vector<1x128xf32> to vector<144x128xf32>
    %13 = arith.addf %10, %12 : vector<144x128xf32>
    %cst_6 = arith.constant 0.000000e+00 : f32
    %14 = vector.broadcast %cst_6 : f32 to vector<144x128xf32>
    %15 = arith.maximumf %13, %14 : vector<144x128xf32>
    %16 = arith.truncf %15 : vector<144x128xf32> to vector<144x128xbf16>
    %c0_7 = arith.constant 0 : index
    %c0_8 = arith.constant 0 : index
    %17 = vector.load %arg4[%c0_7, %c0_8] : memref<144x128xbf16, #tpu.memory_space<vmem>>, vector<144x128xbf16>
    tpu.vector_store %arg4[%c0_7, %c0_8], %16 {strides = array<i32>} : memref<144x128xbf16, #tpu.memory_space<vmem>>, vector<144x128xbf16>,
    return
  }
  func.func @transform_0(%arg0: i32) -> (i32, i32, i32) {
    %c0_i32 = arith.constant 0 : i32
    %c0_i32_0 = arith.constant 0 : i32
    %c0_i32_1 = arith.constant 0 : i32
    return %c0_i32, %arg0, %c0_i32_0 : i32, i32, i32
  }
  func.func @transform_1(%arg0: i32) -> (i32, i32) {
    %c0_i32 = arith.constant 0 : i32
    %c0_i32_0 = arith.constant 0 : i32
    %c0_i32_1 = arith.constant 0 : i32
    return %c0_i32, %c0_i32_0 : i32, i32
  }
  func.func @transform_2(%arg0: i32) -> (i32, i32) {
    %c0_i32 = arith.constant 0 : i32
    %c0_i32_0 = arith.constant 0 : i32
    %c0_i32_1 = arith.constant 0 : i32
    return %c0_i32, %c0_i32_0 : i32, i32
  }
  func.func @transform_3(%arg0: i32) -> (i32, i32) {
    %c0_i32 = arith.constant 0 : i32
    %c0_i32_0 = arith.constant 0 : i32
    return %arg0, %c0_i32 : i32, i32
  }
}

module attributes {stable_mosaic.version = 11 : i64} {
  func.func @_conv_pool_kernel(%arg0: i32, %arg1: memref<4x16x512xbf16, #tpu.memory_space<vmem>>, %arg2: memref<512x128xbf16, #tpu.memory_space<vmem>>, %arg3: memref<1x128xf32, #tpu.memory_space<vmem>>, %arg4: memref<16x128xbf16, #tpu.memory_space<vmem>>) attributes {dimension_semantics = [#tpu.dimension_semantics<parallel>], iteration_bounds = array<i64: 2>, scalar_prefetch = 0 : i64, scratch_operands = 0 : i64, tpu.core_type = #tpu.core_type<tc>, window_params = [{transform_indices = @transform_0, window_bounds = array<i64: 4, 16, 512>}, {pipeline_mode = #tpu.pipeline_mode<synchronous>, transform_indices = @transform_1, window_bounds = array<i64: 512, 128>}, {pipeline_mode = #tpu.pipeline_mode<synchronous>, transform_indices = @transform_2, window_bounds = array<i64: 1, 128>}, {transform_indices = @transform_3, window_bounds = array<i64: 16, 128>}]} {
    %c0 = arith.constant 0 : index
    %c0_0 = arith.constant 0 : index
    %c0_1 = arith.constant 0 : index
    %0 = vector.load %arg1[%c0, %c0_0, %c0_1] : memref<4x16x512xbf16, #tpu.memory_space<vmem>>, vector<4x16x512xbf16>
    %1 = vector.shape_cast %0 : vector<4x16x512xbf16> to vector<64x512xbf16>
    %c0_2 = arith.constant 0 : index
    %c0_3 = arith.constant 0 : index
    %2 = vector.load %arg2[%c0_2, %c0_3] : memref<512x128xbf16, #tpu.memory_space<vmem>>, vector<512x128xbf16>
    %cst = arith.constant dense<0.000000e+00> : vector<64x128xf32>
    %3 = tpu.matmul %1, %2, %cst {dimension_numbers = #tpu.dot_dimension_numbers<[1], [0], [0], [1], [0, 0, 1, 1], [], []>} : vector<64x512xbf16>, vector<512x128xbf16>, vector<64x128xf32> -> vector<64x128xf32>
    %4 = vector.extract_strided_slice %3 {offsets = [0, 0], sizes = [16, 128], strides = [1, 1]} : vector<64x128xf32> to vector<16x128xf32>
    %5 = vector.extract_strided_slice %3 {offsets = [16, 0], sizes = [16, 128], strides = [1, 1]} : vector<64x128xf32> to vector<16x128xf32>
    %6 = arith.maximumf %4, %5 : vector<16x128xf32>
    %7 = vector.extract_strided_slice %3 {offsets = [32, 0], sizes = [16, 128], strides = [1, 1]} : vector<64x128xf32> to vector<16x128xf32>
    %8 = arith.maximumf %6, %7 : vector<16x128xf32>
    %9 = vector.extract_strided_slice %3 {offsets = [48, 0], sizes = [16, 128], strides = [1, 1]} : vector<64x128xf32> to vector<16x128xf32>
    %10 = arith.maximumf %8, %9 : vector<16x128xf32>
    %c0_4 = arith.constant 0 : index
    %c0_5 = arith.constant 0 : index
    %11 = vector.load %arg3[%c0_4, %c0_5] : memref<1x128xf32, #tpu.memory_space<vmem>>, vector<1x128xf32>
    %12 = vector.broadcast %11 : vector<1x128xf32> to vector<16x128xf32>
    %13 = arith.addf %10, %12 : vector<16x128xf32>
    %cst_6 = arith.constant 0.000000e+00 : f32
    %14 = vector.broadcast %cst_6 : f32 to vector<16x128xf32>
    %15 = arith.maximumf %13, %14 : vector<16x128xf32>
    %16 = arith.truncf %15 : vector<16x128xf32> to vector<16x128xbf16>
    %c0_7 = arith.constant 0 : index
    %c0_8 = arith.constant 0 : index
    %17 = vector.load %arg4[%c0_7, %c0_8] : memref<16x128xbf16, #tpu.memory_space<vmem>>, vector<16x128xbf16>
    tpu.vector_store %arg4[%c0_7, %c0_8], %16 {strides = array<i32>} : memref<16x128xbf16, #tpu.memory_space<vmem>>, vector<16x128xbf16>,
    return
  }
  func.func @transform_0(%arg0: i32) -> (i32, i32, i32) {
    %c0_i32 = arith.constant 0 : i32
    %c0_i32_0 = arith.constant 0 : i32
    %c0_i32_1 = arith.constant 0 : i32
    return %c0_i32, %arg0, %c0_i32_0 : i32, i32, i32
  }
  func.func @transform_1(%arg0: i32) -> (i32, i32) {
    %c0_i32 = arith.constant 0 : i32
    %c0_i32_0 = arith.constant 0 : i32
    %c0_i32_1 = arith.constant 0 : i32
    return %c0_i32, %c0_i32_0 : i32, i32
  }
  func.func @transform_2(%arg0: i32) -> (i32, i32) {
    %c0_i32 = arith.constant 0 : i32
    %c0_i32_0 = arith.constant 0 : i32
    %c0_i32_1 = arith.constant 0 : i32
    return %c0_i32, %c0_i32_0 : i32, i32
  }
  func.func @transform_3(%arg0: i32) -> (i32, i32) {
    %c0_i32 = arith.constant 0 : i32
    %c0_i32_0 = arith.constant 0 : i32
    return %arg0, %c0_i32 : i32, i32
  }
}

module attributes {stable_mosaic.version = 11 : i64} {
  func.func @_mlp_head_kernel(%arg0: i32, %arg1: memref<16x2048xbf16, #tpu.memory_space<vmem>>, %arg2: memref<2048x512xbf16, #tpu.memory_space<vmem>>, %arg3: memref<1x512xf32, #tpu.memory_space<vmem>>, %arg4: memref<512x128xbf16, #tpu.memory_space<vmem>>, %arg5: memref<1x128xf32, #tpu.memory_space<vmem>>, %arg6: memref<128x128xbf16, #tpu.memory_space<vmem>>, %arg7: memref<1x128xf32, #tpu.memory_space<vmem>>, %arg8: memref<128x128xbf16, #tpu.memory_space<vmem>>, %arg9: memref<1x128xf32, #tpu.memory_space<vmem>>, %arg10: memref<16x128xf32, #tpu.memory_space<vmem>>) attributes {dimension_semantics = [#tpu.dimension_semantics<parallel>], iteration_bounds = array<i64: 1>, scalar_prefetch = 0 : i64, scratch_operands = 0 : i64, tpu.core_type = #tpu.core_type<tc>, window_params = [{transform_indices = @transform_0, window_bounds = array<i64: 16, 2048>}, {pipeline_mode = #tpu.pipeline_mode<synchronous>, transform_indices = @transform_1, window_bounds = array<i64: 2048, 512>}, {pipeline_mode = #tpu.pipeline_mode<synchronous>, transform_indices = @transform_2, window_bounds = array<i64: 1, 512>}, {pipeline_mode = #tpu.pipeline_mode<synchronous>, transform_indices = @transform_3, window_bounds = array<i64: 512, 128>}, {pipeline_mode = #tpu.pipeline_mode<synchronous>, transform_indices = @transform_4, window_bounds = array<i64: 1, 128>}, {pipeline_mode = #tpu.pipeline_mode<synchronous>, transform_indices = @transform_5, window_bounds = array<i64: 128, 128>}, {pipeline_mode = #tpu.pipeline_mode<synchronous>, transform_indices = @transform_6, window_bounds = array<i64: 1, 128>}, {pipeline_mode = #tpu.pipeline_mode<synchronous>, transform_indices = @transform_7, window_bounds = array<i64: 128, 128>}, {pipeline_mode = #tpu.pipeline_mode<synchronous>, transform_indices = @transform_8, window_bounds = array<i64: 1, 128>}, {transform_indices = @transform_9, window_bounds = array<i64: 16, 128>}]} {
    %c0 = arith.constant 0 : index
    %c0_0 = arith.constant 0 : index
    %0 = vector.load %arg1[%c0, %c0_0] : memref<16x2048xbf16, #tpu.memory_space<vmem>>, vector<16x2048xbf16>
    %c0_1 = arith.constant 0 : index
    %c0_2 = arith.constant 0 : index
    %1 = vector.load %arg2[%c0_1, %c0_2] : memref<2048x512xbf16, #tpu.memory_space<vmem>>, vector<2048x512xbf16>
    %cst = arith.constant dense<0.000000e+00> : vector<16x512xf32>
    %2 = tpu.matmul %0, %1, %cst {dimension_numbers = #tpu.dot_dimension_numbers<[1], [0], [0], [1], [0, 0, 1, 1], [], []>} : vector<16x2048xbf16>, vector<2048x512xbf16>, vector<16x512xf32> -> vector<16x512xf32>
    %c0_3 = arith.constant 0 : index
    %c0_4 = arith.constant 0 : index
    %3 = vector.load %arg3[%c0_3, %c0_4] : memref<1x512xf32, #tpu.memory_space<vmem>>, vector<1x512xf32>
    %4 = vector.broadcast %3 : vector<1x512xf32> to vector<16x512xf32>
    %5 = arith.addf %2, %4 : vector<16x512xf32>
    %cst_5 = arith.constant 0.000000e+00 : f32
    %6 = vector.broadcast %cst_5 : f32 to vector<16x512xf32>
    %7 = arith.maximumf %5, %6 : vector<16x512xf32>
    %8 = arith.truncf %7 : vector<16x512xf32> to vector<16x512xbf16>
    %c0_6 = arith.constant 0 : index
    %c0_7 = arith.constant 0 : index
    %9 = vector.load %arg4[%c0_6, %c0_7] : memref<512x128xbf16, #tpu.memory_space<vmem>>, vector<512x128xbf16>
    %cst_8 = arith.constant dense<0.000000e+00> : vector<16x128xf32>
    %10 = tpu.matmul %8, %9, %cst_8 {dimension_numbers = #tpu.dot_dimension_numbers<[1], [0], [0], [1], [0, 0, 1, 1], [], []>} : vector<16x512xbf16>, vector<512x128xbf16>, vector<16x128xf32> -> vector<16x128xf32>
    %c0_9 = arith.constant 0 : index
    %c0_10 = arith.constant 0 : index
    %11 = vector.load %arg5[%c0_9, %c0_10] : memref<1x128xf32, #tpu.memory_space<vmem>>, vector<1x128xf32>
    %12 = vector.broadcast %11 : vector<1x128xf32> to vector<16x128xf32>
    %13 = arith.addf %10, %12 : vector<16x128xf32>
    %cst_11 = arith.constant 0.000000e+00 : f32
    %14 = vector.broadcast %cst_11 : f32 to vector<16x128xf32>
    %15 = arith.maximumf %13, %14 : vector<16x128xf32>
    %16 = arith.truncf %15 : vector<16x128xf32> to vector<16x128xbf16>
    %c0_12 = arith.constant 0 : index
    %c0_13 = arith.constant 0 : index
    %17 = vector.load %arg6[%c0_12, %c0_13] : memref<128x128xbf16, #tpu.memory_space<vmem>>, vector<128x128xbf16>
    %cst_14 = arith.constant dense<0.000000e+00> : vector<16x128xf32>
    %18 = tpu.matmul %16, %17, %cst_14 {dimension_numbers = #tpu.dot_dimension_numbers<[1], [0], [0], [1], [0, 0, 1, 1], [], []>} : vector<16x128xbf16>, vector<128x128xbf16>, vector<16x128xf32> -> vector<16x128xf32>
    %c0_15 = arith.constant 0 : index
    %c0_16 = arith.constant 0 : index
    %19 = vector.load %arg7[%c0_15, %c0_16] : memref<1x128xf32, #tpu.memory_space<vmem>>, vector<1x128xf32>
    %20 = vector.broadcast %19 : vector<1x128xf32> to vector<16x128xf32>
    %21 = arith.addf %18, %20 : vector<16x128xf32>
    %cst_17 = arith.constant 0.000000e+00 : f32
    %22 = vector.broadcast %cst_17 : f32 to vector<16x128xf32>
    %23 = arith.maximumf %21, %22 : vector<16x128xf32>
    %24 = arith.truncf %23 : vector<16x128xf32> to vector<16x128xbf16>
    %c0_18 = arith.constant 0 : index
    %c0_19 = arith.constant 0 : index
    %25 = vector.load %arg8[%c0_18, %c0_19] : memref<128x128xbf16, #tpu.memory_space<vmem>>, vector<128x128xbf16>
    %cst_20 = arith.constant dense<0.000000e+00> : vector<16x128xf32>
    %26 = tpu.matmul %24, %25, %cst_20 {dimension_numbers = #tpu.dot_dimension_numbers<[1], [0], [0], [1], [0, 0, 1, 1], [], []>} : vector<16x128xbf16>, vector<128x128xbf16>, vector<16x128xf32> -> vector<16x128xf32>
    %c0_21 = arith.constant 0 : index
    %c0_22 = arith.constant 0 : index
    %27 = vector.load %arg9[%c0_21, %c0_22] : memref<1x128xf32, #tpu.memory_space<vmem>>, vector<1x128xf32>
    %28 = vector.broadcast %27 : vector<1x128xf32> to vector<16x128xf32>
    %29 = arith.addf %26, %28 : vector<16x128xf32>
    %30 = tpu.iota {dimensions = array<i32: 1>} : vector<16x128xi32>
    %c10_i32 = arith.constant 10 : i32
    %31 = vector.broadcast %c10_i32 : i32 to vector<16x128xi32>
    %32 = arith.cmpi slt, %30, %31 : vector<16x128xi32>
    %cst_23 = arith.constant -1.000000e+30 : f32
    %33 = vector.broadcast %cst_23 : f32 to vector<16x128xf32>
    %34 = arith.select %32, %29, %33 : vector<16x128xi1>, vector<16x128xf32>
    %cst_24 = arith.constant dense<0xFF800000> : vector<16xf32>
    %35 = vector.multi_reduction <maximumf>, %34, %cst_24 [1] : vector<16x128xf32> to vector<16xf32>
    %36 = vector.shape_cast %35 : vector<16xf32> to vector<16x1xf32>
    %37 = vector.broadcast %36 : vector<16x1xf32> to vector<16x128xf32>
    %38 = arith.subf %34, %37 : vector<16x128xf32>
    %39 = math.exp %38 : vector<16x128xf32>
    %cst_25 = arith.constant dense<0.000000e+00> : vector<16xf32>
    %40 = vector.multi_reduction <add>, %39, %cst_25 [1] : vector<16x128xf32> to vector<16xf32>
    %41 = vector.shape_cast %40 : vector<16xf32> to vector<16x1xf32>
    %42 = math.log %41 : vector<16x1xf32>
    %43 = vector.broadcast %42 : vector<16x1xf32> to vector<16x128xf32>
    %44 = arith.subf %38, %43 : vector<16x128xf32>
    %c0_26 = arith.constant 0 : index
    %c0_27 = arith.constant 0 : index
    %45 = vector.load %arg10[%c0_26, %c0_27] : memref<16x128xf32, #tpu.memory_space<vmem>>, vector<16x128xf32>
    tpu.vector_store %arg10[%c0_26, %c0_27], %44 {strides = array<i32>} : memref<16x128xf32, #tpu.memory_space<vmem>>, vector<16x128xf32>,
    return
  }
  func.func @transform_0(%arg0: i32) -> (i32, i32) {
    %c0_i32 = arith.constant 0 : i32
    %c0_i32_0 = arith.constant 0 : i32
    return %arg0, %c0_i32 : i32, i32
  }
  func.func @transform_1(%arg0: i32) -> (i32, i32) {
    %c0_i32 = arith.constant 0 : i32
    %c0_i32_0 = arith.constant 0 : i32
    %c0_i32_1 = arith.constant 0 : i32
    return %c0_i32, %c0_i32_0 : i32, i32
  }
  func.func @transform_2(%arg0: i32) -> (i32, i32) {
    %c0_i32 = arith.constant 0 : i32
    %c0_i32_0 = arith.constant 0 : i32
    %c0_i32_1 = arith.constant 0 : i32
    return %c0_i32, %c0_i32_0 : i32, i32
  }
  func.func @transform_3(%arg0: i32) -> (i32, i32) {
    %c0_i32 = arith.constant 0 : i32
    %c0_i32_0 = arith.constant 0 : i32
    %c0_i32_1 = arith.constant 0 : i32
    return %c0_i32, %c0_i32_0 : i32, i32
  }
  func.func @transform_4(%arg0: i32) -> (i32, i32) {
    %c0_i32 = arith.constant 0 : i32
    %c0_i32_0 = arith.constant 0 : i32
    %c0_i32_1 = arith.constant 0 : i32
    return %c0_i32, %c0_i32_0 : i32, i32
  }
  func.func @transform_5(%arg0: i32) -> (i32, i32) {
    %c0_i32 = arith.constant 0 : i32
    %c0_i32_0 = arith.constant 0 : i32
    %c0_i32_1 = arith.constant 0 : i32
    return %c0_i32, %c0_i32_0 : i32, i32
  }
  func.func @transform_6(%arg0: i32) -> (i32, i32) {
    %c0_i32 = arith.constant 0 : i32
    %c0_i32_0 = arith.constant 0 : i32
    %c0_i32_1 = arith.constant 0 : i32
    return %c0_i32, %c0_i32_0 : i32, i32
  }
  func.func @transform_7(%arg0: i32) -> (i32, i32) {
    %c0_i32 = arith.constant 0 : i32
    %c0_i32_0 = arith.constant 0 : i32
    %c0_i32_1 = arith.constant 0 : i32
    return %c0_i32, %c0_i32_0 : i32, i32
  }
  func.func @transform_8(%arg0: i32) -> (i32, i32) {
    %c0_i32 = arith.constant 0 : i32
    %c0_i32_0 = arith.constant 0 : i32
    %c0_i32_1 = arith.constant 0 : i32
    return %c0_i32, %c0_i32_0 : i32, i32
  }
  func.func @transform_9(%arg0: i32) -> (i32, i32) {
    %c0_i32 = arith.constant 0 : i32
    %c0_i32_0 = arith.constant 0 : i32
    return %arg0, %c0_i32 : i32, i32
  }
}

</mosaic_0001>

<bundles_post_ra>
// kernel: mnist_forward.3
= control target key start
LH: loop header
LB: loop body
LE: loop exit
PB: predicated region body
PF: predicated region fallthrough
CT: control target
= control target key end

     0   :  { %s1847_s12 = smov 0   ;;  %s1849_s13 = smov 0   ;;  %s2173_s0 = inlined_call_operand.vmem [shape: bf16[4,288,32], index: 0, kind: input, shape index: {}]   ;;  %s2174_s1 = inlined_call_operand.vmem [shape: bf16[32,128], index: 1, kind: input, shape index: {}]   ;;  %s2175_s2 = inlined_call_operand.vmem [shape: f32[1,128], index: 2, kind: input, shape index: {}]   ;;  %s2176_s3 = inlined_call_operand.vmem [shape: bf16[288,128], index: 3, kind: output, shape index: {}]  }
   0x1   :  { %s1851_s14 = smov 0  }
   0x2 LB: > { %s1447_s15 = sadd.s32 4294967295, %s1825_s14   ;;  %s1864_s16 = sadd.s32 1, %s1825_s14   ;;  %s1825_s14 = sphi %s1851_s14, %s2179_s14   ;;  %s1821_s13 = sphi %s1849_s13, %s2178_s13   ;;  %s1817_s12 = sphi %s1847_s12, %s2177_s12  }
   0x3   : > { %s17_s17 = ssub.s32 %s1825_s14, %s1864_s16  ;;  %s20_s18 = sadd.s32 1, %s1821_s13 }
   0x4   : > { %p18_p0 = scmp.eq.s32.totalorder %s17_s17, 0  ;;  %p27_p1 = scmp.ne.s32.totalorder %s1821_s13, %s1817_s12 }
   0x5   : > { %p28_p2 = scmp.eq.s32.totalorder %s1825_s14, 0  ;;  %p1450_p4 = scmp.ge.s32.totalorder %s1825_s14, 2 }
   0x6   : > { %s1873_s19 = scalar_select %p18_p0, %s1821_s13, %s20_s18  }
   0x7   : > { %p29_p3 = por %p28_p2, %p27_p1  ;;  %127 = sbr.rel (%p1450_p4) target bundleno = 37 (0x25), region = 24 }
   0xe   : > { %130 = sbr.rel (!%p29_p3) target bundleno = 37 (0x25), region = 28  ;;  %s132_s20 = sand.u32 (%p29_p3), 1, %s1821_s13  }
   0xf   : > { %s1549_s21 = smul.u32 (%p29_p3), 72, %s1825_s14 }
  0x10   : > { %s1739_s22 = smul.u32 (%p29_p3), 288, %s132_s20 }
  0x11   : > { %s1881_s25 = scalar_lea.vmem (%p29_p3), %s2173_s0, %s1549_s21 }
  0x12   : > { %v153_v0 = vld [vmem:[%s1881_s25] sm:$0xff] (%p29_p3)   ;;  %v157_v1 = vld [vmem:[%s1881_s25 + $0x8] sm:$0xff] (%p29_p3)   ;;  %v161_v2 = vld [vmem:[%s1881_s25 + $0x10] sm:$0xff] (%p29_p3)   ;;  %s1886_s26 = scalar_lea.vmem (%p29_p3), [#allocation2], %s1739_s22 }
  0x13   : > { %154 = vst [vmem:[%s1886_s26] sm:$0xff] (%p29_p3), %v153_v0   ;;  %158 = vst [vmem:[%s1886_s26 + $0x8] sm:$0xff] (%p29_p3), %v157_v1   ;;  %v165_v3 = vld [vmem:[%s1881_s25 + $0x18] sm:$0xff] (%p29_p3)   ;;  %v169_v4 = vld [vmem:[%s1881_s25 + $0x20] sm:$0xff] (%p29_p3)  }
  0x14   : > { %162 = vst [vmem:[%s1886_s26 + $0x10] sm:$0xff] (%p29_p3), %v161_v2   ;;  %v173_v5 = vld [vmem:[%s1881_s25 + $0x28] sm:$0xff] (%p29_p3)   ;;  %166 = vst [vmem:[%s1886_s26 + $0x18] sm:$0xff] (%p29_p3), %v165_v3   ;;  %v177_v6 = vld [vmem:[%s1881_s25 + $0x30] sm:$0xff] (%p29_p3)  }
  0x15   : > { %170 = vst [vmem:[%s1886_s26 + $0x20] sm:$0xff] %v169_v4   ;;  %174 = vst [vmem:[%s1886_s26 + $0x28] sm:$0xff] %v173_v5   ;;  %v181_v7 = vld [vmem:[%s1881_s25 + $0x38] sm:$0xff]   ;;  %v185_v8 = vld [vmem:[%s1881_s25 + $0x40] sm:$0xff]  }
  0x16   : > { %178 = vst [vmem:[%s1886_s26 + $0x30] sm:$0xff] %v177_v6   ;;  %182 = vst [vmem:[%s1886_s26 + $0x38] sm:$0xff] %v181_v7   ;;  %v189_v9 = vld [vmem:[%s1881_s25 + $0x90] sm:$0xff]   ;;  %v193_v10 = vld [vmem:[%s1881_s25 + $0x98] sm:$0xff]  }
  0x17   : > { %186 = vst [vmem:[%s1886_s26 + $0x40] sm:$0xff] %v185_v8   ;;  %v197_v11 = vld [vmem:[%s1881_s25 + $0xa0] sm:$0xff]   ;;  %190 = vst [vmem:[%s1886_s26 + $0x48] sm:$0xff] %v189_v9   ;;  %v201_v12 = vld [vmem:[%s1881_s25 + $0xa8] sm:$0xff]  }
  0x18   : > { %194 = vst [vmem:[%s1886_s26 + $0x50] sm:$0xff] %v193_v10   ;;  %198 = vst [vmem:[%s1886_s26 + $0x58] sm:$0xff] %v197_v11   ;;  %v205_v13 = vld [vmem:[%s1881_s25 + $0xb0] sm:$0xff]   ;;  %v209_v14 = vld [vmem:[%s1881_s25 + $0xb8] sm:$0xff]  }
  0x19   : > { %202 = vst [vmem:[%s1886_s26 + $0x60] sm:$0xff] %v201_v12   ;;  %206 = vst [vmem:[%s1886_s26 + $0x68] sm:$0xff] %v205_v13   ;;  %v213_v15 = vld [vmem:[%s1881_s25 + $0xc0] sm:$0xff]   ;;  %v217_v16 = vld [vmem:[%s1881_s25 + $0xc8] sm:$0xff]  }
  0x1a   : > { %210 = vst [vmem:[%s1886_s26 + $0x70] sm:$0xff] %v209_v14   ;;  %v221_v17 = vld [vmem:[%s1881_s25 + $0xd0] sm:$0xff]   ;;  %214 = vst [vmem:[%s1886_s26 + $0x78] sm:$0xff] %v213_v15   ;;  %v225_v18 = vld [vmem:[%s1881_s25 + $0x120] sm:$0xff]  }
  0x1b   : > { %218 = vst [vmem:[%s1886_s26 + $0x80] sm:$0xff] %v217_v16   ;;  %222 = vst [vmem:[%s1886_s26 + $0x88] sm:$0xff] %v221_v17   ;;  %v229_v19 = vld [vmem:[%s1881_s25 + $0x128] sm:$0xff]   ;;  %v233_v20 = vld [vmem:[%s1881_s25 + $0x130] sm:$0xff]  }
  0x1c   : > { %226 = vst [vmem:[%s1886_s26 + $0x90] sm:$0xff] %v225_v18   ;;  %230 = vst [vmem:[%s1886_s26 + $0x98] sm:$0xff] %v229_v19   ;;  %v237_v21 = vld [vmem:[%s1881_s25 + $0x138] sm:$0xff]   ;;  %v241_v22 = vld [vmem:[%s1881_s25 + $0x140] sm:$0xff]  }
  0x1d   : > { %234 = vst [vmem:[%s1886_s26 + $0xa0] sm:$0xff] %v233_v20   ;;  %v245_v23 = vld [vmem:[%s1881_s25 + $0x148] sm:$0xff]   ;;  %238 = vst [vmem:[%s1886_s26 + $0xa8] sm:$0xff] %v237_v21   ;;  %v249_v24 = vld [vmem:[%s1881_s25 + $0x150] sm:$0xff]  }
  0x1e   : > { %242 = vst [vmem:[%s1886_s26 + $0xb0] sm:$0xff] %v241_v22   ;;  %246 = vst [vmem:[%s1886_s26 + $0xb8] sm:$0xff] %v245_v23   ;;  %v253_v25 = vld [vmem:[%s1881_s25 + $0x158] sm:$0xff]   ;;  %v257_v26 = vld [vmem:[%s1881_s25 + $0x160] sm:$0xff]  }
  0x1f   : > { %250 = vst [vmem:[%s1886_s26 + $0xc0] sm:$0xff] %v249_v24   ;;  %254 = vst [vmem:[%s1886_s26 + $0xc8] sm:$0xff] %v253_v25   ;;  %v261_v27 = vld [vmem:[%s1881_s25 + $0x1b0] sm:$0xff]   ;;  %v265_v28 = vld [vmem:[%s1881_s25 + $0x1b8] sm:$0xff]  }
  0x20   : > { %258 = vst [vmem:[%s1886_s26 + $0xd0] sm:$0xff] %v257_v26   ;;  %v269_v29 = vld [vmem:[%s1881_s25 + $0x1c0] sm:$0xff]   ;;  %262 = vst [vmem:[%s1886_s26 + $0xd8] sm:$0xff] %v261_v27   ;;  %v273_v30 = vld [vmem:[%s1881_s25 + $0x1c8] sm:$0xff]  }
  0x21   : > { %266 = vst [vmem:[%s1886_s26 + $0xe0] sm:$0xff] %v265_v28   ;;  %270 = vst [vmem:[%s1886_s26 + $0xe8] sm:$0xff] %v269_v29   ;;  %v277_v31 = vld [vmem:[%s1881_s25 + $0x1d0] sm:$0xff]   ;;  %v281_v32 = vld [vmem:[%s1881_s25 + $0x1d8] sm:$0xff]  }
  0x22   : > { %274 = vst [vmem:[%s1886_s26 + $0xf0] sm:$0xff] %v273_v30   ;;  %278 = vst [vmem:[%s1886_s26 + $0xf8] sm:$0xff] %v277_v31   ;;  %v285_v33 = vld [vmem:[%s1881_s25 + $0x1e0] sm:$0xff]   ;;  %v289_v34 = vld [vmem:[%s1881_s25 + $0x1e8] sm:$0xff]  }
  0x23   : > { %282 = vst [vmem:[%s1886_s26 + $0x100] sm:$0xff] %v281_v32   ;;  %v293_v35 = vld [vmem:[%s1881_s25 + $0x1f0] sm:$0xff]   ;;  %286 = vst [vmem:[%s1886_s26 + $0x108] sm:$0xff] %v285_v33  }
  0x24   : > { %290 = vst [vmem:[%s1886_s26 + $0x110] sm:$0xff] %v289_v34   ;;  %294 = vst [vmem:[%s1886_s26 + $0x118] sm:$0xff] %v293_v35  }
  0x25 PF: > { %p1452_p5 = scmp.ge.s32.totalorder %s1825_s14, 1  ;;  %p462_p6 = scmp.lt.s32.totalorder %s1825_s14, 3 }
  0x27   : > { %p463_p7 = pnand %p1452_p5, %p462_p6 }
  0x28   : > { %v1765_v36 = vld [vmem:[%s2174_s1] sm:$0xff] (!%p463_p7)   ;;  %s469_s29 = sand.u32 (!%p463_p7), 1, %s1817_s12   ;;  %v1766_v37 = vld [vmem:[%s2174_s1 + $0x8] sm:$0xff] (!%p463_p7)   ;;  %vm768_vm0 = vcmask (!%p463_p7), 261120   ;;  %s493_s7 = smul.u32 (!%p463_p7), 18, %s1447_s15 }
  0x29   : > { %466 = sbr.rel (%p463_p7) target bundleno = 341 (0x155), region = 69  ;;  %1659 = vmatprep.subr.bf16.mxu0 (!%p463_p7), %v1765_v36  ;;  %1735 = vmatprep.subr.bf16.mxu1 (!%p463_p7), %v1765_v36 }
  0x2a   : > { %s1740_s5 = smul.u32 (!%p463_p7), 288, %s469_s29  ;;  %1660 = vmatpush3.bf16.msra.mxu0 (!%p463_p7), %v1765_v36  ;;  %1737 = vmatpush3.bf16.msra.mxu1 (!%p463_p7), %v1765_v36  ;;  %p494_p8 = scmp.lt.s32.totalorder (!%p463_p7), %s493_s7, 35 }
  0x2b   : > { %1661 = vmatprep.subr.bf16.mxu0 (!%p463_p7), %v1766_v37  ;;  %1736 = vmatprep.subr.bf16.mxu1 (!%p463_p7), %v1766_v37 }
  0x2c   : > { %s1966_s6 = scalar_lea.vmem (!%p463_p7), [#allocation2], %s1740_s5 }
  0x2d   : > { %v1767_v38 = vld [vmem:[%s1966_s6] sm:$0xff] (!%p463_p7)   ;;  %v1768_v39 = vld [vmem:[%s1966_s6 + $0x8] sm:$0xff] (!%p463_p7)   ;;  %v1769_v40 = vld [vmem:[%s1966_s6 + $0x90] sm:$0xff] (!%p463_p7)  }
  0x2e   : > { %1663 = vmatprep.mubr.msk.bf16.mxu0 (!%p463_p7), %vm768_vm0, %v1767_v38  ;;  %1662 = vmatpush3.bf16.msra.mxu0 (!%p463_p7), %v1766_v37  ;;  %v1770_v41 = vld [vmem:[%s1966_s6 + $0x98] sm:$0xff] (!%p463_p7)   ;;  %v1771_v42 = vld [vmem:[%s1966_s6 + $0x10] sm:$0xff] (!%p463_p7)   ;;  %v1773_v43 = vld [vmem:[%s1966_s6 + $0xa0] sm:$0xff] (!%p463_p7)  }
  0x2f   : > { %1738 = vmatpush3.bf16.msra.mxu1 (!%p463_p7), %v1766_v37  ;;  %1699 = vmatprep.mubr.msk.bf16.mxu1 (!%p463_p7), %vm768_vm0, %v1769_v40  ;;  %v1772_v44 = vld [vmem:[%s1966_s6 + $0x18] sm:$0xff] (!%p463_p7)   ;;  %v1774_v45 = vld [vmem:[%s1966_s6 + $0xa8] sm:$0xff] (!%p463_p7)   ;;  %v1775_v46 = vld [vmem:[%s1966_s6 + $0x20] sm:$0xff] (!%p463_p7)  }
  0x30   : > { %v1777_v47 = vld [vmem:[%s1966_s6 + $0xb0] sm:$0xff]   ;;  %v1776_v48 = vld [vmem:[%s1966_s6 + $0x28] sm:$0xff]   ;;  %v1778_v49 = vld [vmem:[%s1966_s6 + $0xb8] sm:$0xff]   ;;  %s2181_s7 = smov (!%p494_p8, %s493_s7), 35 }
  0x31   : > { %1664 = vmatmul.mubr.msk.bf16.vlgmr.msra.gmra.mrb[0].mxu0 %vm768_vm0, %v1768_v39  ;;  %v1779_v50 = vld [vmem:[%s1966_s6 + $0x30] sm:$0xff]   ;;  %v1781_v51 = vld [vmem:[%s1966_s6 + $0xc0] sm:$0xff]   ;;  %v1780_v52 = vld [vmem:[%s1966_s6 + $0x38] sm:$0xff]   ;;  %s1453_s10 = sshll.u32 %s2181_s7, 2 }
  0x32   : > { %1700 = vmatmul.mubr.msk.bf16.vlgmr.msra.gmra.mrb[0].mxu1 %vm768_vm0, %v1770_v41  ;;  %1667 = vmatprep.mubr.msk.bf16.mxu0 %vm768_vm0, %v1771_v42  ;;  %v1782_v53 = vld [vmem:[%s1966_s6 + $0xc8] sm:$0xff]   ;;  %v1783_v54 = vld [vmem:[%s1966_s6 + $0x40] sm:$0xff]   ;;  %v1785_v55 = vld [vmem:[%s1966_s6 + $0xd0] sm:$0xff]   ;;  %s2109_s14 = scalar_lea.vmem %s2176_s3, %s1453_s10 }
  0x33   : > { %1703 = vmatprep.mubr.msk.bf16.mxu1 %vm768_vm0, %v1773_v43  ;;  %v1784_v56 = vld [vmem:[%s1966_s6 + $0x48] sm:$0xff]   ;;  %v1786_v57 = vld [vmem:[%s1966_s6 + $0xd8] sm:$0xff]   ;;  %v1787_v58 = vld [vmem:[%s1966_s6 + $0x50] sm:$0xff]  }
  0x34   : > { %v1789_v59 = vld [vmem:[%s1966_s6 + $0xe0] sm:$0xff]   ;;  %v1788_v60 = vld [vmem:[%s1966_s6 + $0x58] sm:$0xff]   ;;  %v1790_v61 = vld [vmem:[%s1966_s6 + $0xe8] sm:$0xff]  }
  0x35   : > { %v1791_v62 = vld [vmem:[%s1966_s6 + $0x60] sm:$0xff]   ;;  %v1793_v63 = vld [vmem:[%s1966_s6 + $0xf0] sm:$0xff]   ;;  %v1792_v0 = vld [vmem:[%s1966_s6 + $0x68] sm:$0xff]  }
  0x36   : > { %v1794_v1 = vld [vmem:[%s1966_s6 + $0xf8] sm:$0xff]   ;;  %v1795_v2 = vld [vmem:[%s1966_s6 + $0x70] sm:$0xff]   ;;  %v1797_v3 = vld [vmem:[%s1966_s6 + $0x100] sm:$0xff]  }
  0x37   : > { %v1796_v4 = vld [vmem:[%s1966_s6 + $0x78] sm:$0xff]   ;;  %v1798_v5 = vld [vmem:[%s1966_s6 + $0x108] sm:$0xff]   ;;  %v1799_v6 = vld [vmem:[%s1966_s6 + $0x80] sm:$0xff]  }
  0x38   : > { %v1801_v7 = vld [vmem:[%s1966_s6 + $0x110] sm:$0xff]   ;;  %v1800_v8 = vld [vmem:[%s1966_s6 + $0x88] sm:$0xff]   ;;  %v1802_v9 = vld [vmem:[%s1966_s6 + $0x118] sm:$0xff]  }
  0x39   : > { %1668 = vmatmul.mubr.msk.bf16.gmra.mrb[4].mxu0 %vm768_vm0, %v1772_v44 }
  0x3a   : > { %1704 = vmatmul.mubr.msk.bf16.gmra.mrb[4].mxu1 %vm768_vm0, %v1774_v45  ;;  %1671 = vmatprep.mubr.msk.bf16.mxu0 %vm768_vm0, %v1775_v46 }
  0x3b   : > { %1707 = vmatprep.mubr.msk.bf16.mxu1 %vm768_vm0, %v1777_v47 }
  0x41   : > { %1672 = vmatmul.mubr.msk.bf16.gmra.mrb[8].mxu0 %vm768_vm0, %v1776_v48 }
  0x42   : > { %1708 = vmatmul.mubr.msk.bf16.gmra.mrb[8].mxu1 %vm768_vm0, %v1778_v49  ;;  %1675 = vmatprep.mubr.msk.bf16.mxu0 %vm768_vm0, %v1779_v50 }
  0x43   : > { %1711 = vmatprep.mubr.msk.bf16.mxu1 %vm768_vm0, %v1781_v51 }
  0x49   : > { %1676 = vmatmul.mubr.msk.bf16.gmra.mrb[12].mxu0 %vm768_vm0, %v1780_v52 }
  0x4a   : > { %1712 = vmatmul.mubr.msk.bf16.gmra.mrb[12].mxu1 %vm768_vm0, %v1782_v53  ;;  %1679 = vmatprep.mubr.msk.bf16.mxu0 %vm768_vm0, %v1783_v54  ;;  %v2101_v53 = vld [vmem:[%s2175_s2] ss:$0 sm:$0xff] }
  0x4b   : > { %1715 = vmatprep.mubr.msk.bf16.mxu1 %vm768_vm0, %v1785_v55 }
  0x51   : > { %1680 = vmatmul.mubr.msk.bf16.gmra.mrb[16].mxu0 %vm768_vm0, %v1784_v56 }
  0x52   : > { %1716 = vmatmul.mubr.msk.bf16.gmra.mrb[16].mxu1 %vm768_vm0, %v1786_v57  ;;  %1683 = vmatprep.mubr.msk.bf16.mxu0 %vm768_vm0, %v1787_v58 }
  0x53   : > { %1719 = vmatprep.mubr.msk.bf16.mxu1 %vm768_vm0, %v1789_v59 }
  0x59   : > { %1684 = vmatmul.mubr.msk.bf16.gmra.mrb[20].mxu0 %vm768_vm0, %v1788_v60 }
  0x5a   : > { %1720 = vmatmul.mubr.msk.bf16.gmra.mrb[20].mxu1 %vm768_vm0, %v1790_v61  ;;  %1687 = vmatprep.mubr.msk.bf16.mxu0 %vm768_vm0, %v1791_v62 }
  0x5b   : > { %1723 = vmatprep.mubr.msk.bf16.mxu1 %vm768_vm0, %v1793_v63 }
  0x61   : > { %1688 = vmatmul.mubr.msk.bf16.gmra.mrb[24].mxu0 %vm768_vm0, %v1792_v0 }
  0x62   : > { %1724 = vmatmul.mubr.msk.bf16.gmra.mrb[24].mxu1 %vm768_vm0, %v1794_v1  ;;  %1691 = vmatprep.mubr.msk.bf16.mxu0 %vm768_vm0, %v1795_v2 }
  0x63   : > { %1727 = vmatprep.mubr.msk.bf16.mxu1 %vm768_vm0, %v1797_v3 }
  0x69   : > { %1692 = vmatmul.mubr.msk.bf16.gmra.mrb[28].mxu0 %vm768_vm0, %v1796_v4 }
  0x6a   : > { %1728 = vmatmul.mubr.msk.bf16.gmra.mrb[28].mxu1 %vm768_vm0, %v1798_v5  ;;  %1695 = vmatprep.mubr.msk.bf16.mxu0 %vm768_vm0, %v1799_v6 }
  0x6b   : > { %1731 = vmatprep.mubr.msk.bf16.mxu1 %vm768_vm0, %v1801_v7 }
  0x71   : > { %1696 = vmatmul.mubr.msk.bf16.gmra.mrb[32].mxu0 %vm768_vm0, %v1800_v8 }
  0x72   : > { %1732 = vmatmul.mubr.msk.bf16.gmra.mrb[32].mxu1 %vm768_vm0, %v1802_v9 }
 0x104   : > { %v2040_v10 = vpop.f32.mrb[0].mxu0 }
 0x105   : > { %v2042_v11 = vpop.f32.mrb[0].mxu1  ;;  %v911_v12 = vpop.f32.mrb[1].mxu0 }
 0x106   : > { %v1055_v13 = vpop.f32.mrb[1].mxu1  ;;  %v2044_v14 = vpop.f32.mrb[2].mxu0 }
 0x107   : > { %v2046_v15 = vpop.f32.mrb[2].mxu1  ;;  %v914_v16 = vpop.f32.mrb[3].mxu0 }
 0x108   : > { %v1058_v17 = vpop.f32.mrb[3].mxu1 }
 0x10c   : > { %v2048_v18 = vpop.f32.mrb[4].mxu0 }
 0x10d   : > { %v2050_v19 = vpop.f32.mrb[4].mxu1  ;;  %v927_v20 = vpop.f32.mrb[5].mxu0 }
 0x10e   : > { %v1071_v21 = vpop.f32.mrb[5].mxu1  ;;  %v2052_v22 = vpop.f32.mrb[6].mxu0 }
 0x10f   : > { %v2054_v23 = vpop.f32.mrb[6].mxu1  ;;  %v930_v24 = vpop.f32.mrb[7].mxu0 }
 0x110   : > { %v1074_v25 = vpop.f32.mrb[7].mxu1 }
 0x114   : > { %v2056_v26 = vpop.f32.mrb[8].mxu0 }
 0x115   : > { %v2058_v27 = vpop.f32.mrb[8].mxu1  ;;  %v2060_v28 = vpop.f32.mrb[9].mxu0 }
 0x116   : > { %v2062_v29 = vpop.f32.mrb[9].mxu1  ;;  %v2064_v30 = vpop.f32.mrb[10].mxu0 }
 0x117   : > { %v2066_v31 = vpop.f32.mrb[10].mxu1  ;;  %v2068_v32 = vpop.f32.mrb[11].mxu0 }
 0x118   : > { %v2070_v33 = vpop.f32.mrb[11].mxu1 }
 0x11c   : > { %v2072_v34 = vpop.f32.mrb[12].mxu0 }
 0x11d   : > { %v2074_v35 = vpop.f32.mrb[12].mxu1  ;;  %v2076_v36 = vpop.f32.mrb[13].mxu0 }
 0x11e   : > { %v2078_v37 = vpop.f32.mrb[13].mxu1  ;;  %v2080_v38 = vpop.f32.mrb[14].mxu0 }
 0x11f   : > { %v2082_v39 = vpop.f32.mrb[14].mxu1  ;;  %v2084_v40 = vpop.f32.mrb[15].mxu0 }
 0x120   : > { %v2086_v41 = vpop.f32.mrb[15].mxu1 }
 0x124   : > { %v1681_v42 = vpop.f32.mrb[16].mxu0 }
 0x125   : > { %v1717_v43 = vpop.f32.mrb[16].mxu1  ;;  %v1198_v44 = vmax.f32 %v911_v12, %v1681_v42  ;;  %v2090_v45 = vpop.f32.mrb[17].mxu0 }
 0x126   : > { %v2092_v46 = vpop.f32.mrb[17].mxu1  ;;  %v1682_v47 = vpop.f32.mrb[18].mxu0 }
 0x127   : > { %v1718_v48 = vpop.f32.mrb[18].mxu1  ;;  %v1216_v49 = vmax.f32 %v1198_v44, %v1055_v13  ;;  %v1199_v50 = vmax.f32 %v914_v16, %v1682_v47  ;;  %v2094_v51 = vpop.f32.mrb[19].mxu0 }
 0x128   : > { %v2096_v52 = vpop.f32.mrb[19].mxu1 }
 0x129   : > { %v1234_v54 = vmax.f32 %v1216_v49, %v1717_v43  ;;  %v1217_v55 = vmax.f32 %v1199_v50, %v1058_v17 }
 0x12b   : > { %v1259_v56 = vadd.f32 %v2101_v53, %v1234_v54  ;;  %v1235_v57 = vmax.f32 %v1217_v55, %v1718_v48 }
 0x12c   : > { %v1685_v58 = vpop.f32.mrb[20].mxu0 }
 0x12d   : > { %v1721_v59 = vpop.f32.mrb[20].mxu1  ;;  %v1260_v60 = vadd.f32 %v2101_v53, %v1235_v57  ;;  %v1202_v61 = vmax.f32 %v927_v20, %v1685_v58  ;;  %v991_v62 = vpop.f32.mrb[21].mxu0  ;;  %v1277_v3 = vmax.f32 %v1259_v56, 0.0 }
 0x12e   : > { %v1135_v63 = vpop.f32.mrb[21].mxu1  ;;  %v1200_v0 = vmax.f32 %v2040_v10, %v991_v62  ;;  %v1686_v1 = vpop.f32.mrb[22].mxu0 }
 0x12f   : > { %v1722_v2 = vpop.f32.mrb[22].mxu1  ;;  %v1278_v4 = vmax.f32 %v1260_v60, 0.0  ;;  %v1220_v5 = vmax.f32 %v1202_v61, %v1071_v21  ;;  %v1203_v6 = vmax.f32 %v930_v24, %v1686_v1  ;;  %v994_v7 = vpop.f32.mrb[23].mxu0 }
 0x130   : > { %v1138_v8 = vpop.f32.mrb[23].mxu1  ;;  %v1218_v9 = vmax.f32 %v1200_v0, %v2042_v11  ;;  %v1201_v12 = vmax.f32 %v2044_v14, %v994_v7 }
 0x131   : > { %v1571_v13 = vpack.c.bf16 %v1278_v4, %v1277_v3  ;;  %v1238_v10 = vmax.f32 %v1220_v5, %v1721_v59  ;;  %v1221_v16 = vmax.f32 %v1203_v6, %v1074_v25 }
 0x132   : > { %v1236_v17 = vmax.f32 %v1218_v9, %v1135_v63  ;;  %v1219_v20 = vmax.f32 %v1201_v12, %v2046_v15 }
 0x133   : > { %1572 = vst [vmem:[%s2109_s14] sm:$0xff] %v1571_v13   ;;  %v1263_v21 = vadd.f32 %v2101_v53, %v1238_v10  ;;  %v1239_v24 = vmax.f32 %v1221_v16, %v1722_v2 }
 0x134   : > { %v1261_v42 = vadd.f32 %v2101_v53, %v1236_v17  ;;  %v1237_v43 = vmax.f32 %v1219_v20, %v1138_v8  ;;  %v1689_v44 = vpop.f32.mrb[24].mxu0 }
 0x135   : > { %v1725_v47 = vpop.f32.mrb[24].mxu1  ;;  %v1264_v48 = vadd.f32 %v2101_v53, %v1239_v24  ;;  %v1206_v11 = vmax.f32 %v2060_v28, %v1689_v44  ;;  %v1007_v14 = vpop.f32.mrb[25].mxu0  ;;  %v1281_v55 = vmax.f32 %v1263_v21, 0.0 }
 0x136   : > { %v1151_v49 = vpop.f32.mrb[25].mxu1  ;;  %v1262_v25 = vadd.f32 %v2101_v53, %v1237_v43  ;;  %v1204_v50 = vmax.f32 %v2048_v18, %v1007_v14  ;;  %v1690_v15 = vpop.f32.mrb[26].mxu0  ;;  %v1279_v61 = vmax.f32 %v1261_v42, 0.0 }
 0x137   : > { %v1726_v54 = vpop.f32.mrb[26].mxu1  ;;  %v1282_v56 = vmax.f32 %v1264_v48, 0.0  ;;  %v1224_v57 = vmax.f32 %v1206_v11, %v2062_v29  ;;  %v1207_v58 = vmax.f32 %v2068_v32, %v1690_v15  ;;  %v1010_v59 = vpop.f32.mrb[27].mxu0 }
 0x138   : > { %v1154_v60 = vpop.f32.mrb[27].mxu1  ;;  %v1280_v28 = vmax.f32 %v1262_v25, 0.0  ;;  %v1222_v62 = vmax.f32 %v1204_v50, %v2050_v19  ;;  %v1205_v63 = vmax.f32 %v2052_v22, %v1010_v59 }
 0x139   : > { %v1581_v0 = vpack.c.bf16 %v1282_v56, %v1281_v55  ;;  %v1242_v18 = vmax.f32 %v1224_v57, %v1725_v47  ;;  %v1225_v1 = vmax.f32 %v1207_v58, %v2070_v33 }
 0x13a   : > { %v1576_v2 = vpack.c.bf16 %v1280_v28, %v1279_v61  ;;  %v1240_v3 = vmax.f32 %v1222_v62, %v1151_v49  ;;  %v1223_v4 = vmax.f32 %v1205_v63, %v2054_v23 }
 0x13b   : > { %1614 = vst [vmem:[%s2109_s14 + $0x10] sm:$0xff] %v1581_v0   ;;  %v1267_v29 = vadd.f32 %v2101_v53, %v1242_v18  ;;  %v1243_v32 = vmax.f32 %v1225_v1, %v1726_v54 }
 0x13c   : > { %1613 = vst [vmem:[%s2109_s14 + $0x8] sm:$0xff] %v1576_v2   ;;  %v1265_v5 = vadd.f32 %v2101_v53, %v1240_v3  ;;  %v1241_v6 = vmax.f32 %v1223_v4, %v1154_v60  ;;  %v1693_v7 = vpop.f32.mrb[28].mxu0 }
 0x13d   : > { %v1729_v19 = vpop.f32.mrb[28].mxu1  ;;  %v1268_v22 = vadd.f32 %v2101_v53, %v1243_v32  ;;  %v1210_v8 = vmax.f32 %v2076_v36, %v1693_v7  ;;  %v1023_v9 = vpop.f32.mrb[29].mxu0  ;;  %v1285_v16 = vmax.f32 %v1267_v29, 0.0 }
 0x13e   : > { %v1167_v33 = vpop.f32.mrb[29].mxu1  ;;  %v1266_v12 = vadd.f32 %v2101_v53, %v1241_v6  ;;  %v1208_v23 = vmax.f32 %v2056_v26, %v1023_v9  ;;  %v1694_v13 = vpop.f32.mrb[30].mxu0  ;;  %v1283_v43 = vmax.f32 %v1265_v5, 0.0 }
 0x13f   : > { %v1730_v10 = vpop.f32.mrb[30].mxu1  ;;  %v1286_v17 = vmax.f32 %v1268_v22, 0.0  ;;  %v1228_v20 = vmax.f32 %v1210_v8, %v2078_v37  ;;  %v1211_v21 = vmax.f32 %v2084_v40, %v1694_v13  ;;  %v1026_v24 = vpop.f32.mrb[31].mxu0 }
 0x140   : > { %v1170_v42 = vpop.f32.mrb[31].mxu1  ;;  %v1284_v36 = vmax.f32 %v1266_v12, 0.0  ;;  %v1226_v44 = vmax.f32 %v1208_v23, %v2058_v27  ;;  %v1209_v47 = vmax.f32 %v2064_v30, %v1026_v24 }
 0x141   : > { %v1591_v48 = vpack.c.bf16 %v1286_v17, %v1285_v16  ;;  %v1246_v26 = vmax.f32 %v1228_v20, %v1729_v19  ;;  %v1229_v11 = vmax.f32 %v1211_v21, %v2086_v41 }
 0x142   : > { %v1586_v14 = vpack.c.bf16 %v1284_v36, %v1283_v43  ;;  %v1244_v49 = vmax.f32 %v1226_v44, %v1167_v33  ;;  %v1227_v25 = vmax.f32 %v1209_v47, %v2066_v31 }
 0x143   : > { %1616 = vst [vmem:[%s2109_s14 + $0x20] sm:$0xff] %v1591_v48   ;;  %v1271_v37 = vadd.f32 %v2101_v53, %v1246_v26  ;;  %v1247_v40 = vmax.f32 %v1229_v11, %v1730_v10 }
 0x144   : > { %1615 = vst [vmem:[%s2109_s14 + $0x18] sm:$0xff] %v1586_v14   ;;  %v1269_v50 = vadd.f32 %v2101_v53, %v1244_v49  ;;  %v1245_v15 = vmax.f32 %v1227_v25, %v1170_v42  ;;  %v1697_v54 = vpop.f32.mrb[32].mxu0 }
 0x145   : > { %v1733_v27 = vpop.f32.mrb[32].mxu1  ;;  %v1272_v30 = vadd.f32 %v2101_v53, %v1247_v40  ;;  %v1214_v55 = vmax.f32 %v2090_v45, %v1697_v54  ;;  %v1039_v56 = vpop.f32.mrb[33].mxu0  ;;  %v1289_v60 = vmax.f32 %v1271_v37, 0.0 }
 0x146   : > { %v1183_v41 = vpop.f32.mrb[33].mxu1  ;;  %v1270_v57 = vadd.f32 %v2101_v53, %v1245_v15  ;;  %v1212_v31 = vmax.f32 %v2072_v34, %v1039_v56  ;;  %v1698_v58 = vpop.f32.mrb[34].mxu0  ;;  %v1287_v18 = vmax.f32 %v1269_v50, 0.0 }
 0x147   : > { %v1734_v59 = vpop.f32.mrb[34].mxu1  ;;  %v1290_v61 = vmax.f32 %v1272_v30, 0.0  ;;  %v1232_v28 = vmax.f32 %v1214_v55, %v2092_v46  ;;  %v1215_v62 = vmax.f32 %v2094_v51, %v1698_v58  ;;  %v1042_v63 = vpop.f32.mrb[35].mxu0 }
 0x148   : > { %v1186_v0 = vpop.f32.mrb[35].mxu1  ;;  %v1288_v45 = vmax.f32 %v1270_v57, 0.0  ;;  %v1230_v1 = vmax.f32 %v1212_v31, %v2074_v35  ;;  %v1213_v2 = vmax.f32 %v2080_v38, %v1042_v63 }
 0x149   : > { %v1601_v3 = vpack.c.bf16 %v1290_v61, %v1289_v60  ;;  %v1250_v34 = vmax.f32 %v1232_v28, %v1733_v27  ;;  %v1233_v4 = vmax.f32 %v1215_v62, %v2096_v52 }
 0x14a   : > { %v1596_v29 = vpack.c.bf16 %v1288_v45, %v1287_v18  ;;  %v1248_v32 = vmax.f32 %v1230_v1, %v1183_v41  ;;  %v1231_v46 = vmax.f32 %v1213_v2, %v2082_v39 }
 0x14b   : > { %1618 = vst [vmem:[%s2109_s14 + $0x30] sm:$0xff] %v1601_v3   ;;  %v1275_v51 = vadd.f32 %v2101_v53, %v1250_v34  ;;  %v1251_v5 = vmax.f32 %v1233_v4, %v1734_v59 }
 0x14c   : > { %1617 = vst [vmem:[%s2109_s14 + $0x28] sm:$0xff] %v1596_v29   ;;  %v1273_v6 = vadd.f32 %v2101_v53, %v1248_v32  ;;  %v1249_v35 = vmax.f32 %v1231_v46, %v1186_v0 }
 0x14d   : > { %v1276_v38 = vadd.f32 %v2101_v53, %v1251_v5  ;;  %v1293_v19 = vmax.f32 %v1275_v51, 0.0 }
 0x14e   : > { %v1274_v7 = vadd.f32 %v2101_v53, %v1249_v35  ;;  %v1291_v22 = vmax.f32 %v1273_v6, 0.0 }
 0x14f   : > { %v1294_v52 = vmax.f32 %v1276_v38, 0.0 }
 0x150   : > { %v1292_v8 = vmax.f32 %v1274_v7, 0.0 }
 0x151   : > { %v1611_v9 = vpack.c.bf16 %v1294_v52, %v1293_v19 }
 0x152   : > { %v1606_v33 = vpack.c.bf16 %v1292_v8, %v1291_v22 }
 0x153   : > { %1620 = vst [vmem:[%s2109_s14 + $0x40] sm:$0xff] %v1611_v9  }
 0x154   : > { %1619 = vst [vmem:[%s2109_s14 + $0x38] sm:$0xff] %v1606_v33  }
 0x155 PF: > { %p10_p9 = scmp.ge.s32.totalorder %s1864_s16, 4   ;;  %s2177_s12 = smov %s1821_s13 }
 0x156   : > { %s2178_s13 = smov %s1873_s19  ;;  %s2179_s14 = smov %s1864_s16 }
 0x157   :  { %12 = sbr.rel (!%p10_p9) target bundleno = 2 (0x2), region = 108 }

// kernel: mnist_forward.4
= control target key start
LH: loop header
LB: loop body
LE: loop exit
PB: predicated region body
PF: predicated region fallthrough
CT: control target
= control target key end

     0   :  { %s1074_s12 = smov 0   ;;  %s1076_s13 = smov 0   ;;  %s1261_s0 = inlined_call_operand.vmem [shape: bf16[4,32,512], index: 0, kind: input, shape index: {}]   ;;  %s1262_s1 = inlined_call_operand.vmem [shape: bf16[512,128], index: 1, kind: input, shape index: {}]   ;;  %s1263_s2 = inlined_call_operand.vmem [shape: f32[1,128], index: 2, kind: input, shape index: {}]   ;;  %s1264_s3 = inlined_call_operand.vmem [shape: bf16[32,128], index: 3, kind: output, shape index: {}]  }
   0x1   :  { %s1078_s14 = smov 0  }
   0x2 LB: > { %s796_s15 = sadd.s32 4294967295, %s1052_s14   ;;  %s1091_s16 = sadd.s32 1, %s1052_s14   ;;  %s1052_s14 = sphi %s1078_s14, %s1267_s14   ;;  %s1048_s13 = sphi %s1076_s13, %s1266_s13   ;;  %s1044_s12 = sphi %s1074_s12, %s1265_s12  }
   0x3   : > { %s17_s17 = ssub.s32 %s1052_s14, %s1091_s16  ;;  %s20_s18 = sadd.s32 1, %s1048_s13 }
   0x4   : > { %p18_p0 = scmp.eq.s32.totalorder %s17_s17, 0  ;;  %p27_p1 = scmp.ne.s32.totalorder %s1048_s13, %s1044_s12 }
   0x5   : > { %p28_p2 = scmp.eq.s32.totalorder %s1052_s14, 0  ;;  %p799_p4 = scmp.ge.s32.totalorder %s1052_s14, 2 }
   0x6   : > { %s1100_s19 = scalar_select %p18_p0, %s1048_s13, %s20_s18  }
   0x7   : > { %p29_p3 = por %p28_p2, %p27_p1  ;;  %127 = sbr.rel (%p799_p4) target bundleno = 26 (0x1a), region = 24 }
   0xe   : > { %130 = sbr.rel (!%p29_p3) target bundleno = 26 (0x1a), region = 28  ;;  %s132_s20 = sand.u32 (%p29_p3), 1, %s1048_s13  }
   0xf   : > { %s862_s21 = sshll.u32 (%p29_p3), %s1052_s14, 5  ;;  %s800_s22 = sshll.u32 (%p29_p3), %s132_s20, 7 }
  0x10   : > { %s1108_s25 = scalar_lea.vmem (%p29_p3), %s1261_s0, %s862_s21  ;;  %s134_s26 = scalar_lea.vmem (%p29_p3), [#allocation2], %s800_s22 }
  0x11   : > { %v151_v0 = vld [vmem:[%s1108_s25] sm:$0xff] (%p29_p3)  ;;  %v153_v1 = vld [vmem:[%s1108_s25 + $0x8] sm:$0xff] (%p29_p3)  ;;  %v155_v2 = vld [vmem:[%s1108_s25 + $0x10] sm:$0xff] (%p29_p3) }
  0x12   : > { %152 = vst [vmem:[%s134_s26] sm:$0xff] (%p29_p3), %v151_v0  ;;  %154 = vst [vmem:[%s134_s26 + $0x8] sm:$0xff] (%p29_p3), %v153_v1  ;;  %v157_v3 = vld [vmem:[%s1108_s25 + $0x18] sm:$0xff] (%p29_p3)  ;;  %v159_v4 = vld [vmem:[%s1108_s25 + $0x40] sm:$0xff] (%p29_p3) }
  0x13   : > { %156 = vst [vmem:[%s134_s26 + $0x10] sm:$0xff] (%p29_p3), %v155_v2  ;;  %v161_v5 = vld [vmem:[%s1108_s25 + $0x48] sm:$0xff] (%p29_p3)  ;;  %158 = vst [vmem:[%s134_s26 + $0x18] sm:$0xff] (%p29_p3), %v157_v3  ;;  %v163_v6 = vld [vmem:[%s1108_s25 + $0x50] sm:$0xff] (%p29_p3) }
  0x14   : > { %160 = vst [vmem:[%s134_s26 + $0x20] sm:$0xff] (%p29_p3), %v159_v4  ;;  %162 = vst [vmem:[%s134_s26 + $0x28] sm:$0xff] (%p29_p3), %v161_v5  ;;  %v165_v7 = vld [vmem:[%s1108_s25 + $0x58] sm:$0xff] (%p29_p3)  ;;  %v167_v8 = vld [vmem:[%s1108_s25 + $0x80] sm:$0xff] (%p29_p3) }
  0x15   : > { %164 = vst [vmem:[%s134_s26 + $0x30] sm:$0xff] %v163_v6  ;;  %166 = vst [vmem:[%s134_s26 + $0x38] sm:$0xff] %v165_v7  ;;  %v169_v9 = vld [vmem:[%s1108_s25 + $0x88] sm:$0xff]  ;;  %v171_v10 = vld [vmem:[%s1108_s25 + $0x90] sm:$0xff] }
  0x16   : > { %168 = vst [vmem:[%s134_s26 + $0x40] sm:$0xff] %v167_v8  ;;  %v173_v11 = vld [vmem:[%s1108_s25 + $0x98] sm:$0xff]  ;;  %170 = vst [vmem:[%s134_s26 + $0x48] sm:$0xff] %v169_v9  ;;  %v175_v12 = vld [vmem:[%s1108_s25 + $0xc0] sm:$0xff] }
  0x17   : > { %172 = vst [vmem:[%s134_s26 + $0x50] sm:$0xff] %v171_v10  ;;  %174 = vst [vmem:[%s134_s26 + $0x58] sm:$0xff] %v173_v11  ;;  %v177_v13 = vld [vmem:[%s1108_s25 + $0xc8] sm:$0xff]  ;;  %v179_v14 = vld [vmem:[%s1108_s25 + $0xd0] sm:$0xff] }
  0x18   : > { %176 = vst [vmem:[%s134_s26 + $0x60] sm:$0xff] %v175_v12  ;;  %178 = vst [vmem:[%s134_s26 + $0x68] sm:$0xff] %v177_v13  ;;  %v181_v15 = vld [vmem:[%s1108_s25 + $0xd8] sm:$0xff] }
  0x19   : > { %180 = vst [vmem:[%s134_s26 + $0x70] sm:$0xff] %v179_v14  ;;  %182 = vst [vmem:[%s134_s26 + $0x78] sm:$0xff] %v181_v15 }
  0x1a PF: > { %p804_p5 = scmp.ge.s32.totalorder %s1052_s14, 1  ;;  %p187_p6 = scmp.lt.s32.totalorder %s1052_s14, 3 }
  0x1c   : > { %p188_p7 = pnand %p804_p5, %p187_p6 }
  0x1d   : > { %v974_v16 = vld [vmem:[%s1262_s1 + $0x40] sm:$0xff] (!%p188_p7)   ;;  %v978_v20 = vld [vmem:[%s1262_s1 + $0x48] sm:$0xff] (!%p188_p7)   ;;  %v982_v24 = vld [vmem:[%s1262_s1 + $0x50] sm:$0xff] (!%p188_p7)   ;;  %s194_s6 = sand.u32 (!%p188_p7), 1, %s1044_s12   ;;  %s806_s30 = sshll.u32 (!%p188_p7), %s796_s15, 1 }
  0x1e   : > { %191 = sbr.rel (%p188_p7) target bundleno = 316 (0x13c), region = 51  ;;  %v975_v17 = vld [vmem:[%s1262_s1 + $0xc0] sm:$0xff] (!%p188_p7)   ;;  %870 = vmatprep.subr.bf16.mxu0 (!%p188_p7), %v974_v16  ;;  %v979_v21 = vld [vmem:[%s1262_s1 + $0xc8] sm:$0xff] (!%p188_p7)   ;;  %v983_v25 = vld [vmem:[%s1262_s1 + $0xd0] sm:$0xff] (!%p188_p7)   ;;  %s805_s18 = sshll.u32 (!%p188_p7), %s194_s6, 7 }
  0x1f   : > { %v976_v18 = vld [vmem:[%s1262_s1] sm:$0xff] (!%p188_p7)   ;;  %910 = vmatprep.subr.bf16.mxu1 (!%p188_p7), %v975_v17  ;;  %v980_v22 = vld [vmem:[%s1262_s1 + $0x8] sm:$0xff] (!%p188_p7)   ;;  %v984_v26 = vld [vmem:[%s1262_s1 + $0x10] sm:$0xff] (!%p188_p7)   ;;  %s1225_s29 = scalar_lea.vmem (!%p188_p7), [#allocation2], %s805_s18  ;;  %p219_p8 = scmp.lt.s32.totalorder (!%p188_p7), %s806_s30, 3 }
  0x20   : > { %v977_v19 = vld [vmem:[%s1262_s1 + $0x80] sm:$0xff] (!%p188_p7)   ;;  %871 = vmatpush3.bf16.msra.mxu0 (!%p188_p7), %v976_v18  ;;  %v981_v23 = vld [vmem:[%s1262_s1 + $0x88] sm:$0xff] (!%p188_p7)   ;;  %v985_v27 = vld [vmem:[%s1262_s1 + $0x90] sm:$0xff] (!%p188_p7)  }
  0x21   : > { %911 = vmatpush3.bf16.msra.mxu1 (!%p188_p7), %v977_v19  ;;  %872 = vmatprep.subr.bf16.mxu0 (!%p188_p7), %v978_v20  ;;  %v986_v28 = vld [vmem:[%s1262_s1 + $0x58] sm:$0xff] (!%p188_p7)   ;;  %v990_v32 = vld [vmem:[%s1262_s1 + $0x60] sm:$0xff] (!%p188_p7)   ;;  %v994_v36 = vld [vmem:[%s1262_s1 + $0x68] sm:$0xff] (!%p188_p7)  }
  0x22   : > { %912 = vmatprep.subr.bf16.mxu1 (!%p188_p7), %v979_v21  ;;  %v987_v29 = vld [vmem:[%s1262_s1 + $0xd8] sm:$0xff] (!%p188_p7)   ;;  %v991_v33 = vld [vmem:[%s1262_s1 + $0xe0] sm:$0xff] (!%p188_p7)   ;;  %v995_v37 = vld [vmem:[%s1262_s1 + $0xe8] sm:$0xff] (!%p188_p7)  }
  0x23   : > { %v988_v30 = vld [vmem:[%s1262_s1 + $0x18] sm:$0xff] (!%p188_p7)   ;;  %v992_v34 = vld [vmem:[%s1262_s1 + $0x20] sm:$0xff] (!%p188_p7)   ;;  %v996_v38 = vld [vmem:[%s1262_s1 + $0x28] sm:$0xff] (!%p188_p7)  }
  0x24   : > { %873 = vmatpush3.bf16.msra.mxu0 (!%p188_p7), %v980_v22  ;;  %v989_v31 = vld [vmem:[%s1262_s1 + $0x98] sm:$0xff] (!%p188_p7)   ;;  %v993_v35 = vld [vmem:[%s1262_s1 + $0xa0] sm:$0xff] (!%p188_p7)   ;;  %v997_v39 = vld [vmem:[%s1262_s1 + $0xa8] sm:$0xff] (!%p188_p7)  }
  0x25   : > { %913 = vmatpush3.bf16.msra.mxu1 %v981_v23  ;;  %874 = vmatprep.subr.bf16.mxu0 %v982_v24  ;;  %v998_v40 = vld [vmem:[%s1262_s1 + $0x70] sm:$0xff]   ;;  %v1002_v44 = vld [vmem:[%s1262_s1 + $0x78] sm:$0xff]   ;;  %s1269_s30 = smov (!%p219_p8, %s806_s30), 3 }
  0x26   : > { %914 = vmatprep.subr.bf16.mxu1 %v983_v25  ;;  %v999_v41 = vld [vmem:[%s1262_s1 + $0xf0] sm:$0xff]   ;;  %v1003_v45 = vld [vmem:[%s1262_s1 + $0xf8] sm:$0xff]   ;;  %s807_s14 = sshll.u32 %s1269_s30, 2 }
  0x27   : > { %v1000_v42 = vld [vmem:[%s1262_s1 + $0x30] sm:$0xff]   ;;  %v1004_v46 = vld [vmem:[%s1262_s1 + $0x38] sm:$0xff]   ;;  %s222_s7 = scalar_lea.vmem %s1264_s3, %s807_s14 }
  0x28   : > { %875 = vmatpush3.bf16.msra.mxu0 %v984_v26  ;;  %v1001_v43 = vld [vmem:[%s1262_s1 + $0xb0] sm:$0xff]   ;;  %v1005_v47 = vld [vmem:[%s1262_s1 + $0xb8] sm:$0xff]  }
  0x29   : > { %915 = vmatpush3.bf16.msra.mxu1 %v985_v27  ;;  %876 = vmatprep.subr.bf16.mxu0 %v986_v28  ;;  %v1006_v48 = vld [vmem:[%s1225_s29] ss:$16 sps:$4 sm:$0xff]   ;;  %v1008_v49 = vld [vmem:[%s1225_s29 + $0x4] ss:$16 sps:$4 sm:$0xff]   ;;  %v1009_v50 = vld [vmem:[%s1225_s29 + $0x8] ss:$16 sps:$4 sm:$0xff]  }
  0x2a   : > { %916 = vmatprep.subr.bf16.mxu1 %v987_v29  ;;  %v1011_v51 = vld [vmem:[%s1225_s29 + $0xc] ss:$16 sps:$4 sm:$0xff]   ;;  %609 = vmatprep.mubr.bf16.mxu0 %v1008_v49  ;;  %v1012_v52 = vld [vmem:[%s1225_s29 + $0x24] ss:$16 sps:$4 sm:$0xff]   ;;  %v1016_v54 = vld [vmem:[%s1225_s29 + $0x20] ss:$16 sps:$4 sm:$0xff]  }
  0x2b   : > { %674 = vmatprep.mubr.bf16.mxu1 %v1011_v51  ;;  %v1014_v53 = vld [vmem:[%s1225_s29 + $0x2c] ss:$16 sps:$4 sm:$0xff]   ;;  %v1017_v55 = vld [vmem:[%s1225_s29 + $0x28] ss:$16 sps:$4 sm:$0xff]   ;;  %v1018_v56 = vld [vmem:[%s1225_s29 + $0x44] ss:$16 sps:$4 sm:$0xff]  }
  0x2c   : > { %877 = vmatpush3.bf16.msra.mxu0 %v988_v30  ;;  %v1020_v57 = vld [vmem:[%s1225_s29 + $0x4c] ss:$16 sps:$4 sm:$0xff]   ;;  %v1022_v58 = vld [vmem:[%s1225_s29 + $0x40] ss:$16 sps:$4 sm:$0xff]   ;;  %v1023_v59 = vld [vmem:[%s1225_s29 + $0x48] ss:$16 sps:$4 sm:$0xff]  }
  0x2d   : > { %917 = vmatpush3.bf16.msra.mxu1 %v989_v31  ;;  %878 = vmatprep.subr.bf16.mxu0 %v990_v32  ;;  %v1024_v60 = vld [vmem:[%s1225_s29 + $0x64] ss:$16 sps:$4 sm:$0xff]   ;;  %v1026_v61 = vld [vmem:[%s1225_s29 + $0x6c] ss:$16 sps:$4 sm:$0xff]   ;;  %v1028_v62 = vld [vmem:[%s1225_s29 + $0x60] ss:$16 sps:$4 sm:$0xff]  }
  0x2e   : > { %918 = vmatprep.subr.bf16.mxu1 %v991_v33  ;;  %v1029_v63 = vld [vmem:[%s1225_s29 + $0x68] ss:$16 sps:$4 sm:$0xff]  }
  0x30   : > { %879 = vmatpush3.bf16.msra.mxu0 %v992_v34 }
  0x31   : > { %919 = vmatpush3.bf16.msra.mxu1 %v993_v35  ;;  %880 = vmatprep.subr.bf16.mxu0 %v994_v36 }
  0x32   : > { %920 = vmatprep.subr.bf16.mxu1 %v995_v37 }
  0x34   : > { %881 = vmatpush3.bf16.msra.mxu0 %v996_v38 }
  0x35   : > { %921 = vmatpush3.bf16.msra.mxu1 %v997_v39  ;;  %882 = vmatprep.subr.bf16.mxu0 %v998_v40 }
  0x36   : > { %922 = vmatprep.subr.bf16.mxu1 %v999_v41 }
  0x38   : > { %883 = vmatpush3.bf16.msra.mxu0 %v1000_v42 }
  0x39   : > { %923 = vmatpush3.bf16.msra.mxu1 %v1001_v43  ;;  %884 = vmatprep.subr.bf16.mxu0 %v1002_v44 }
  0x3a   : > { %924 = vmatprep.subr.bf16.mxu1 %v1003_v45 }
  0x3c   : > { %885 = vmatpush3.bf16.msra.mxu0 %v1004_v46 }
  0x3d   : > { %925 = vmatpush3.bf16.msra.mxu1 %v1005_v47 }
  0x3f   : > { %610 = vmatmul.mubr.bf16.vlgmr.msra.gmra.mrb[0].mxu0 %v1006_v48 }
  0x40   : > { %675 = vmatmul.mubr.bf16.vlgmr.msra.gmra.mrb[0].mxu1 %v1009_v50  ;;  %617 = vmatprep.mubr.bf16.mxu0 %v1012_v52 }
  0x41   : > { %682 = vmatprep.mubr.bf16.mxu1 %v1014_v53 }
  0x47   : > { %618 = vmatmul.mubr.bf16.gmra.mrb[4].mxu0 %v1016_v54 }
  0x48   : > { %683 = vmatmul.mubr.bf16.gmra.mrb[4].mxu1 %v1017_v55  ;;  %625 = vmatprep.mubr.bf16.mxu0 %v1018_v56 }
  0x49   : > { %690 = vmatprep.mubr.bf16.mxu1 %v1020_v57 }
  0x4f   : > { %626 = vmatmul.mubr.bf16.gmra.mrb[8].mxu0 %v1022_v58 }
  0x50   : > { %691 = vmatmul.mubr.bf16.gmra.mrb[8].mxu1 %v1023_v59  ;;  %633 = vmatprep.mubr.bf16.mxu0 %v1024_v60  ;;  %v856_v59 = vld [vmem:[%s1263_s2] ss:$0 sm:$0xff] }
  0x51   : > { %698 = vmatprep.mubr.bf16.mxu1 %v1026_v61 }
  0x57   : > { %634 = vmatmul.mubr.bf16.gmra.mrb[12].mxu0 %v1028_v62 }
  0x58   : > { %699 = vmatmul.mubr.bf16.gmra.mrb[12].mxu1 %v1029_v63 }
 0x112   : > { %v886_v0 = vpop.f32.mrb[0].mxu0 }
 0x113   : > { %v926_v1 = vpop.f32.mrb[0].mxu1  ;;  %v887_v2 = vpop.f32.mrb[1].mxu0 }
 0x114   : > { %v888_v3 = vadd.f32 %v887_v2, %v886_v0  ;;  %v927_v4 = vpop.f32.mrb[1].mxu1  ;;  %v889_v5 = vpop.f32.mrb[2].mxu0 }
 0x115   : > { %v928_v6 = vadd.f32 %v927_v4, %v926_v1  ;;  %v929_v7 = vpop.f32.mrb[2].mxu1  ;;  %v890_v8 = vpop.f32.mrb[3].mxu0 }
 0x116   : > { %v891_v9 = vadd.f32 %v890_v8, %v889_v5  ;;  %v930_v10 = vpop.f32.mrb[3].mxu1 }
 0x117   : > { %v677_v11 = vadd.f32 %v928_v6, %v888_v3  ;;  %v931_v12 = vadd.f32 %v930_v10, %v929_v7 }
 0x119   : > { %v680_v13 = vadd.f32 %v931_v12, %v891_v9 }
 0x11a   : > { %v892_v14 = vpop.f32.mrb[4].mxu0 }
 0x11b   : > { %v932_v15 = vpop.f32.mrb[4].mxu1  ;;  %v893_v16 = vpop.f32.mrb[5].mxu0 }
 0x11c   : > { %v894_v17 = vadd.f32 %v893_v16, %v892_v14  ;;  %v933_v18 = vpop.f32.mrb[5].mxu1  ;;  %v895_v19 = vpop.f32.mrb[6].mxu0 }
 0x11d   : > { %v934_v20 = vadd.f32 %v933_v18, %v932_v15  ;;  %v935_v21 = vpop.f32.mrb[6].mxu1  ;;  %v896_v22 = vpop.f32.mrb[7].mxu0 }
 0x11e   : > { %v897_v23 = vadd.f32 %v896_v22, %v895_v19  ;;  %v936_v24 = vpop.f32.mrb[7].mxu1 }
 0x11f   : > { %v685_v25 = vadd.f32 %v934_v20, %v894_v17  ;;  %v937_v26 = vadd.f32 %v936_v24, %v935_v21 }
 0x121   : > { %v707_v27 = vmax.f32 %v677_v11, %v685_v25  ;;  %v688_v28 = vadd.f32 %v937_v26, %v897_v23 }
 0x122   : > { %v898_v29 = vpop.f32.mrb[8].mxu0 }
 0x123   : > { %v708_v30 = vmax.f32 %v680_v13, %v688_v28  ;;  %v938_v31 = vpop.f32.mrb[8].mxu1  ;;  %v899_v32 = vpop.f32.mrb[9].mxu0 }
 0x124   : > { %v900_v33 = vadd.f32 %v899_v32, %v898_v29  ;;  %v939_v34 = vpop.f32.mrb[9].mxu1  ;;  %v901_v35 = vpop.f32.mrb[10].mxu0 }
 0x125   : > { %v940_v36 = vadd.f32 %v939_v34, %v938_v31  ;;  %v941_v37 = vpop.f32.mrb[10].mxu1  ;;  %v902_v38 = vpop.f32.mrb[11].mxu0 }
 0x126   : > { %v903_v39 = vadd.f32 %v902_v38, %v901_v35  ;;  %v942_v40 = vpop.f32.mrb[11].mxu1 }
 0x127   : > { %v693_v41 = vadd.f32 %v940_v36, %v900_v33  ;;  %v943_v42 = vadd.f32 %v942_v40, %v941_v37 }
 0x129   : > { %v709_v43 = vmax.f32 %v707_v27, %v693_v41  ;;  %v696_v44 = vadd.f32 %v943_v42, %v903_v39 }
 0x12a   : > { %v904_v45 = vpop.f32.mrb[12].mxu0 }
 0x12b   : > { %v710_v46 = vmax.f32 %v708_v30, %v696_v44  ;;  %v944_v47 = vpop.f32.mrb[12].mxu1  ;;  %v905_v48 = vpop.f32.mrb[13].mxu0 }
 0x12c   : > { %v906_v49 = vadd.f32 %v905_v48, %v904_v45  ;;  %v945_v50 = vpop.f32.mrb[13].mxu1  ;;  %v907_v51 = vpop.f32.mrb[14].mxu0 }
 0x12d   : > { %v946_v52 = vadd.f32 %v945_v50, %v944_v47  ;;  %v947_v53 = vpop.f32.mrb[14].mxu1  ;;  %v908_v54 = vpop.f32.mrb[15].mxu0 }
 0x12e   : > { %v909_v55 = vadd.f32 %v908_v54, %v907_v51  ;;  %v948_v56 = vpop.f32.mrb[15].mxu1 }
 0x12f   : > { %v701_v57 = vadd.f32 %v946_v52, %v906_v49  ;;  %v949_v58 = vadd.f32 %v948_v56, %v947_v53 }
 0x131   : > { %v711_v60 = vmax.f32 %v709_v43, %v701_v57  ;;  %v704_v61 = vadd.f32 %v949_v58, %v909_v55 }
 0x133   : > { %v720_v62 = vadd.f32 %v856_v59, %v711_v60  ;;  %v712_v63 = vmax.f32 %v710_v46, %v704_v61 }
 0x135   : > { %v721_v0 = vadd.f32 %v856_v59, %v712_v63  ;;  %v722_v1 = vmax.f32 %v720_v62, 0.0 }
 0x137   : > { %v723_v2 = vmax.f32 %v721_v0, 0.0 }
 0x139   : > { %v868_v3 = vpack.c.bf16 %v723_v2, %v722_v1 }
 0x13b   : > { %869 = vst [vmem:[%s222_s7] sm:$0xff] %v868_v3  }
 0x13c PF: > { %p10_p9 = scmp.ge.s32.totalorder %s1091_s16, 4   ;;  %s1265_s12 = smov %s1048_s13 }
 0x13d   : > { %s1266_s13 = smov %s1100_s19  ;;  %s1267_s14 = smov %s1091_s16 }
 0x13e   :  { %12 = sbr.rel (!%p10_p9) target bundleno = 2 (0x2), region = 90 }

// kernel: mnist_forward.5
= control target key start
LH: loop header
LB: loop body
LE: loop exit
PB: predicated region body
PF: predicated region fallthrough
CT: control target
= control target key end

     0   :  { %vm6101_vm0 = vmmov 0   ;;  %s7974_s1 = inlined_call_operand.vmem [shape: bf16[2048,512], index: 1, kind: input, shape index: {}]   ;;  %s7975_s0 = inlined_call_operand.vmem [shape: bf16[16,2048], index: 0, kind: input, shape index: {}]   ;;  %s7976_s3 = inlined_call_operand.vmem [shape: bf16[512,128], index: 3, kind: input, shape index: {}]   ;;  %s7977_s5 = inlined_call_operand.vmem [shape: bf16[128,128], index: 5, kind: input, shape index: {}]   ;;  %s7978_s2 = inlined_call_operand.vmem [shape: f32[1,512], index: 2, kind: input, shape index: {}]   ;;  %s7979_s7 = inlined_call_operand.vmem [shape: bf16[128,128], index: 7, kind: input, shape index: {}]   ;;  %s7980_s4 = inlined_call_operand.vmem [shape: f32[1,128], index: 4, kind: input, shape index: {}]   ;;  %s7981_s6 = inlined_call_operand.vmem [shape: f32[1,128], index: 6, kind: input, shape index: {}]   ;;  %s7982_s8 = inlined_call_operand.vmem [shape: f32[1,128], index: 8, kind: input, shape index: {}]   ;;  %s7983_s9 = inlined_call_operand.vmem [shape: f32[16,128], index: 9, kind: output, shape index: {}]  }
   0x1   :  { %v5276_v0 = vld [vmem:[%s7974_s1 + $0x4] ss:$16 sps:$4 sm:$0xff]   ;;  %v5278_v1 = vld [vmem:[%s7974_s1 + $0xc] ss:$16 sps:$4 sm:$0xff]   ;;  %v5280_v2 = vld [vmem:[%s7974_s1] ss:$16 sps:$4 sm:$0xff]  }
   0x2   :  { %3223 = vmatprep.subr.bf16.mxu0 %v5276_v0  ;;  %v5281_v3 = vld [vmem:[%s7974_s1 + $0x8] ss:$16 sps:$4 sm:$0xff]   ;;  %3567 = vmatprep.subr.bf16.mxu1 %v5278_v1  ;;  %v5282_v4 = vld [vmem:[%s7974_s1 + $0x24] ss:$16 sps:$4 sm:$0xff]   ;;  %v5284_v5 = vld [vmem:[%s7974_s1 + $0x2c] ss:$16 sps:$4 sm:$0xff]  }
   0x3   :  { %3224 = vmatpush1.bf16.msra.mxu0 %v5280_v2  ;;  %3568 = vmatpush1.bf16.msra.mxu1 %v5281_v3  ;;  %v5286_v6 = vld [vmem:[%s7974_s1 + $0x20] ss:$16 sps:$4 sm:$0xff]   ;;  %v5287_v7 = vld [vmem:[%s7974_s1 + $0x28] ss:$16 sps:$4 sm:$0xff]   ;;  %v5288_v8 = vld [vmem:[%s7974_s1 + $0x44] ss:$16 sps:$4 sm:$0xff]  }
   0x4   :  { %3225 = vmatprep.subr.bf16.mxu0 %v5282_v4  ;;  %3569 = vmatprep.subr.bf16.mxu1 %v5284_v5  ;;  %v5290_v9 = vld [vmem:[%s7974_s1 + $0x4c] ss:$16 sps:$4 sm:$0xff]   ;;  %v5292_v10 = vld [vmem:[%s7974_s1 + $0x40] ss:$16 sps:$4 sm:$0xff]   ;;  %v5293_v11 = vld [vmem:[%s7974_s1 + $0x48] ss:$16 sps:$4 sm:$0xff]  }
   0x5   :  { %v5294_v12 = vld [vmem:[%s7974_s1 + $0x64] ss:$16 sps:$4 sm:$0xff]   ;;  %v5296_v13 = vld [vmem:[%s7974_s1 + $0x6c] ss:$16 sps:$4 sm:$0xff]   ;;  %v5298_v14 = vld [vmem:[%s7974_s1 + $0x60] ss:$16 sps:$4 sm:$0xff]  }
   0x6   :  { %v5299_v15 = vld [vmem:[%s7974_s1 + $0x68] ss:$16 sps:$4 sm:$0xff]   ;;  %v5300_v16 = vld [vmem:[%s7974_s1 + $0x84] ss:$16 sps:$4 sm:$0xff]   ;;  %v5302_v17 = vld [vmem:[%s7974_s1 + $0x8c] ss:$16 sps:$4 sm:$0xff]  }
   0x7   :  { %3226 = vmatpush1.bf16.msra.mxu0 %v5286_v6  ;;  %3570 = vmatpush1.bf16.msra.mxu1 %v5287_v7  ;;  %v5304_v18 = vld [vmem:[%s7974_s1 + $0x80] ss:$16 sps:$4 sm:$0xff]   ;;  %v5305_v19 = vld [vmem:[%s7974_s1 + $0x88] ss:$16 sps:$4 sm:$0xff]   ;;  %v5306_v20 = vld [vmem:[%s7974_s1 + $0xa4] ss:$16 sps:$4 sm:$0xff]  }
   0x8   :  { %3227 = vmatprep.subr.bf16.mxu0 %v5288_v8  ;;  %3571 = vmatprep.subr.bf16.mxu1 %v5290_v9  ;;  %v5308_v21 = vld [vmem:[%s7974_s1 + $0xac] ss:$16 sps:$4 sm:$0xff]   ;;  %v5310_v22 = vld [vmem:[%s7974_s1 + $0xa0] ss:$16 sps:$4 sm:$0xff]   ;;  %v5311_v23 = vld [vmem:[%s7974_s1 + $0xa8] ss:$16 sps:$4 sm:$0xff]  }
   0x9   :  { %v5312_v24 = vld [vmem:[%s7974_s1 + $0xc4] ss:$16 sps:$4 sm:$0xff]   ;;  %v5314_v25 = vld [vmem:[%s7974_s1 + $0xcc] ss:$16 sps:$4 sm:$0xff]   ;;  %v5316_v26 = vld [vmem:[%s7974_s1 + $0xc0] ss:$16 sps:$4 sm:$0xff]  }
   0xa   :  { %v5317_v27 = vld [vmem:[%s7974_s1 + $0xc8] ss:$16 sps:$4 sm:$0xff]   ;;  %v5318_v28 = vld [vmem:[%s7974_s1 + $0xe4] ss:$16 sps:$4 sm:$0xff]   ;;  %v5320_v29 = vld [vmem:[%s7974_s1 + $0xec] ss:$16 sps:$4 sm:$0xff]  }
   0xb   :  { %3228 = vmatpush1.bf16.msra.mxu0 %v5292_v10  ;;  %3572 = vmatpush1.bf16.msra.mxu1 %v5293_v11  ;;  %v5322_v30 = vld [vmem:[%s7974_s1 + $0xe0] ss:$16 sps:$4 sm:$0xff]   ;;  %v5323_v31 = vld [vmem:[%s7974_s1 + $0xe8] ss:$16 sps:$4 sm:$0xff]   ;;  %v5324_v32 = vld [vmem:[%s7974_s1 + $0x104] ss:$16 sps:$4 sm:$0xff]  }
   0xc   :  { %3229 = vmatprep.subr.bf16.mxu0 %v5294_v12  ;;  %3573 = vmatprep.subr.bf16.mxu1 %v5296_v13  ;;  %v5326_v33 = vld [vmem:[%s7974_s1 + $0x10c] ss:$16 sps:$4 sm:$0xff]   ;;  %v5328_v34 = vld [vmem:[%s7974_s1 + $0x100] ss:$16 sps:$4 sm:$0xff]   ;;  %v5329_v35 = vld [vmem:[%s7974_s1 + $0x108] ss:$16 sps:$4 sm:$0xff]  }
   0xd   :  { %v5330_v36 = vld [vmem:[%s7974_s1 + $0x124] ss:$16 sps:$4 sm:$0xff]   ;;  %v5332_v37 = vld [vmem:[%s7974_s1 + $0x12c] ss:$16 sps:$4 sm:$0xff]   ;;  %v5334_v38 = vld [vmem:[%s7974_s1 + $0x120] ss:$16 sps:$4 sm:$0xff]  }
   0xe   :  { %v5335_v39 = vld [vmem:[%s7974_s1 + $0x128] ss:$16 sps:$4 sm:$0xff]   ;;  %v5336_v40 = vld [vmem:[%s7974_s1 + $0x144] ss:$16 sps:$4 sm:$0xff]   ;;  %v5338_v41 = vld [vmem:[%s7974_s1 + $0x14c] ss:$16 sps:$4 sm:$0xff]  }
   0xf   :  { %3230 = vmatpush1.bf16.msra.mxu0 %v5298_v14  ;;  %3574 = vmatpush1.bf16.msra.mxu1 %v5299_v15  ;;  %v5340_v42 = vld [vmem:[%s7974_s1 + $0x140] ss:$16 sps:$4 sm:$0xff]   ;;  %v5341_v43 = vld [vmem:[%s7974_s1 + $0x148] ss:$16 sps:$4 sm:$0xff]   ;;  %v5342_v44 = vld [vmem:[%s7974_s1 + $0x164] ss:$16 sps:$4 sm:$0xff]  }
  0x10   :  { %3231 = vmatprep.subr.bf16.mxu0 %v5300_v16  ;;  %3575 = vmatprep.subr.bf16.mxu1 %v5302_v17  ;;  %v5344_v45 = vld [vmem:[%s7974_s1 + $0x16c] ss:$16 sps:$4 sm:$0xff]   ;;  %v33_v46 = vld [vmem:[%s7975_s0] sm:$0xff]  ;;  %v5347_v49 = vld [vmem:[%s7974_s1 + $0x168] ss:$16 sps:$4 sm:$0xff]  }
  0x11   :  { %v41_v47 = vld [vmem:[%s7975_s0 + $0x40] sm:$0xff]  ;;  %v5350_v52 = vld [vmem:[%s7974_s1 + $0x18c] ss:$16 sps:$4 sm:$0xff]   ;;  %v5353_v54 = vld [vmem:[%s7974_s1 + $0x188] ss:$16 sps:$4 sm:$0xff]  }
  0x12   :  { %v5346_v48 = vld [vmem:[%s7974_s1 + $0x160] ss:$16 sps:$4 sm:$0xff]   ;;  %v4530_v50 = vcombine.high %v33_v46, %v41_v47  ;;  %v5348_v51 = vld [vmem:[%s7974_s1 + $0x184] ss:$16 sps:$4 sm:$0xff]   ;;  %v5356_v56 = vld [vmem:[%s7974_s1 + $0x1ac] ss:$16 sps:$4 sm:$0xff]   ;;  %v4529_v5 = vcombine.low %v33_v46, %v41_v47 }
  0x13   :  { %3232 = vmatpush1.bf16.msra.mxu0 %v5304_v18  ;;  %3576 = vmatpush1.bf16.msra.mxu1 %v5305_v19  ;;  %v5352_v53 = vld [vmem:[%s7974_s1 + $0x180] ss:$16 sps:$4 sm:$0xff]   ;;  %v5354_v55 = vld [vmem:[%s7974_s1 + $0x1a4] ss:$16 sps:$4 sm:$0xff]   ;;  %v5359_v58 = vld [vmem:[%s7974_s1 + $0x1a8] ss:$16 sps:$4 sm:$0xff]  }
  0x14   :  { %3233 = vmatprep.subr.bf16.mxu0 %v5306_v20  ;;  %3577 = vmatprep.subr.bf16.mxu1 %v5308_v21  ;;  %v5358_v57 = vld [vmem:[%s7974_s1 + $0x1a0] ss:$16 sps:$4 sm:$0xff]   ;;  %v5360_v59 = vld [vmem:[%s7974_s1 + $0x1c4] ss:$16 sps:$4 sm:$0xff]   ;;  %v5362_v60 = vld [vmem:[%s7974_s1 + $0x1cc] ss:$16 sps:$4 sm:$0xff]  }
  0x15   :  { %3255 = vmatprep.mubr.bf16.mxu0 %v4530_v50  ;;  %3599 = vmatprep.mubr.bf16.mxu1 %v4530_v50  ;;  %v5364_v61 = vld [vmem:[%s7974_s1 + $0x1c0] ss:$16 sps:$4 sm:$0xff]   ;;  %v5365_v62 = vld [vmem:[%s7974_s1 + $0x1c8] ss:$16 sps:$4 sm:$0xff]   ;;  %v5366_v63 = vld [vmem:[%s7974_s1 + $0x1e4] ss:$16 sps:$4 sm:$0xff]  }
  0x16   :  { %v5368_v0 = vld [vmem:[%s7974_s1 + $0x1ec] ss:$16 sps:$4 sm:$0xff]   ;;  %v5370_v1 = vld [vmem:[%s7974_s1 + $0x1e0] ss:$16 sps:$4 sm:$0xff]   ;;  %v5371_v2 = vld [vmem:[%s7974_s1 + $0x1e8] ss:$16 sps:$4 sm:$0xff]  }
  0x17   :  { %3234 = vmatpush1.bf16.msra.mxu0 %v5310_v22  ;;  %3578 = vmatpush1.bf16.msra.mxu1 %v5311_v23  ;;  %v5374_v3 = vld [vmem:[%s7974_s1 + $0x204] ss:$16 sps:$4 sm:$0xff]   ;;  %v5377_v4 = vld [vmem:[%s7974_s1 + $0x20c] ss:$16 sps:$4 sm:$0xff]   ;;  %v5372_v6 = vld [vmem:[%s7974_s1 + $0x200] ss:$16 sps:$4 sm:$0xff]  }
  0x18   :  { %3235 = vmatprep.subr.bf16.mxu0 %v5312_v24  ;;  %3579 = vmatprep.subr.bf16.mxu1 %v5314_v25  ;;  %v5375_v7 = vld [vmem:[%s7974_s1 + $0x208] ss:$16 sps:$4 sm:$0xff]   ;;  %v5380_v8 = vld [vmem:[%s7974_s1 + $0x224] ss:$16 sps:$4 sm:$0xff]   ;;  %v5383_v9 = vld [vmem:[%s7974_s1 + $0x22c] ss:$16 sps:$4 sm:$0xff]  }
  0x19   :  { %v5378_v10 = vld [vmem:[%s7974_s1 + $0x220] ss:$16 sps:$4 sm:$0xff]   ;;  %v5381_v11 = vld [vmem:[%s7974_s1 + $0x228] ss:$16 sps:$4 sm:$0xff]   ;;  %v5386_v12 = vld [vmem:[%s7974_s1 + $0x244] ss:$16 sps:$4 sm:$0xff]  }
  0x1a   :  { %v5389_v13 = vld [vmem:[%s7974_s1 + $0x24c] ss:$16 sps:$4 sm:$0xff]   ;;  %v5384_v14 = vld [vmem:[%s7974_s1 + $0x240] ss:$16 sps:$4 sm:$0xff]   ;;  %v5387_v15 = vld [vmem:[%s7974_s1 + $0x248] ss:$16 sps:$4 sm:$0xff]  }
  0x1b   :  { %3236 = vmatpush1.bf16.msra.mxu0 %v5316_v26  ;;  %3580 = vmatpush1.bf16.msra.mxu1 %v5317_v27  ;;  %v5392_v16 = vld [vmem:[%s7974_s1 + $0x264] ss:$16 sps:$4 sm:$0xff]   ;;  %v5395_v17 = vld [vmem:[%s7974_s1 + $0x26c] ss:$16 sps:$4 sm:$0xff]   ;;  %v5390_v18 = vld [vmem:[%s7974_s1 + $0x260] ss:$16 sps:$4 sm:$0xff]  }
  0x1c   :  { %3237 = vmatprep.subr.bf16.mxu0 %v5318_v28  ;;  %3581 = vmatprep.subr.bf16.mxu1 %v5320_v29  ;;  %v5393_v19 = vld [vmem:[%s7974_s1 + $0x268] ss:$16 sps:$4 sm:$0xff]   ;;  %v5398_v20 = vld [vmem:[%s7974_s1 + $0x284] ss:$16 sps:$4 sm:$0xff]   ;;  %v5401_v21 = vld [vmem:[%s7974_s1 + $0x28c] ss:$16 sps:$4 sm:$0xff]  }
  0x1d   :  { %v5396_v22 = vld [vmem:[%s7974_s1 + $0x280] ss:$16 sps:$4 sm:$0xff]   ;;  %v5399_v23 = vld [vmem:[%s7974_s1 + $0x288] ss:$16 sps:$4 sm:$0xff]   ;;  %v5404_v24 = vld [vmem:[%s7974_s1 + $0x2a4] ss:$16 sps:$4 sm:$0xff]  }
  0x1e   :  { %v5407_v25 = vld [vmem:[%s7974_s1 + $0x2ac] ss:$16 sps:$4 sm:$0xff]   ;;  %v5402_v26 = vld [vmem:[%s7974_s1 + $0x2a0] ss:$16 sps:$4 sm:$0xff]   ;;  %v5405_v27 = vld [vmem:[%s7974_s1 + $0x2a8] ss:$16 sps:$4 sm:$0xff]  }
  0x1f   :  { %3238 = vmatpush1.bf16.msra.mxu0 %v5322_v30  ;;  %3582 = vmatpush1.bf16.msra.mxu1 %v5323_v31  ;;  %v5410_v28 = vld [vmem:[%s7974_s1 + $0x2c4] ss:$16 sps:$4 sm:$0xff]   ;;  %v5413_v29 = vld [vmem:[%s7974_s1 + $0x2cc] ss:$16 sps:$4 sm:$0xff]   ;;  %v5429_v46 = vld [vmem:[%s7974_s1 + $0x328] ss:$16 sps:$4 sm:$0xff]  }
  0x20   :  { %3239 = vmatprep.subr.bf16.mxu0 %v5324_v32  ;;  %3583 = vmatprep.subr.bf16.mxu1 %v5326_v33  ;;  %v6431_v30 = vld [vmem:[%s7975_s0 + $0x8] sm:$0xff]  ;;  %v5408_v32 = vld [vmem:[%s7974_s1 + $0x2c0] ss:$16 sps:$4 sm:$0xff]   ;;  %v5434_v47 = vld [vmem:[%s7974_s1 + $0x344] ss:$16 sps:$4 sm:$0xff]  }
  0x21   :  { %v6436_v31 = vld [vmem:[%s7975_s0 + $0x48] sm:$0xff] }
  0x22   :  { %v5411_v33 = vld [vmem:[%s7974_s1 + $0x2c8] ss:$16 sps:$4 sm:$0xff]  }
  0x23   :  { %3240 = vmatpush1.bf16.msra.mxu0 %v5328_v34  ;;  %3584 = vmatpush1.bf16.msra.mxu1 %v5329_v35  ;;  %v4532_v34 = vcombine.high %v6431_v30, %v6436_v31  ;;  %v5416_v35 = vld [vmem:[%s7974_s1 + $0x2e4] ss:$16 sps:$4 sm:$0xff]   ;;  %v5435_v50 = vld [vmem:[%s7974_s1 + $0x348] ss:$16 sps:$4 sm:$0xff]  }
  0x24   :  { %3241 = vmatprep.subr.bf16.mxu0 %v5330_v36  ;;  %3585 = vmatprep.subr.bf16.mxu1 %v5332_v37  ;;  %v5419_v36 = vld [vmem:[%s7974_s1 + $0x2ec] ss:$16 sps:$4 sm:$0xff]   ;;  %v5414_v37 = vld [vmem:[%s7974_s1 + $0x2e0] ss:$16 sps:$4 sm:$0xff]  }
  0x27   :  { %3242 = vmatpush1.bf16.msra.mxu0 %v5334_v38  ;;  %3586 = vmatpush1.bf16.msra.mxu1 %v5335_v39  ;;  %v5417_v38 = vld [vmem:[%s7974_s1 + $0x2e8] ss:$16 sps:$4 sm:$0xff]   ;;  %v5422_v39 = vld [vmem:[%s7974_s1 + $0x304] ss:$16 sps:$4 sm:$0xff]  }
  0x28   :  { %3243 = vmatprep.subr.bf16.mxu0 %v5336_v40  ;;  %3587 = vmatprep.subr.bf16.mxu1 %v5338_v41  ;;  %v5425_v40 = vld [vmem:[%s7974_s1 + $0x30c] ss:$16 sps:$4 sm:$0xff]   ;;  %v5420_v41 = vld [vmem:[%s7974_s1 + $0x300] ss:$16 sps:$4 sm:$0xff]  }
  0x2b   :  { %3244 = vmatpush1.bf16.msra.mxu0 %v5340_v42  ;;  %3588 = vmatpush1.bf16.msra.mxu1 %v5341_v43  ;;  %v5423_v42 = vld [vmem:[%s7974_s1 + $0x308] ss:$16 sps:$4 sm:$0xff]   ;;  %v5428_v43 = vld [vmem:[%s7974_s1 + $0x324] ss:$16 sps:$4 sm:$0xff]  }
  0x2c   :  { %3245 = vmatprep.subr.bf16.mxu0 %v5342_v44  ;;  %3589 = vmatprep.subr.bf16.mxu1 %v5344_v45  ;;  %v5431_v44 = vld [vmem:[%s7974_s1 + $0x32c] ss:$16 sps:$4 sm:$0xff]   ;;  %v5426_v45 = vld [vmem:[%s7974_s1 + $0x320] ss:$16 sps:$4 sm:$0xff]  }
  0x2f   :  { %3246 = vmatpush1.bf16.msra.mxu0 %v5346_v48  ;;  %3590 = vmatpush1.bf16.msra.mxu1 %v5347_v49  ;;  %v5437_v48 = vld [vmem:[%s7974_s1 + $0x34c] ss:$16 sps:$4 sm:$0xff]   ;;  %v5432_v49 = vld [vmem:[%s7974_s1 + $0x340] ss:$16 sps:$4 sm:$0xff]  }
  0x30   :  { %3247 = vmatprep.subr.bf16.mxu0 %v5348_v51  ;;  %3591 = vmatprep.subr.bf16.mxu1 %v5350_v52  ;;  %v5440_v51 = vld [vmem:[%s7974_s1 + $0x364] ss:$16 sps:$4 sm:$0xff]   ;;  %v5443_v52 = vld [vmem:[%s7974_s1 + $0x36c] ss:$16 sps:$4 sm:$0xff]  }
  0x33   :  { %3248 = vmatpush1.bf16.msra.mxu0 %v5352_v53  ;;  %3592 = vmatpush1.bf16.msra.mxu1 %v5353_v54  ;;  %v5438_v53 = vld [vmem:[%s7974_s1 + $0x360] ss:$16 sps:$4 sm:$0xff]   ;;  %v5441_v54 = vld [vmem:[%s7974_s1 + $0x368] ss:$16 sps:$4 sm:$0xff]  }
  0x34   :  { %3249 = vmatprep.subr.bf16.mxu0 %v5354_v55  ;;  %3593 = vmatprep.subr.bf16.mxu1 %v5356_v56  ;;  %v5446_v55 = vld [vmem:[%s7974_s1 + $0x384] ss:$16 sps:$4 sm:$0xff]   ;;  %v5449_v56 = vld [vmem:[%s7974_s1 + $0x38c] ss:$16 sps:$4 sm:$0xff]  }
  0x37   :  { %3250 = vmatpush1.bf16.msra.mxu0 %v5358_v57  ;;  %3594 = vmatpush1.bf16.msra.mxu1 %v5359_v58  ;;  %v5444_v57 = vld [vmem:[%s7974_s1 + $0x380] ss:$16 sps:$4 sm:$0xff]   ;;  %v5447_v58 = vld [vmem:[%s7974_s1 + $0x388] ss:$16 sps:$4 sm:$0xff]  }
  0x38   :  { %3251 = vmatprep.subr.bf16.mxu0 %v5360_v59  ;;  %3595 = vmatprep.subr.bf16.mxu1 %v5362_v60  ;;  %v5452_v59 = vld [vmem:[%s7974_s1 + $0x3a4] ss:$16 sps:$4 sm:$0xff]   ;;  %v5455_v60 = vld [vmem:[%s7974_s1 + $0x3ac] ss:$16 sps:$4 sm:$0xff]  }
  0x3b   :  { %3252 = vmatpush1.bf16.msra.mxu0 %v5364_v61  ;;  %3596 = vmatpush1.bf16.msra.mxu1 %v5365_v62  ;;  %v5450_v61 = vld [vmem:[%s7974_s1 + $0x3a0] ss:$16 sps:$4 sm:$0xff]   ;;  %v5453_v62 = vld [vmem:[%s7974_s1 + $0x3a8] ss:$16 sps:$4 sm:$0xff]  }
  0x3c   :  { %3253 = vmatprep.subr.bf16.mxu0 %v5366_v63  ;;  %3597 = vmatprep.subr.bf16.mxu1 %v5368_v0  ;;  %v5458_v63 = vld [vmem:[%s7974_s1 + $0x3c4] ss:$16 sps:$4 sm:$0xff]   ;;  %v5461_v0 = vld [vmem:[%s7974_s1 + $0x3cc] ss:$16 sps:$4 sm:$0xff]  }
  0x3f   :  { %3254 = vmatpush1.bf16.msra.mxu0 %v5370_v1  ;;  %3598 = vmatpush1.bf16.msra.mxu1 %v5371_v2  ;;  %v5456_v1 = vld [vmem:[%s7974_s1 + $0x3c0] ss:$16 sps:$4 sm:$0xff]   ;;  %v5459_v2 = vld [vmem:[%s7974_s1 + $0x3c8] ss:$16 sps:$4 sm:$0xff]  }
  0x40   :  { %3266 = vmatprep.subr.bf16.mxu0 %v5374_v3  ;;  %3610 = vmatprep.subr.bf16.mxu1 %v5377_v4  ;;  %v5464_v3 = vld [vmem:[%s7974_s1 + $0x3e4] ss:$16 sps:$4 sm:$0xff]   ;;  %v5467_v4 = vld [vmem:[%s7974_s1 + $0x3ec] ss:$16 sps:$4 sm:$0xff]  }
  0x42   :  { %3256 = vmatmul.mubr.bf16.vlgmr.msra.gmra.mrb[0].mxu0 %v4529_v5  ;;  %3600 = vmatmul.mubr.bf16.vlgmr.msra.gmra.mrb[0].mxu1 %v4529_v5  ;;  %v5462_v5 = vld [vmem:[%s7974_s1 + $0x3e0] ss:$16 sps:$4 sm:$0xff]  }
  0x43   :  { %3267 = vmatpush1.bf16.msra.mxu0 %v5372_v6  ;;  %3611 = vmatpush1.bf16.msra.mxu1 %v5375_v7  ;;  %v5465_v6 = vld [vmem:[%s7974_s1 + $0x3e8] ss:$16 sps:$4 sm:$0xff]   ;;  %v5470_v7 = vld [vmem:[%s7974_s1 + $0x404] ss:$16 sps:$4 sm:$0xff]  }
  0x44   :  { %3268 = vmatprep.subr.bf16.mxu0 %v5380_v8  ;;  %3612 = vmatprep.subr.bf16.mxu1 %v5383_v9  ;;  %v5473_v8 = vld [vmem:[%s7974_s1 + $0x40c] ss:$16 sps:$4 sm:$0xff]   ;;  %v4531_v9 = vcombine.low %v6431_v30, %v6436_v31  ;;  %v5495_v30 = vld [vmem:[%s7974_s1 + $0x488] ss:$16 sps:$4 sm:$0xff]   ;;  %v5500_v31 = vld [vmem:[%s7974_s1 + $0x4a4] ss:$16 sps:$4 sm:$0xff]  }
  0x45   :  { %3298 = vmatprep.mubr.bf16.mxu0 %v4532_v34  ;;  %3642 = vmatprep.mubr.bf16.mxu1 %v4532_v34  ;;  %v5501_v34 = vld [vmem:[%s7974_s1 + $0x4a8] ss:$16 sps:$4 sm:$0xff]  }
  0x47   :  { %3269 = vmatpush1.bf16.msra.mxu0 %v5378_v10  ;;  %3613 = vmatpush1.bf16.msra.mxu1 %v5381_v11  ;;  %v5468_v10 = vld [vmem:[%s7974_s1 + $0x400] ss:$16 sps:$4 sm:$0xff]   ;;  %v5471_v11 = vld [vmem:[%s7974_s1 + $0x408] ss:$16 sps:$4 sm:$0xff]  }
  0x48   :  { %3270 = vmatprep.subr.bf16.mxu0 %v5386_v12  ;;  %3614 = vmatprep.subr.bf16.mxu1 %v5389_v13  ;;  %v5476_v12 = vld [vmem:[%s7974_s1 + $0x424] ss:$16 sps:$4 sm:$0xff]   ;;  %v5479_v13 = vld [vmem:[%s7974_s1 + $0x42c] ss:$16 sps:$4 sm:$0xff]  }
  0x4b   :  { %3271 = vmatpush1.bf16.msra.mxu0 %v5384_v14  ;;  %3615 = vmatpush1.bf16.msra.mxu1 %v5387_v15  ;;  %v6577_v14 = vld [vmem:[%s7975_s0 + $0x10] sm:$0xff] }
  0x4c   :  { %3272 = vmatprep.subr.bf16.mxu0 %v5392_v16  ;;  %3616 = vmatprep.subr.bf16.mxu1 %v5395_v17  ;;  %v6582_v15 = vld [vmem:[%s7975_s0 + $0x50] sm:$0xff] }
  0x4d   :  { %v4534_v16 = vcombine.high %v6577_v14, %v6582_v15  ;;  %v5474_v17 = vld [vmem:[%s7974_s1 + $0x420] ss:$16 sps:$4 sm:$0xff]  }
  0x4f   :  { %3273 = vmatpush1.bf16.msra.mxu0 %v5390_v18  ;;  %3617 = vmatpush1.bf16.msra.mxu1 %v5393_v19  ;;  %v5477_v18 = vld [vmem:[%s7974_s1 + $0x428] ss:$16 sps:$4 sm:$0xff]   ;;  %v5482_v19 = vld [vmem:[%s7974_s1 + $0x444] ss:$16 sps:$4 sm:$0xff]  }
  0x50   :  { %3274 = vmatprep.subr.bf16.mxu0 %v5398_v20  ;;  %3618 = vmatprep.subr.bf16.mxu1 %v5401_v21  ;;  %v5485_v20 = vld [vmem:[%s7974_s1 + $0x44c] ss:$16 sps:$4 sm:$0xff]   ;;  %v5480_v21 = vld [vmem:[%s7974_s1 + $0x440] ss:$16 sps:$4 sm:$0xff]  }
  0x53   :  { %3275 = vmatpush1.bf16.msra.mxu0 %v5396_v22  ;;  %3619 = vmatpush1.bf16.msra.mxu1 %v5399_v23  ;;  %v5483_v22 = vld [vmem:[%s7974_s1 + $0x448] ss:$16 sps:$4 sm:$0xff]   ;;  %v5488_v23 = vld [vmem:[%s7974_s1 + $0x464] ss:$16 sps:$4 sm:$0xff]  }
  0x54   :  { %3276 = vmatprep.subr.bf16.mxu0 %v5404_v24  ;;  %3620 = vmatprep.subr.bf16.mxu1 %v5407_v25  ;;  %v5491_v24 = vld [vmem:[%s7974_s1 + $0x46c] ss:$16 sps:$4 sm:$0xff]   ;;  %v5486_v25 = vld [vmem:[%s7974_s1 + $0x460] ss:$16 sps:$4 sm:$0xff]  }
  0x57   :  { %3277 = vmatpush1.bf16.msra.mxu0 %v5402_v26  ;;  %3621 = vmatpush1.bf16.msra.mxu1 %v5405_v27  ;;  %v5489_v26 = vld [vmem:[%s7974_s1 + $0x468] ss:$16 sps:$4 sm:$0xff]   ;;  %v5494_v27 = vld [vmem:[%s7974_s1 + $0x484] ss:$16 sps:$4 sm:$0xff]  }
  0x58   :  { %3278 = vmatprep.subr.bf16.mxu0 %v5410_v28  ;;  %3622 = vmatprep.subr.bf16.mxu1 %v5413_v29  ;;  %v5497_v28 = vld [vmem:[%s7974_s1 + $0x48c] ss:$16 sps:$4 sm:$0xff]   ;;  %v5492_v29 = vld [vmem:[%s7974_s1 + $0x480] ss:$16 sps:$4 sm:$0xff]  }
  0x5b   :  { %3279 = vmatpush1.bf16.msra.mxu0 %v5408_v32  ;;  %3623 = vmatpush1.bf16.msra.mxu1 %v5411_v33  ;;  %v5503_v32 = vld [vmem:[%s7974_s1 + $0x4ac] ss:$16 sps:$4 sm:$0xff]   ;;  %v5498_v33 = vld [vmem:[%s7974_s1 + $0x4a0] ss:$16 sps:$4 sm:$0xff]  }
  0x5c   :  { %3280 = vmatprep.subr.bf16.mxu0 %v5416_v35  ;;  %3624 = vmatprep.subr.bf16.mxu1 %v5419_v36  ;;  %v5506_v35 = vld [vmem:[%s7974_s1 + $0x4c4] ss:$16 sps:$4 sm:$0xff]   ;;  %v5509_v36 = vld [vmem:[%s7974_s1 + $0x4cc] ss:$16 sps:$4 sm:$0xff]  }
  0x5f   :  { %3281 = vmatpush1.bf16.msra.mxu0 %v5414_v37  ;;  %3625 = vmatpush1.bf16.msra.mxu1 %v5417_v38  ;;  %v5504_v37 = vld [vmem:[%s7974_s1 + $0x4c0] ss:$16 sps:$4 sm:$0xff]   ;;  %v5507_v38 = vld [vmem:[%s7974_s1 + $0x4c8] ss:$16 sps:$4 sm:$0xff]  }
  0x60   :  { %3282 = vmatprep.subr.bf16.mxu0 %v5422_v39  ;;  %3626 = vmatprep.subr.bf16.mxu1 %v5425_v40  ;;  %v5512_v39 = vld [vmem:[%s7974_s1 + $0x4e4] ss:$16 sps:$4 sm:$0xff]   ;;  %v5515_v40 = vld [vmem:[%s7974_s1 + $0x4ec] ss:$16 sps:$4 sm:$0xff]  }
  0x63   :  { %3283 = vmatpush1.bf16.msra.mxu0 %v5420_v41  ;;  %3627 = vmatpush1.bf16.msra.mxu1 %v5423_v42  ;;  %v5510_v41 = vld [vmem:[%s7974_s1 + $0x4e0] ss:$16 sps:$4 sm:$0xff]   ;;  %v5513_v42 = vld [vmem:[%s7974_s1 + $0x4e8] ss:$16 sps:$4 sm:$0xff]  }
  0x64   :  { %3284 = vmatprep.subr.bf16.mxu0 %v5428_v43  ;;  %3628 = vmatprep.subr.bf16.mxu1 %v5431_v44  ;;  %v5518_v43 = vld [vmem:[%s7974_s1 + $0x504] ss:$16 sps:$4 sm:$0xff]   ;;  %v5521_v44 = vld [vmem:[%s7974_s1 + $0x50c] ss:$16 sps:$4 sm:$0xff]  }
  0x67   :  { %3285 = vmatpush1.bf16.msra.mxu0 %v5426_v45  ;;  %3629 = vmatpush1.bf16.msra.mxu1 %v5429_v46  ;;  %v5516_v45 = vld [vmem:[%s7974_s1 + $0x500] ss:$16 sps:$4 sm:$0xff]   ;;  %v5519_v46 = vld [vmem:[%s7974_s1 + $0x508] ss:$16 sps:$4 sm:$0xff]  }
  0x68   :  { %3286 = vmatprep.subr.bf16.mxu0 %v5434_v47  ;;  %3630 = vmatprep.subr.bf16.mxu1 %v5437_v48  ;;  %v5524_v47 = vld [vmem:[%s7974_s1 + $0x524] ss:$16 sps:$4 sm:$0xff]   ;;  %v5527_v48 = vld [vmem:[%s7974_s1 + $0x52c] ss:$16 sps:$4 sm:$0xff]  }
  0x6b   :  { %3287 = vmatpush1.bf16.msra.mxu0 %v5432_v49  ;;  %3631 = vmatpush1.bf16.msra.mxu1 %v5435_v50  ;;  %v5522_v49 = vld [vmem:[%s7974_s1 + $0x520] ss:$16 sps:$4 sm:$0xff]   ;;  %v5525_v50 = vld [vmem:[%s7974_s1 + $0x528] ss:$16 sps:$4 sm:$0xff]  }
  0x6c   :  { %3288 = vmatprep.subr.bf16.mxu0 %v5440_v51  ;;  %3632 = vmatprep.subr.bf16.mxu1 %v5443_v52  ;;  %v5530_v51 = vld [vmem:[%s7974_s1 + $0x544] ss:$16 sps:$4 sm:$0xff]   ;;  %v5533_v52 = vld [vmem:[%s7974_s1 + $0x54c] ss:$16 sps:$4 sm:$0xff]  }
  0x6f   :  { %3289 = vmatpush1.bf16.msra.mxu0 %v5438_v53  ;;  %3633 = vmatpush1.bf16.msra.mxu1 %v5441_v54  ;;  %v5528_v53 = vld [vmem:[%s7974_s1 + $0x540] ss:$16 sps:$4 sm:$0xff]   ;;  %v5531_v54 = vld [vmem:[%s7974_s1 + $0x548] ss:$16 sps:$4 sm:$0xff]  }
  0x70   :  { %3290 = vmatprep.subr.bf16.mxu0 %v5446_v55  ;;  %3634 = vmatprep.subr.bf16.mxu1 %v5449_v56  ;;  %v5536_v55 = vld [vmem:[%s7974_s1 + $0x564] ss:$16 sps:$4 sm:$0xff]   ;;  %v5539_v56 = vld [vmem:[%s7974_s1 + $0x56c] ss:$16 sps:$4 sm:$0xff]  }
  0x73   :  { %3291 = vmatpush1.bf16.msra.mxu0 %v5444_v57  ;;  %3635 = vmatpush1.bf16.msra.mxu1 %v5447_v58  ;;  %v5534_v57 = vld [vmem:[%s7974_s1 + $0x560] ss:$16 sps:$4 sm:$0xff]   ;;  %v5537_v58 = vld [vmem:[%s7974_s1 + $0x568] ss:$16 sps:$4 sm:$0xff]  }
  0x74   :  { %3292 = vmatprep.subr.bf16.mxu0 %v5452_v59  ;;  %3636 = vmatprep.subr.bf16.mxu1 %v5455_v60  ;;  %v5542_v59 = vld [vmem:[%s7974_s1 + $0x584] ss:$16 sps:$4 sm:$0xff]   ;;  %v5545_v60 = vld [vmem:[%s7974_s1 + $0x58c] ss:$16 sps:$4 sm:$0xff]  }
  0x77   :  { %3293 = vmatpush1.bf16.msra.mxu0 %v5450_v61  ;;  %3637 = vmatpush1.bf16.msra.mxu1 %v5453_v62  ;;  %v5540_v61 = vld [vmem:[%s7974_s1 + $0x580] ss:$16 sps:$4 sm:$0xff]   ;;  %v5543_v62 = vld [vmem:[%s7974_s1 + $0x588] ss:$16 sps:$4 sm:$0xff]  }
  0x78   :  { %3294 = vmatprep.subr.bf16.mxu0 %v5458_v63  ;;  %3638 = vmatprep.subr.bf16.mxu1 %v5461_v0  ;;  %v5548_v63 = vld [vmem:[%s7974_s1 + $0x5a4] ss:$16 sps:$4 sm:$0xff]   ;;  %v5551_v0 = vld [vmem:[%s7974_s1 + $0x5ac] ss:$16 sps:$4 sm:$0xff]  }
  0x7b   :  { %3295 = vmatpush1.bf16.msra.mxu0 %v5456_v1  ;;  %3639 = vmatpush1.bf16.msra.mxu1 %v5459_v2  ;;  %v5546_v1 = vld [vmem:[%s7974_s1 + $0x5a0] ss:$16 sps:$4 sm:$0xff]   ;;  %v5549_v2 = vld [vmem:[%s7974_s1 + $0x5a8] ss:$16 sps:$4 sm:$0xff]  }
  0x7c   :  { %3296 = vmatprep.subr.bf16.mxu0 %v5464_v3  ;;  %3640 = vmatprep.subr.bf16.mxu1 %v5467_v4  ;;  %v5554_v3 = vld [vmem:[%s7974_s1 + $0x5c4] ss:$16 sps:$4 sm:$0xff]   ;;  %v5557_v4 = vld [vmem:[%s7974_s1 + $0x5cc] ss:$16 sps:$4 sm:$0xff]  }
  0x7f   :  { %3297 = vmatpush1.bf16.msra.mxu0 %v5462_v5  ;;  %3641 = vmatpush1.bf16.msra.mxu1 %v5465_v6  ;;  %v5552_v5 = vld [vmem:[%s7974_s1 + $0x5c0] ss:$16 sps:$4 sm:$0xff]   ;;  %v5555_v6 = vld [vmem:[%s7974_s1 + $0x5c8] ss:$16 sps:$4 sm:$0xff]  }
  0x80   :  { %3309 = vmatprep.subr.bf16.mxu0 %v5470_v7  ;;  %3653 = vmatprep.subr.bf16.mxu1 %v5473_v8  ;;  %v5560_v7 = vld [vmem:[%s7974_s1 + $0x5e4] ss:$16 sps:$4 sm:$0xff]   ;;  %v5563_v8 = vld [vmem:[%s7974_s1 + $0x5ec] ss:$16 sps:$4 sm:$0xff]  }
  0x82   :  { %3299 = vmatmul.mubr.bf16.vlgmr.msra.gmra.mrb[0].mxu0 %v4531_v9  ;;  %3643 = vmatmul.mubr.bf16.vlgmr.msra.gmra.mrb[0].mxu1 %v4531_v9  ;;  %v5558_v9 = vld [vmem:[%s7974_s1 + $0x5e0] ss:$16 sps:$4 sm:$0xff]  }
  0x83   :  { %3310 = vmatpush1.bf16.msra.mxu0 %v5468_v10  ;;  %3654 = vmatpush1.bf16.msra.mxu1 %v5471_v11  ;;  %v5561_v10 = vld [vmem:[%s7974_s1 + $0x5e8] ss:$16 sps:$4 sm:$0xff]   ;;  %v5566_v11 = vld [vmem:[%s7974_s1 + $0x604] ss:$16 sps:$4 sm:$0xff]  }
  0x84   :  { %3311 = vmatprep.subr.bf16.mxu0 %v5476_v12  ;;  %3655 = vmatprep.subr.bf16.mxu1 %v5479_v13  ;;  %v5569_v12 = vld [vmem:[%s7974_s1 + $0x60c] ss:$16 sps:$4 sm:$0xff]   ;;  %v5564_v13 = vld [vmem:[%s7974_s1 + $0x600] ss:$16 sps:$4 sm:$0xff]  }
  0x85   :  { %3341 = vmatprep.mubr.bf16.mxu0 %v4534_v16  ;;  %3685 = vmatprep.mubr.bf16.mxu1 %v4534_v16  ;;  %v5567_v16 = vld [vmem:[%s7974_s1 + $0x608] ss:$16 sps:$4 sm:$0xff]  }
  0x87   :  { %3312 = vmatpush1.bf16.msra.mxu0 %v5474_v17  ;;  %3656 = vmatpush1.bf16.msra.mxu1 %v5477_v18  ;;  %v4533_v17 = vcombine.low %v6577_v14, %v6582_v15  ;;  %v6777_v18 = vld [vmem:[%s7975_s0 + $0x18] sm:$0xff] }
  0x88   :  { %3313 = vmatprep.subr.bf16.mxu0 %v5482_v19  ;;  %3657 = vmatprep.subr.bf16.mxu1 %v5485_v20  ;;  %v6782_v19 = vld [vmem:[%s7975_s0 + $0x58] sm:$0xff]  ;;  %v5572_v20 = vld [vmem:[%s7974_s1 + $0x624] ss:$16 sps:$4 sm:$0xff]  }
  0x89   :  { %v5575_v14 = vld [vmem:[%s7974_s1 + $0x62c] ss:$16 sps:$4 sm:$0xff]   ;;  %v4536_v15 = vcombine.high %v6777_v18, %v6782_v19 }
  0x8b   :  { %3314 = vmatpush1.bf16.msra.mxu0 %v5480_v21  ;;  %3658 = vmatpush1.bf16.msra.mxu1 %v5483_v22  ;;  %v5570_v21 = vld [vmem:[%s7974_s1 + $0x620] ss:$16 sps:$4 sm:$0xff]   ;;  %v5573_v22 = vld [vmem:[%s7974_s1 + $0x628] ss:$16 sps:$4 sm:$0xff]  }
  0x8c   :  { %3315 = vmatprep.subr.bf16.mxu0 %v5488_v23  ;;  %3659 = vmatprep.subr.bf16.mxu1 %v5491_v24  ;;  %v5578_v23 = vld [vmem:[%s7974_s1 + $0x644] ss:$16 sps:$4 sm:$0xff]   ;;  %v5581_v24 = vld [vmem:[%s7974_s1 + $0x64c] ss:$16 sps:$4 sm:$0xff]  }
  0x8f   :  { %3316 = vmatpush1.bf16.msra.mxu0 %v5486_v25  ;;  %3660 = vmatpush1.bf16.msra.mxu1 %v5489_v26  ;;  %v5576_v25 = vld [vmem:[%s7974_s1 + $0x640] ss:$16 sps:$4 sm:$0xff]   ;;  %v5579_v26 = vld [vmem:[%s7974_s1 + $0x648] ss:$16 sps:$4 sm:$0xff]  }
  0x90   :  { %3317 = vmatprep.subr.bf16.mxu0 %v5494_v27  ;;  %3661 = vmatprep.subr.bf16.mxu1 %v5497_v28  ;;  %v5584_v27 = vld [vmem:[%s7974_s1 + $0x664] ss:$16 sps:$4 sm:$0xff]   ;;  %v5587_v28 = vld [vmem:[%s7974_s1 + $0x66c] ss:$16 sps:$4 sm:$0xff]  }
  0x93   :  { %3318 = vmatpush1.bf16.msra.mxu0 %v5492_v29  ;;  %3662 = vmatpush1.bf16.msra.mxu1 %v5495_v30  ;;  %v5582_v29 = vld [vmem:[%s7974_s1 + $0x660] ss:$16 sps:$4 sm:$0xff]   ;;  %v5585_v30 = vld [vmem:[%s7974_s1 + $0x668] ss:$16 sps:$4 sm:$0xff]  }
  0x94   :  { %3319 = vmatprep.subr.bf16.mxu0 %v5500_v31  ;;  %3663 = vmatprep.subr.bf16.mxu1 %v5503_v32  ;;  %v5590_v31 = vld [vmem:[%s7974_s1 + $0x684] ss:$16 sps:$4 sm:$0xff]   ;;  %v5593_v32 = vld [vmem:[%s7974_s1 + $0x68c] ss:$16 sps:$4 sm:$0xff]  }
  0x97   :  { %3320 = vmatpush1.bf16.msra.mxu0 %v5498_v33  ;;  %3664 = vmatpush1.bf16.msra.mxu1 %v5501_v34  ;;  %v5588_v33 = vld [vmem:[%s7974_s1 + $0x680] ss:$16 sps:$4 sm:$0xff]   ;;  %v5591_v34 = vld [vmem:[%s7974_s1 + $0x688] ss:$16 sps:$4 sm:$0xff]  }
  0x98   :  { %3321 = vmatprep.subr.bf16.mxu0 %v5506_v35  ;;  %3665 = vmatprep.subr.bf16.mxu1 %v5509_v36  ;;  %v5596_v35 = vld [vmem:[%s7974_s1 + $0x6a4] ss:$16 sps:$4 sm:$0xff]   ;;  %v5599_v36 = vld [vmem:[%s7974_s1 + $0x6ac] ss:$16 sps:$4 sm:$0xff]  }
  0x9b   :  { %3322 = vmatpush1.bf16.msra.mxu0 %v5504_v37  ;;  %3666 = vmatpush1.bf16.msra.mxu1 %v5507_v38  ;;  %v5594_v37 = vld [vmem:[%s7974_s1 + $0x6a0] ss:$16 sps:$4 sm:$0xff]   ;;  %v5597_v38 = vld [vmem:[%s7974_s1 + $0x6a8] ss:$16 sps:$4 sm:$0xff]  }
  0x9c   :  { %3323 = vmatprep.subr.bf16.mxu0 %v5512_v39  ;;  %3667 = vmatprep.subr.bf16.mxu1 %v5515_v40  ;;  %v5602_v39 = vld [vmem:[%s7974_s1 + $0x6c4] ss:$16 sps:$4 sm:$0xff]   ;;  %v5605_v40 = vld [vmem:[%s7974_s1 + $0x6cc] ss:$16 sps:$4 sm:$0xff]  }
  0x9f   :  { %3324 = vmatpush1.bf16.msra.mxu0 %v5510_v41  ;;  %3668 = vmatpush1.bf16.msra.mxu1 %v5513_v42  ;;  %v5600_v41 = vld [vmem:[%s7974_s1 + $0x6c0] ss:$16 sps:$4 sm:$0xff]   ;;  %v5603_v42 = vld [vmem:[%s7974_s1 + $0x6c8] ss:$16 sps:$4 sm:$0xff]  }
  0xa0   :  { %3325 = vmatprep.subr.bf16.mxu0 %v5518_v43  ;;  %3669 = vmatprep.subr.bf16.mxu1 %v5521_v44  ;;  %v5608_v43 = vld [vmem:[%s7974_s1 + $0x6e4] ss:$16 sps:$4 sm:$0xff]   ;;  %v5611_v44 = vld [vmem:[%s7974_s1 + $0x6ec] ss:$16 sps:$4 sm:$0xff]  }
  0xa3   :  { %3326 = vmatpush1.bf16.msra.mxu0 %v5516_v45  ;;  %3670 = vmatpush1.bf16.msra.mxu1 %v5519_v46  ;;  %v5606_v45 = vld [vmem:[%s7974_s1 + $0x6e0] ss:$16 sps:$4 sm:$0xff]   ;;  %v5609_v46 = vld [vmem:[%s7974_s1 + $0x6e8] ss:$16 sps:$4 sm:$0xff]  }
  0xa4   :  { %3327 = vmatprep.subr.bf16.mxu0 %v5524_v47  ;;  %3671 = vmatprep.subr.bf16.mxu1 %v5527_v48  ;;  %v5614_v47 = vld [vmem:[%s7974_s1 + $0x704] ss:$16 sps:$4 sm:$0xff]   ;;  %v5617_v48 = vld [vmem:[%s7974_s1 + $0x70c] ss:$16 sps:$4 sm:$0xff]  }
  0xa7   :  { %3328 = vmatpush1.bf16.msra.mxu0 %v5522_v49  ;;  %3672 = vmatpush1.bf16.msra.mxu1 %v5525_v50  ;;  %v5612_v49 = vld [vmem:[%s7974_s1 + $0x700] ss:$16 sps:$4 sm:$0xff]   ;;  %v5615_v50 = vld [vmem:[%s7974_s1 + $0x708] ss:$16 sps:$4 sm:$0xff]  }
  0xa8   :  { %3329 = vmatprep.subr.bf16.mxu0 %v5530_v51  ;;  %3673 = vmatprep.subr.bf16.mxu1 %v5533_v52  ;;  %v5620_v51 = vld [vmem:[%s7974_s1 + $0x724] ss:$16 sps:$4 sm:$0xff]   ;;  %v5623_v52 = vld [vmem:[%s7974_s1 + $0x72c] ss:$16 sps:$4 sm:$0xff]  }
  0xab   :  { %3330 = vmatpush1.bf16.msra.mxu0 %v5528_v53  ;;  %3674 = vmatpush1.bf16.msra.mxu1 %v5531_v54  ;;  %v5618_v53 = vld [vmem:[%s7974_s1 + $0x720] ss:$16 sps:$4 sm:$0xff]   ;;  %v5621_v54 = vld [vmem:[%s7974_s1 + $0x728] ss:$16 sps:$4 sm:$0xff]  }
  0xac   :  { %3331 = vmatprep.subr.bf16.mxu0 %v5536_v55  ;;  %3675 = vmatprep.subr.bf16.mxu1 %v5539_v56  ;;  %v5626_v55 = vld [vmem:[%s7974_s1 + $0x744] ss:$16 sps:$4 sm:$0xff]   ;;  %v5629_v56 = vld [vmem:[%s7974_s1 + $0x74c] ss:$16 sps:$4 sm:$0xff]  }
  0xaf   :  { %3332 = vmatpush1.bf16.msra.mxu0 %v5534_v57  ;;  %3676 = vmatpush1.bf16.msra.mxu1 %v5537_v58  ;;  %v5624_v57 = vld [vmem:[%s7974_s1 + $0x740] ss:$16 sps:$4 sm:$0xff]   ;;  %v5627_v58 = vld [vmem:[%s7974_s1 + $0x748] ss:$16 sps:$4 sm:$0xff]  }
  0xb0   :  { %3333 = vmatprep.subr.bf16.mxu0 %v5542_v59  ;;  %3677 = vmatprep.subr.bf16.mxu1 %v5545_v60  ;;  %v5632_v59 = vld [vmem:[%s7974_s1 + $0x764] ss:$16 sps:$4 sm:$0xff]   ;;  %v5635_v60 = vld [vmem:[%s7974_s1 + $0x76c] ss:$16 sps:$4 sm:$0xff]  }
  0xb3   :  { %3334 = vmatpush1.bf16.msra.mxu0 %v5540_v61  ;;  %3678 = vmatpush1.bf16.msra.mxu1 %v5543_v62  ;;  %v5630_v61 = vld [vmem:[%s7974_s1 + $0x760] ss:$16 sps:$4 sm:$0xff]   ;;  %v5633_v62 = vld [vmem:[%s7974_s1 + $0x768] ss:$16 sps:$4 sm:$0xff]  }
  0xb4   :  { %3335 = vmatprep.subr.bf16.mxu0 %v5548_v63  ;;  %3679 = vmatprep.subr.bf16.mxu1 %v5551_v0  ;;  %v5638_v63 = vld [vmem:[%s7974_s1 + $0x784] ss:$16 sps:$4 sm:$0xff]   ;;  %v5641_v0 = vld [vmem:[%s7974_s1 + $0x78c] ss:$16 sps:$4 sm:$0xff]  }
  0xb7   :  { %3336 = vmatpush1.bf16.msra.mxu0 %v5546_v1  ;;  %3680 = vmatpush1.bf16.msra.mxu1 %v5549_v2  ;;  %v5636_v1 = vld [vmem:[%s7974_s1 + $0x780] ss:$16 sps:$4 sm:$0xff]   ;;  %v5639_v2 = vld [vmem:[%s7974_s1 + $0x788] ss:$16 sps:$4 sm:$0xff]  }
  0xb8   :  { %3337 = vmatprep.subr.bf16.mxu0 %v5554_v3  ;;  %3681 = vmatprep.subr.bf16.mxu1 %v5557_v4  ;;  %v5644_v3 = vld [vmem:[%s7974_s1 + $0x7a4] ss:$16 sps:$4 sm:$0xff]   ;;  %v5647_v4 = vld [vmem:[%s7974_s1 + $0x7ac] ss:$16 sps:$4 sm:$0xff]  }
  0xbb   :  { %3338 = vmatpush1.bf16.msra.mxu0 %v5552_v5  ;;  %3682 = vmatpush1.bf16.msra.mxu1 %v5555_v6  ;;  %v5642_v5 = vld [vmem:[%s7974_s1 + $0x7a0] ss:$16 sps:$4 sm:$0xff]   ;;  %v5645_v6 = vld [vmem:[%s7974_s1 + $0x7a8] ss:$16 sps:$4 sm:$0xff]  }
  0xbc   :  { %3339 = vmatprep.subr.bf16.mxu0 %v5560_v7  ;;  %3683 = vmatprep.subr.bf16.mxu1 %v5563_v8  ;;  %v5650_v7 = vld [vmem:[%s7974_s1 + $0x7c4] ss:$16 sps:$4 sm:$0xff]   ;;  %v5653_v8 = vld [vmem:[%s7974_s1 + $0x7cc] ss:$16 sps:$4 sm:$0xff]  }
  0xbf   :  { %3340 = vmatpush1.bf16.msra.mxu0 %v5558_v9  ;;  %3684 = vmatpush1.bf16.msra.mxu1 %v5561_v10  ;;  %v5648_v9 = vld [vmem:[%s7974_s1 + $0x7c0] ss:$16 sps:$4 sm:$0xff]   ;;  %v5651_v10 = vld [vmem:[%s7974_s1 + $0x7c8] ss:$16 sps:$4 sm:$0xff]  }
  0xc0   :  { %3352 = vmatprep.subr.bf16.mxu0 %v5566_v11  ;;  %3696 = vmatprep.subr.bf16.mxu1 %v5569_v12  ;;  %v5656_v11 = vld [vmem:[%s7974_s1 + $0x7e4] ss:$16 sps:$4 sm:$0xff]   ;;  %v5659_v12 = vld [vmem:[%s7974_s1 + $0x7ec] ss:$16 sps:$4 sm:$0xff]  }
  0xc2   :  { %3342 = vmatmul.mubr.bf16.vlgmr.msra.gmra.mrb[0].mxu0 %v4533_v17  ;;  %3686 = vmatmul.mubr.bf16.vlgmr.msra.gmra.mrb[0].mxu1 %v4533_v17  ;;  %v5662_v17 = vld [vmem:[%s7974_s1 + $0x804] ss:$16 sps:$4 sm:$0xff]  }
  0xc3   :  { %3353 = vmatpush1.bf16.msra.mxu0 %v5564_v13  ;;  %3697 = vmatpush1.bf16.msra.mxu1 %v5567_v16  ;;  %v5654_v13 = vld [vmem:[%s7974_s1 + $0x7e0] ss:$16 sps:$4 sm:$0xff]   ;;  %v5657_v16 = vld [vmem:[%s7974_s1 + $0x7e8] ss:$16 sps:$4 sm:$0xff]  }
  0xc4   :  { %3354 = vmatprep.subr.bf16.mxu0 %v5572_v20  ;;  %3698 = vmatprep.subr.bf16.mxu1 %v5575_v14  ;;  %v5665_v20 = vld [vmem:[%s7974_s1 + $0x80c] ss:$16 sps:$4 sm:$0xff]   ;;  %v6975_v14 = vld [vmem:[%s7975_s0 + $0x20] sm:$0xff] }
  0xc5   :  { %3384 = vmatprep.mubr.bf16.mxu0 %v4536_v15  ;;  %3728 = vmatprep.mubr.bf16.mxu1 %v4536_v15  ;;  %v4535_v15 = vcombine.low %v6777_v18, %v6782_v19  ;;  %v5668_v18 = vld [vmem:[%s7974_s1 + $0x824] ss:$16 sps:$4 sm:$0xff]   ;;  %v5671_v19 = vld [vmem:[%s7974_s1 + $0x82c] ss:$16 sps:$4 sm:$0xff]  }
  0xc7   :  { %3355 = vmatpush1.bf16.msra.mxu0 %v5570_v21  ;;  %3699 = vmatpush1.bf16.msra.mxu1 %v5573_v22  ;;  %v6982_v21 = vld [vmem:[%s7975_s0 + $0x60] sm:$0xff] }
  0xc8   :  { %3356 = vmatprep.subr.bf16.mxu0 %v5578_v23  ;;  %3700 = vmatprep.subr.bf16.mxu1 %v5581_v24  ;;  %v5660_v22 = vld [vmem:[%s7974_s1 + $0x800] ss:$16 sps:$4 sm:$0xff]   ;;  %v5663_v23 = vld [vmem:[%s7974_s1 + $0x808] ss:$16 sps:$4 sm:$0xff]   ;;  %v4538_v24 = vcombine.high %v6975_v14, %v6982_v21 }
  0xcb   :  { %3357 = vmatpush1.bf16.msra.mxu0 %v5576_v25  ;;  %3701 = vmatpush1.bf16.msra.mxu1 %v5579_v26  ;;  %v5666_v25 = vld [vmem:[%s7974_s1 + $0x820] ss:$16 sps:$4 sm:$0xff]   ;;  %v5669_v26 = vld [vmem:[%s7974_s1 + $0x828] ss:$16 sps:$4 sm:$0xff]  }
  0xcc   :  { %3358 = vmatprep.subr.bf16.mxu0 %v5584_v27  ;;  %3702 = vmatprep.subr.bf16.mxu1 %v5587_v28  ;;  %v5674_v27 = vld [vmem:[%s7974_s1 + $0x844] ss:$16 sps:$4 sm:$0xff]   ;;  %v5677_v28 = vld [vmem:[%s7974_s1 + $0x84c] ss:$16 sps:$4 sm:$0xff]  }
  0xcf   :  { %3359 = vmatpush1.bf16.msra.mxu0 %v5582_v29  ;;  %3703 = vmatpush1.bf16.msra.mxu1 %v5585_v30  ;;  %v5672_v29 = vld [vmem:[%s7974_s1 + $0x840] ss:$16 sps:$4 sm:$0xff]   ;;  %v5675_v30 = vld [vmem:[%s7974_s1 + $0x848] ss:$16 sps:$4 sm:$0xff]  }
  0xd0   :  { %3360 = vmatprep.subr.bf16.mxu0 %v5590_v31  ;;  %3704 = vmatprep.subr.bf16.mxu1 %v5593_v32  ;;  %v5680_v31 = vld [vmem:[%s7974_s1 + $0x864] ss:$16 sps:$4 sm:$0xff]   ;;  %v5683_v32 = vld [vmem:[%s7974_s1 + $0x86c] ss:$16 sps:$4 sm:$0xff]  }
  0xd3   :  { %3361 = vmatpush1.bf16.msra.mxu0 %v5588_v33  ;;  %3705 = vmatpush1.bf16.msra.mxu1 %v5591_v34  ;;  %v5678_v33 = vld [vmem:[%s7974_s1 + $0x860] ss:$16 sps:$4 sm:$0xff]   ;;  %v5681_v34 = vld [vmem:[%s7974_s1 + $0x868] ss:$16 sps:$4 sm:$0xff]  }
  0xd4   :  { %3362 = vmatprep.subr.bf16.mxu0 %v5596_v35  ;;  %3706 = vmatprep.subr.bf16.mxu1 %v5599_v36  ;;  %v5686_v35 = vld [vmem:[%s7974_s1 + $0x884] ss:$16 sps:$4 sm:$0xff]   ;;  %v5689_v36 = vld [vmem:[%s7974_s1 + $0x88c] ss:$16 sps:$4 sm:$0xff]  }
  0xd7   :  { %3363 = vmatpush1.bf16.msra.mxu0 %v5594_v37  ;;  %3707 = vmatpush1.bf16.msra.mxu1 %v5597_v38  ;;  %v5684_v37 = vld [vmem:[%s7974_s1 + $0x880] ss:$16 sps:$4 sm:$0xff]   ;;  %v5687_v38 = vld [vmem:[%s7974_s1 + $0x888] ss:$16 sps:$4 sm:$0xff]  }
  0xd8   :  { %3364 = vmatprep.subr.bf16.mxu0 %v5602_v39  ;;  %3708 = vmatprep.subr.bf16.mxu1 %v5605_v40  ;;  %v5692_v39 = vld [vmem:[%s7974_s1 + $0x8a4] ss:$16 sps:$4 sm:$0xff]   ;;  %v5695_v40 = vld [vmem:[%s7974_s1 + $0x8ac] ss:$16 sps:$4 sm:$0xff]  }
  0xdb   :  { %3365 = vmatpush1.bf16.msra.mxu0 %v5600_v41  ;;  %3709 = vmatpush1.bf16.msra.mxu1 %v5603_v42  ;;  %v5690_v41 = vld [vmem:[%s7974_s1 + $0x8a0] ss:$16 sps:$4 sm:$0xff]   ;;  %v5693_v42 = vld [vmem:[%s7974_s1 + $0x8a8] ss:$16 sps:$4 sm:$0xff]  }
  0xdc   :  { %3366 = vmatprep.subr.bf16.mxu0 %v5608_v43  ;;  %3710 = vmatprep.subr.bf16.mxu1 %v5611_v44  ;;  %v5698_v43 = vld [vmem:[%s7974_s1 + $0x8c4] ss:$16 sps:$4 sm:$0xff]   ;;  %v5701_v44 = vld [vmem:[%s7974_s1 + $0x8cc] ss:$16 sps:$4 sm:$0xff]  }
  0xdf   :  { %3367 = vmatpush1.bf16.msra.mxu0 %v5606_v45  ;;  %3711 = vmatpush1.bf16.msra.mxu1 %v5609_v46  ;;  %v5696_v45 = vld [vmem:[%s7974_s1 + $0x8c0] ss:$16 sps:$4 sm:$0xff]   ;;  %v5699_v46 = vld [vmem:[%s7974_s1 + $0x8c8] ss:$16 sps:$4 sm:$0xff]  }
  0xe0   :  { %3368 = vmatprep.subr.bf16.mxu0 %v5614_v47  ;;  %3712 = vmatprep.subr.bf16.mxu1 %v5617_v48  ;;  %v5704_v47 = vld [vmem:[%s7974_s1 + $0x8e4] ss:$16 sps:$4 sm:$0xff]   ;;  %v5707_v48 = vld [vmem:[%s7974_s1 + $0x8ec] ss:$16 sps:$4 sm:$0xff]  }
  0xe3   :  { %3369 = vmatpush1.bf16.msra.mxu0 %v5612_v49  ;;  %3713 = vmatpush1.bf16.msra.mxu1 %v5615_v50  ;;  %v5702_v49 = vld [vmem:[%s7974_s1 + $0x8e0] ss:$16 sps:$4 sm:$0xff]   ;;  %v5705_v50 = vld [vmem:[%s7974_s1 + $0x8e8] ss:$16 sps:$4 sm:$0xff]  }
  0xe4   :  { %3370 = vmatprep.subr.bf16.mxu0 %v5620_v51  ;;  %3714 = vmatprep.subr.bf16.mxu1 %v5623_v52  ;;  %v5710_v51 = vld [vmem:[%s7974_s1 + $0x904] ss:$16 sps:$4 sm:$0xff]   ;;  %v5713_v52 = vld [vmem:[%s7974_s1 + $0x90c] ss:$16 sps:$4 sm:$0xff]  }
  0xe7   :  { %3371 = vmatpush1.bf16.msra.mxu0 %v5618_v53  ;;  %3715 = vmatpush1.bf16.msra.mxu1 %v5621_v54  ;;  %v5708_v53 = vld [vmem:[%s7974_s1 + $0x900] ss:$16 sps:$4 sm:$0xff]   ;;  %v5711_v54 = vld [vmem:[%s7974_s1 + $0x908] ss:$16 sps:$4 sm:$0xff]  }
  0xe8   :  { %3372 = vmatprep.subr.bf16.mxu0 %v5626_v55  ;;  %3716 = vmatprep.subr.bf16.mxu1 %v5629_v56  ;;  %v5716_v55 = vld [vmem:[%s7974_s1 + $0x924] ss:$16 sps:$4 sm:$0xff]   ;;  %v5719_v56 = vld [vmem:[%s7974_s1 + $0x92c] ss:$16 sps:$4 sm:$0xff]  }
  0xeb   :  { %3373 = vmatpush1.bf16.msra.mxu0 %v5624_v57  ;;  %3717 = vmatpush1.bf16.msra.mxu1 %v5627_v58  ;;  %v5714_v57 = vld [vmem:[%s7974_s1 + $0x920] ss:$16 sps:$4 sm:$0xff]   ;;  %v5717_v58 = vld [vmem:[%s7974_s1 + $0x928] ss:$16 sps:$4 sm:$0xff]  }
  0xec   :  { %3374 = vmatprep.subr.bf16.mxu0 %v5632_v59  ;;  %3718 = vmatprep.subr.bf16.mxu1 %v5635_v60  ;;  %v5722_v59 = vld [vmem:[%s7974_s1 + $0x944] ss:$16 sps:$4 sm:$0xff]   ;;  %v5725_v60 = vld [vmem:[%s7974_s1 + $0x94c] ss:$16 sps:$4 sm:$0xff]  }
  0xef   :  { %3375 = vmatpush1.bf16.msra.mxu0 %v5630_v61  ;;  %3719 = vmatpush1.bf16.msra.mxu1 %v5633_v62  ;;  %v5720_v61 = vld [vmem:[%s7974_s1 + $0x940] ss:$16 sps:$4 sm:$0xff]   ;;  %v5723_v62 = vld [vmem:[%s7974_s1 + $0x948] ss:$16 sps:$4 sm:$0xff]  }
  0xf0   :  { %3376 = vmatprep.subr.bf16.mxu0 %v5638_v63  ;;  %3720 = vmatprep.subr.bf16.mxu1 %v5641_v0  ;;  %v5728_v63 = vld [vmem:[%s7974_s1 + $0x964] ss:$16 sps:$4 sm:$0xff]   ;;  %v5731_v0 = vld [vmem:[%s7974_s1 + $0x96c] ss:$16 sps:$4 sm:$0xff]  }
  0xf3   :  { %3377 = vmatpush1.bf16.msra.mxu0 %v5636_v1  ;;  %3721 = vmatpush1.bf16.msra.mxu1 %v5639_v2  ;;  %v5726_v1 = vld [vmem:[%s7974_s1 + $0x960] ss:$16 sps:$4 sm:$0xff]   ;;  %v5729_v2 = vld [vmem:[%s7974_s1 + $0x968] ss:$16 sps:$4 sm:$0xff]  }
  0xf4   :  { %3378 = vmatprep.subr.bf16.mxu0 %v5644_v3  ;;  %3722 = vmatprep.subr.bf16.mxu1 %v5647_v4  ;;  %v5734_v3 = vld [vmem:[%s7974_s1 + $0x984] ss:$16 sps:$4 sm:$0xff]   ;;  %v5737_v4 = vld [vmem:[%s7974_s1 + $0x98c] ss:$16 sps:$4 sm:$0xff]  }
  0xf7   :  { %3379 = vmatpush1.bf16.msra.mxu0 %v5642_v5  ;;  %3723 = vmatpush1.bf16.msra.mxu1 %v5645_v6  ;;  %v5732_v5 = vld [vmem:[%s7974_s1 + $0x980] ss:$16 sps:$4 sm:$0xff]   ;;  %v5735_v6 = vld [vmem:[%s7974_s1 + $0x988] ss:$16 sps:$4 sm:$0xff]  }
  0xf8   :  { %3380 = vmatprep.subr.bf16.mxu0 %v5650_v7  ;;  %3724 = vmatprep.subr.bf16.mxu1 %v5653_v8  ;;  %v5740_v7 = vld [vmem:[%s7974_s1 + $0x9a4] ss:$16 sps:$4 sm:$0xff]   ;;  %v5743_v8 = vld [vmem:[%s7974_s1 + $0x9ac] ss:$16 sps:$4 sm:$0xff]  }
  0xfb   :  { %3381 = vmatpush1.bf16.msra.mxu0 %v5648_v9  ;;  %3725 = vmatpush1.bf16.msra.mxu1 %v5651_v10  ;;  %v5738_v9 = vld [vmem:[%s7974_s1 + $0x9a0] ss:$16 sps:$4 sm:$0xff]   ;;  %v5741_v10 = vld [vmem:[%s7974_s1 + $0x9a8] ss:$16 sps:$4 sm:$0xff]  }
  0xfc   :  { %3382 = vmatprep.subr.bf16.mxu0 %v5656_v11  ;;  %3726 = vmatprep.subr.bf16.mxu1 %v5659_v12  ;;  %v5746_v11 = vld [vmem:[%s7974_s1 + $0x9c4] ss:$16 sps:$4 sm:$0xff]   ;;  %v5749_v12 = vld [vmem:[%s7974_s1 + $0x9cc] ss:$16 sps:$4 sm:$0xff]  }
  0xff   :  { %3383 = vmatpush1.bf16.msra.mxu0 %v5654_v13  ;;  %3727 = vmatpush1.bf16.msra.mxu1 %v5657_v16  ;;  %v5744_v13 = vld [vmem:[%s7974_s1 + $0x9c0] ss:$16 sps:$4 sm:$0xff]   ;;  %v5747_v16 = vld [vmem:[%s7974_s1 + $0x9c8] ss:$16 sps:$4 sm:$0xff]  }
 0x100   :  { %3395 = vmatprep.subr.bf16.mxu0 %v5662_v17  ;;  %3739 = vmatprep.subr.bf16.mxu1 %v5665_v20  ;;  %v5752_v17 = vld [vmem:[%s7974_s1 + $0x9e4] ss:$16 sps:$4 sm:$0xff]   ;;  %v5755_v20 = vld [vmem:[%s7974_s1 + $0x9ec] ss:$16 sps:$4 sm:$0xff]  }
 0x102   :  { %3385 = vmatmul.mubr.bf16.vlgmr.msra.gmra.mrb[0].mxu0 %v4535_v15  ;;  %3729 = vmatmul.mubr.bf16.vlgmr.msra.gmra.mrb[0].mxu1 %v4535_v15  ;;  %v5750_v15 = vld [vmem:[%s7974_s1 + $0x9e0] ss:$16 sps:$4 sm:$0xff]  }
 0x103   :  { %3396 = vmatpush1.bf16.msra.mxu0 %v5660_v22  ;;  %3740 = vmatpush1.bf16.msra.mxu1 %v5663_v23  ;;  %v5753_v22 = vld [vmem:[%s7974_s1 + $0x9e8] ss:$16 sps:$4 sm:$0xff]   ;;  %v5758_v23 = vld [vmem:[%s7974_s1 + $0xa04] ss:$16 sps:$4 sm:$0xff]  }
 0x104   :  { %3397 = vmatprep.subr.bf16.mxu0 %v5668_v18  ;;  %3741 = vmatprep.subr.bf16.mxu1 %v5671_v19  ;;  %v5761_v18 = vld [vmem:[%s7974_s1 + $0xa0c] ss:$16 sps:$4 sm:$0xff]  }
 0x105   :  { %3427 = vmatprep.mubr.bf16.mxu0 %v4538_v24  ;;  %3771 = vmatprep.mubr.bf16.mxu1 %v4538_v24  ;;  %v7181_v19 = vld [vmem:[%s7975_s0 + $0x28] sm:$0xff] }
 0x106   :  { %v7186_v24 = vld [vmem:[%s7975_s0 + $0x68] sm:$0xff] }
 0x107   :  { %3398 = vmatpush1.bf16.msra.mxu0 %v5666_v25  ;;  %3742 = vmatpush1.bf16.msra.mxu1 %v5669_v26  ;;  %v4537_v25 = vcombine.low %v6975_v14, %v6982_v21  ;;  %v5756_v26 = vld [vmem:[%s7974_s1 + $0xa00] ss:$16 sps:$4 sm:$0xff]   ;;  %v5767_v14 = vld [vmem:[%s7974_s1 + $0xa2c] ss:$16 sps:$4 sm:$0xff]   ;;  %v4540_v21 = vcombine.high %v7181_v19, %v7186_v24 }
 0x108   :  { %3399 = vmatprep.subr.bf16.mxu0 %v5674_v27  ;;  %3743 = vmatprep.subr.bf16.mxu1 %v5677_v28  ;;  %v5759_v27 = vld [vmem:[%s7974_s1 + $0xa08] ss:$16 sps:$4 sm:$0xff]   ;;  %v5764_v28 = vld [vmem:[%s7974_s1 + $0xa24] ss:$16 sps:$4 sm:$0xff]  }
 0x10b   :  { %3400 = vmatpush1.bf16.msra.mxu0 %v5672_v29  ;;  %3744 = vmatpush1.bf16.msra.mxu1 %v5675_v30  ;;  %v5762_v29 = vld [vmem:[%s7974_s1 + $0xa20] ss:$16 sps:$4 sm:$0xff]   ;;  %v5765_v30 = vld [vmem:[%s7974_s1 + $0xa28] ss:$16 sps:$4 sm:$0xff]  }
 0x10c   :  { %3401 = vmatprep.subr.bf16.mxu0 %v5680_v31  ;;  %3745 = vmatprep.subr.bf16.mxu1 %v5683_v32  ;;  %v5770_v31 = vld [vmem:[%s7974_s1 + $0xa44] ss:$16 sps:$4 sm:$0xff]   ;;  %v5773_v32 = vld [vmem:[%s7974_s1 + $0xa4c] ss:$16 sps:$4 sm:$0xff]  }
 0x10f   :  { %3402 = vmatpush1.bf16.msra.mxu0 %v5678_v33  ;;  %3746 = vmatpush1.bf16.msra.mxu1 %v5681_v34  ;;  %v5768_v33 = vld [vmem:[%s7974_s1 + $0xa40] ss:$16 sps:$4 sm:$0xff]   ;;  %v5771_v34 = vld [vmem:[%s7974_s1 + $0xa48] ss:$16 sps:$4 sm:$0xff]  }
 0x110   :  { %3403 = vmatprep.subr.bf16.mxu0 %v5686_v35  ;;  %3747 = vmatprep.subr.bf16.mxu1 %v5689_v36  ;;  %v5776_v35 = vld [vmem:[%s7974_s1 + $0xa64] ss:$16 sps:$4 sm:$0xff]   ;;  %v5779_v36 = vld [vmem:[%s7974_s1 + $0xa6c] ss:$16 sps:$4 sm:$0xff]  }
 0x113   :  { %3404 = vmatpush1.bf16.msra.mxu0 %v5684_v37  ;;  %3748 = vmatpush1.bf16.msra.mxu1 %v5687_v38  ;;  %v5774_v37 = vld [vmem:[%s7974_s1 + $0xa60] ss:$16 sps:$4 sm:$0xff]   ;;  %v5777_v38 = vld [vmem:[%s7974_s1 + $0xa68] ss:$16 sps:$4 sm:$0xff]  }
 0x114   :  { %3405 = vmatprep.subr.bf16.mxu0 %v5692_v39  ;;  %3749 = vmatprep.subr.bf16.mxu1 %v5695_v40  ;;  %v5782_v39 = vld [vmem:[%s7974_s1 + $0xa84] ss:$16 sps:$4 sm:$0xff]   ;;  %v5785_v40 = vld [vmem:[%s7974_s1 + $0xa8c] ss:$16 sps:$4 sm:$0xff]  }
 0x117   :  { %3406 = vmatpush1.bf16.msra.mxu0 %v5690_v41  ;;  %3750 = vmatpush1.bf16.msra.mxu1 %v5693_v42  ;;  %v5780_v41 = vld [vmem:[%s7974_s1 + $0xa80] ss:$16 sps:$4 sm:$0xff]   ;;  %v5783_v42 = vld [vmem:[%s7974_s1 + $0xa88] ss:$16 sps:$4 sm:$0xff]  }
 0x118   :  { %3407 = vmatprep.subr.bf16.mxu0 %v5698_v43  ;;  %3751 = vmatprep.subr.bf16.mxu1 %v5701_v44  ;;  %v5788_v43 = vld [vmem:[%s7974_s1 + $0xaa4] ss:$16 sps:$4 sm:$0xff]   ;;  %v5791_v44 = vld [vmem:[%s7974_s1 + $0xaac] ss:$16 sps:$4 sm:$0xff]  }
 0x11b   :  { %3408 = vmatpush1.bf16.msra.mxu0 %v5696_v45  ;;  %3752 = vmatpush1.bf16.msra.mxu1 %v5699_v46  ;;  %v5786_v45 = vld [vmem:[%s7974_s1 + $0xaa0] ss:$16 sps:$4 sm:$0xff]   ;;  %v5789_v46 = vld [vmem:[%s7974_s1 + $0xaa8] ss:$16 sps:$4 sm:$0xff]  }
 0x11c   :  { %3409 = vmatprep.subr.bf16.mxu0 %v5704_v47  ;;  %3753 = vmatprep.subr.bf16.mxu1 %v5707_v48  ;;  %v5794_v47 = vld [vmem:[%s7974_s1 + $0xac4] ss:$16 sps:$4 sm:$0xff]   ;;  %v5797_v48 = vld [vmem:[%s7974_s1 + $0xacc] ss:$16 sps:$4 sm:$0xff]  }
 0x11f   :  { %3410 = vmatpush1.bf16.msra.mxu0 %v5702_v49  ;;  %3754 = vmatpush1.bf16.msra.mxu1 %v5705_v50  ;;  %v5792_v49 = vld [vmem:[%s7974_s1 + $0xac0] ss:$16 sps:$4 sm:$0xff]   ;;  %v5795_v50 = vld [vmem:[%s7974_s1 + $0xac8] ss:$16 sps:$4 sm:$0xff]  }
 0x120   :  { %3411 = vmatprep.subr.bf16.mxu0 %v5710_v51  ;;  %3755 = vmatprep.subr.bf16.mxu1 %v5713_v52  ;;  %v5800_v51 = vld [vmem:[%s7974_s1 + $0xae4] ss:$16 sps:$4 sm:$0xff]   ;;  %v5803_v52 = vld [vmem:[%s7974_s1 + $0xaec] ss:$16 sps:$4 sm:$0xff]  }
 0x123   :  { %3412 = vmatpush1.bf16.msra.mxu0 %v5708_v53  ;;  %3756 = vmatpush1.bf16.msra.mxu1 %v5711_v54  ;;  %v5798_v53 = vld [vmem:[%s7974_s1 + $0xae0] ss:$16 sps:$4 sm:$0xff]   ;;  %v5801_v54 = vld [vmem:[%s7974_s1 + $0xae8] ss:$16 sps:$4 sm:$0xff]  }
 0x124   :  { %3413 = vmatprep.subr.bf16.mxu0 %v5716_v55  ;;  %3757 = vmatprep.subr.bf16.mxu1 %v5719_v56  ;;  %v5806_v55 = vld [vmem:[%s7974_s1 + $0xb04] ss:$16 sps:$4 sm:$0xff]   ;;  %v5809_v56 = vld [vmem:[%s7974_s1 + $0xb0c] ss:$16 sps:$4 sm:$0xff]  }
 0x127   :  { %3414 = vmatpush1.bf16.msra.mxu0 %v5714_v57  ;;  %3758 = vmatpush1.bf16.msra.mxu1 %v5717_v58  ;;  %v5804_v57 = vld [vmem:[%s7974_s1 + $0xb00] ss:$16 sps:$4 sm:$0xff]   ;;  %v5807_v58 = vld [vmem:[%s7974_s1 + $0xb08] ss:$16 sps:$4 sm:$0xff]  }
 0x128   :  { %3415 = vmatprep.subr.bf16.mxu0 %v5722_v59  ;;  %3759 = vmatprep.subr.bf16.mxu1 %v5725_v60  ;;  %v5812_v59 = vld [vmem:[%s7974_s1 + $0xb24] ss:$16 sps:$4 sm:$0xff]   ;;  %v5815_v60 = vld [vmem:[%s7974_s1 + $0xb2c] ss:$16 sps:$4 sm:$0xff]  }
 0x12b   :  { %3416 = vmatpush1.bf16.msra.mxu0 %v5720_v61  ;;  %3760 = vmatpush1.bf16.msra.mxu1 %v5723_v62  ;;  %v5810_v61 = vld [vmem:[%s7974_s1 + $0xb20] ss:$16 sps:$4 sm:$0xff]   ;;  %v5813_v62 = vld [vmem:[%s7974_s1 + $0xb28] ss:$16 sps:$4 sm:$0xff]  }
 0x12c   :  { %3417 = vmatprep.subr.bf16.mxu0 %v5728_v63  ;;  %3761 = vmatprep.subr.bf16.mxu1 %v5731_v0  ;;  %v5818_v63 = vld [vmem:[%s7974_s1 + $0xb44] ss:$16 sps:$4 sm:$0xff]   ;;  %v5821_v0 = vld [vmem:[%s7974_s1 + $0xb4c] ss:$16 sps:$4 sm:$0xff]  }
 0x12f   :  { %3418 = vmatpush1.bf16.msra.mxu0 %v5726_v1  ;;  %3762 = vmatpush1.bf16.msra.mxu1 %v5729_v2  ;;  %v5816_v1 = vld [vmem:[%s7974_s1 + $0xb40] ss:$16 sps:$4 sm:$0xff]   ;;  %v5819_v2 = vld [vmem:[%s7974_s1 + $0xb48] ss:$16 sps:$4 sm:$0xff]  }
 0x130   :  { %3419 = vmatprep.subr.bf16.mxu0 %v5734_v3  ;;  %3763 = vmatprep.subr.bf16.mxu1 %v5737_v4  ;;  %v5824_v3 = vld [vmem:[%s7974_s1 + $0xb64] ss:$16 sps:$4 sm:$0xff]   ;;  %v5827_v4 = vld [vmem:[%s7974_s1 + $0xb6c] ss:$16 sps:$4 sm:$0xff]  }
 0x133   :  { %3420 = vmatpush1.bf16.msra.mxu0 %v5732_v5  ;;  %3764 = vmatpush1.bf16.msra.mxu1 %v5735_v6  ;;  %v5822_v5 = vld [vmem:[%s7974_s1 + $0xb60] ss:$16 sps:$4 sm:$0xff]   ;;  %v5825_v6 = vld [vmem:[%s7974_s1 + $0xb68] ss:$16 sps:$4 sm:$0xff]  }
 0x134   :  { %3421 = vmatprep.subr.bf16.mxu0 %v5740_v7  ;;  %3765 = vmatprep.subr.bf16.mxu1 %v5743_v8  ;;  %v5830_v7 = vld [vmem:[%s7974_s1 + $0xb84] ss:$16 sps:$4 sm:$0xff]   ;;  %v5833_v8 = vld [vmem:[%s7974_s1 + $0xb8c] ss:$16 sps:$4 sm:$0xff]  }
 0x137   :  { %3422 = vmatpush1.bf16.msra.mxu0 %v5738_v9  ;;  %3766 = vmatpush1.bf16.msra.mxu1 %v5741_v10  ;;  %v5828_v9 = vld [vmem:[%s7974_s1 + $0xb80] ss:$16 sps:$4 sm:$0xff]   ;;  %v5831_v10 = vld [vmem:[%s7974_s1 + $0xb88] ss:$16 sps:$4 sm:$0xff]  }
 0x138   :  { %3423 = vmatprep.subr.bf16.mxu0 %v5746_v11  ;;  %3767 = vmatprep.subr.bf16.mxu1 %v5749_v12  ;;  %v5836_v11 = vld [vmem:[%s7974_s1 + $0xba4] ss:$16 sps:$4 sm:$0xff]   ;;  %v5839_v12 = vld [vmem:[%s7974_s1 + $0xbac] ss:$16 sps:$4 sm:$0xff]  }
 0x13b   :  { %3424 = vmatpush1.bf16.msra.mxu0 %v5744_v13  ;;  %3768 = vmatpush1.bf16.msra.mxu1 %v5747_v16  ;;  %v5834_v13 = vld [vmem:[%s7974_s1 + $0xba0] ss:$16 sps:$4 sm:$0xff]   ;;  %v5837_v16 = vld [vmem:[%s7974_s1 + $0xba8] ss:$16 sps:$4 sm:$0xff]  }
 0x13c   :  { %3425 = vmatprep.subr.bf16.mxu0 %v5752_v17  ;;  %3769 = vmatprep.subr.bf16.mxu1 %v5755_v20  ;;  %v5842_v17 = vld [vmem:[%s7974_s1 + $0xbc4] ss:$16 sps:$4 sm:$0xff]   ;;  %v5845_v20 = vld [vmem:[%s7974_s1 + $0xbcc] ss:$16 sps:$4 sm:$0xff]  }
 0x13f   :  { %3426 = vmatpush1.bf16.msra.mxu0 %v5750_v15  ;;  %3770 = vmatpush1.bf16.msra.mxu1 %v5753_v22  ;;  %v5840_v15 = vld [vmem:[%s7974_s1 + $0xbc0] ss:$16 sps:$4 sm:$0xff]   ;;  %v5843_v22 = vld [vmem:[%s7974_s1 + $0xbc8] ss:$16 sps:$4 sm:$0xff]  }
 0x140   :  { %3438 = vmatprep.subr.bf16.mxu0 %v5758_v23  ;;  %3782 = vmatprep.subr.bf16.mxu1 %v5761_v18  ;;  %v5848_v23 = vld [vmem:[%s7974_s1 + $0xbe4] ss:$16 sps:$4 sm:$0xff]   ;;  %v5851_v18 = vld [vmem:[%s7974_s1 + $0xbec] ss:$16 sps:$4 sm:$0xff]  }
 0x142   :  { %3428 = vmatmul.mubr.bf16.vlgmr.msra.gmra.mrb[0].mxu0 %v4537_v25  ;;  %3772 = vmatmul.mubr.bf16.vlgmr.msra.gmra.mrb[0].mxu1 %v4537_v25  ;;  %v5846_v25 = vld [vmem:[%s7974_s1 + $0xbe0] ss:$16 sps:$4 sm:$0xff]  }
 0x143   :  { %3439 = vmatpush1.bf16.msra.mxu0 %v5756_v26  ;;  %3783 = vmatpush1.bf16.msra.mxu1 %v5759_v27  ;;  %v5849_v26 = vld [vmem:[%s7974_s1 + $0xbe8] ss:$16 sps:$4 sm:$0xff]   ;;  %v5854_v27 = vld [vmem:[%s7974_s1 + $0xc04] ss:$16 sps:$4 sm:$0xff]  }
 0x144   :  { %3440 = vmatprep.subr.bf16.mxu0 %v5764_v28  ;;  %3784 = vmatprep.subr.bf16.mxu1 %v5767_v14  ;;  %v5857_v28 = vld [vmem:[%s7974_s1 + $0xc0c] ss:$16 sps:$4 sm:$0xff]   ;;  %v4539_v14 = vcombine.low %v7181_v19, %v7186_v24  ;;  %v5855_v19 = vld [vmem:[%s7974_s1 + $0xc08] ss:$16 sps:$4 sm:$0xff]   ;;  %v5860_v24 = vld [vmem:[%s7974_s1 + $0xc24] ss:$16 sps:$4 sm:$0xff]  }
 0x145   :  { %3470 = vmatprep.mubr.bf16.mxu0 %v4540_v21  ;;  %3814 = vmatprep.mubr.bf16.mxu1 %v4540_v21  ;;  %v7389_v21 = vld [vmem:[%s7975_s0 + $0x30] sm:$0xff] }
 0x147   :  { %3441 = vmatpush1.bf16.msra.mxu0 %v5762_v29  ;;  %3785 = vmatpush1.bf16.msra.mxu1 %v5765_v30  ;;  %v7394_v29 = vld [vmem:[%s7975_s0 + $0x70] sm:$0xff] }
 0x148   :  { %3442 = vmatprep.subr.bf16.mxu0 %v5770_v31  ;;  %3786 = vmatprep.subr.bf16.mxu1 %v5773_v32  ;;  %v5852_v30 = vld [vmem:[%s7974_s1 + $0xc00] ss:$16 sps:$4 sm:$0xff]   ;;  %v5863_v31 = vld [vmem:[%s7974_s1 + $0xc2c] ss:$16 sps:$4 sm:$0xff]   ;;  %v4542_v32 = vcombine.high %v7389_v21, %v7394_v29 }
 0x14b   :  { %3443 = vmatpush1.bf16.msra.mxu0 %v5768_v33  ;;  %3787 = vmatpush1.bf16.msra.mxu1 %v5771_v34  ;;  %v5858_v33 = vld [vmem:[%s7974_s1 + $0xc20] ss:$16 sps:$4 sm:$0xff]   ;;  %v5861_v34 = vld [vmem:[%s7974_s1 + $0xc28] ss:$16 sps:$4 sm:$0xff]  }
 0x14c   :  { %3444 = vmatprep.subr.bf16.mxu0 %v5776_v35  ;;  %3788 = vmatprep.subr.bf16.mxu1 %v5779_v36  ;;  %v5866_v35 = vld [vmem:[%s7974_s1 + $0xc44] ss:$16 sps:$4 sm:$0xff]   ;;  %v5869_v36 = vld [vmem:[%s7974_s1 + $0xc4c] ss:$16 sps:$4 sm:$0xff]  }
 0x14f   :  { %3445 = vmatpush1.bf16.msra.mxu0 %v5774_v37  ;;  %3789 = vmatpush1.bf16.msra.mxu1 %v5777_v38  ;;  %v5864_v37 = vld [vmem:[%s7974_s1 + $0xc40] ss:$16 sps:$4 sm:$0xff]   ;;  %v5867_v38 = vld [vmem:[%s7974_s1 + $0xc48] ss:$16 sps:$4 sm:$0xff]  }
 0x150   :  { %3446 = vmatprep.subr.bf16.mxu0 %v5782_v39  ;;  %3790 = vmatprep.subr.bf16.mxu1 %v5785_v40  ;;  %v5872_v39 = vld [vmem:[%s7974_s1 + $0xc64] ss:$16 sps:$4 sm:$0xff]   ;;  %v5875_v40 = vld [vmem:[%s7974_s1 + $0xc6c] ss:$16 sps:$4 sm:$0xff]  }
 0x153   :  { %3447 = vmatpush1.bf16.msra.mxu0 %v5780_v41  ;;  %3791 = vmatpush1.bf16.msra.mxu1 %v5783_v42  ;;  %v5870_v41 = vld [vmem:[%s7974_s1 + $0xc60] ss:$16 sps:$4 sm:$0xff]   ;;  %v5873_v42 = vld [vmem:[%s7974_s1 + $0xc68] ss:$16 sps:$4 sm:$0xff]  }
 0x154   :  { %3448 = vmatprep.subr.bf16.mxu0 %v5788_v43  ;;  %3792 = vmatprep.subr.bf16.mxu1 %v5791_v44  ;;  %v5878_v43 = vld [vmem:[%s7974_s1 + $0xc84] ss:$16 sps:$4 sm:$0xff]   ;;  %v5881_v44 = vld [vmem:[%s7974_s1 + $0xc8c] ss:$16 sps:$4 sm:$0xff]  }
 0x157   :  { %3449 = vmatpush1.bf16.msra.mxu0 %v5786_v45  ;;  %3793 = vmatpush1.bf16.msra.mxu1 %v5789_v46  ;;  %v5876_v45 = vld [vmem:[%s7974_s1 + $0xc80] ss:$16 sps:$4 sm:$0xff]   ;;  %v5879_v46 = vld [vmem:[%s7974_s1 + $0xc88] ss:$16 sps:$4 sm:$0xff]  }
 0x158   :  { %3450 = vmatprep.subr.bf16.mxu0 %v5794_v47  ;;  %3794 = vmatprep.subr.bf16.mxu1 %v5797_v48  ;;  %v5884_v47 = vld [vmem:[%s7974_s1 + $0xca4] ss:$16 sps:$4 sm:$0xff]   ;;  %v5887_v48 = vld [vmem:[%s7974_s1 + $0xcac] ss:$16 sps:$4 sm:$0xff]  }
 0x15b   :  { %3451 = vmatpush1.bf16.msra.mxu0 %v5792_v49  ;;  %3795 = vmatpush1.bf16.msra.mxu1 %v5795_v50  ;;  %v5882_v49 = vld [vmem:[%s7974_s1 + $0xca0] ss:$16 sps:$4 sm:$0xff]   ;;  %v5885_v50 = vld [vmem:[%s7974_s1 + $0xca8] ss:$16 sps:$4 sm:$0xff]  }
 0x15c   :  { %3452 = vmatprep.subr.bf16.mxu0 %v5800_v51  ;;  %3796 = vmatprep.subr.bf16.mxu1 %v5803_v52  ;;  %v5890_v51 = vld [vmem:[%s7974_s1 + $0xcc4] ss:$16 sps:$4 sm:$0xff]   ;;  %v5893_v52 = vld [vmem:[%s7974_s1 + $0xccc] ss:$16 sps:$4 sm:$0xff]  }
 0x15f   :  { %3453 = vmatpush1.bf16.msra.mxu0 %v5798_v53  ;;  %3797 = vmatpush1.bf16.msra.mxu1 %v5801_v54  ;;  %v5888_v53 = vld [vmem:[%s7974_s1 + $0xcc0] ss:$16 sps:$4 sm:$0xff]   ;;  %v5891_v54 = vld [vmem:[%s7974_s1 + $0xcc8] ss:$16 sps:$4 sm:$0xff]  }
 0x160   :  { %3454 = vmatprep.subr.bf16.mxu0 %v5806_v55  ;;  %3798 = vmatprep.subr.bf16.mxu1 %v5809_v56  ;;  %v5896_v55 = vld [vmem:[%s7974_s1 + $0xce4] ss:$16 sps:$4 sm:$0xff]   ;;  %v5899_v56 = vld [vmem:[%s7974_s1 + $0xcec] ss:$16 sps:$4 sm:$0xff]  }
 0x163   :  { %3455 = vmatpush1.bf16.msra.mxu0 %v5804_v57  ;;  %3799 = vmatpush1.bf16.msra.mxu1 %v5807_v58  ;;  %v5894_v57 = vld [vmem:[%s7974_s1 + $0xce0] ss:$16 sps:$4 sm:$0xff]   ;;  %v5897_v58 = vld [vmem:[%s7974_s1 + $0xce8] ss:$16 sps:$4 sm:$0xff]  }
 0x164   :  { %3456 = vmatprep.subr.bf16.mxu0 %v5812_v59  ;;  %3800 = vmatprep.subr.bf16.mxu1 %v5815_v60  ;;  %v5902_v59 = vld [vmem:[%s7974_s1 + $0xd04] ss:$16 sps:$4 sm:$0xff]   ;;  %v5905_v60 = vld [vmem:[%s7974_s1 + $0xd0c] ss:$16 sps:$4 sm:$0xff]  }
 0x167   :  { %3457 = vmatpush1.bf16.msra.mxu0 %v5810_v61  ;;  %3801 = vmatpush1.bf16.msra.mxu1 %v5813_v62  ;;  %v5900_v61 = vld [vmem:[%s7974_s1 + $0xd00] ss:$16 sps:$4 sm:$0xff]   ;;  %v5903_v62 = vld [vmem:[%s7974_s1 + $0xd08] ss:$16 sps:$4 sm:$0xff]  }
 0x168   :  { %3458 = vmatprep.subr.bf16.mxu0 %v5818_v63  ;;  %3802 = vmatprep.subr.bf16.mxu1 %v5821_v0  ;;  %v5908_v63 = vld [vmem:[%s7974_s1 + $0xd24] ss:$16 sps:$4 sm:$0xff]   ;;  %v5911_v0 = vld [vmem:[%s7974_s1 + $0xd2c] ss:$16 sps:$4 sm:$0xff]  }
 0x16b   :  { %3459 = vmatpush1.bf16.msra.mxu0 %v5816_v1  ;;  %3803 = vmatpush1.bf16.msra.mxu1 %v5819_v2  ;;  %v5906_v1 = vld [vmem:[%s7974_s1 + $0xd20] ss:$16 sps:$4 sm:$0xff]   ;;  %v5909_v2 = vld [vmem:[%s7974_s1 + $0xd28] ss:$16 sps:$4 sm:$0xff]  }
 0x16c   :  { %3460 = vmatprep.subr.bf16.mxu0 %v5824_v3  ;;  %3804 = vmatprep.subr.bf16.mxu1 %v5827_v4  ;;  %v5914_v3 = vld [vmem:[%s7974_s1 + $0xd44] ss:$16 sps:$4 sm:$0xff]   ;;  %v5917_v4 = vld [vmem:[%s7974_s1 + $0xd4c] ss:$16 sps:$4 sm:$0xff]  }
 0x16f   :  { %3461 = vmatpush1.bf16.msra.mxu0 %v5822_v5  ;;  %3805 = vmatpush1.bf16.msra.mxu1 %v5825_v6  ;;  %v5912_v5 = vld [vmem:[%s7974_s1 + $0xd40] ss:$16 sps:$4 sm:$0xff]   ;;  %v5915_v6 = vld [vmem:[%s7974_s1 + $0xd48] ss:$16 sps:$4 sm:$0xff]  }
 0x170   :  { %3462 = vmatprep.subr.bf16.mxu0 %v5830_v7  ;;  %3806 = vmatprep.subr.bf16.mxu1 %v5833_v8  ;;  %v5920_v7 = vld [vmem:[%s7974_s1 + $0xd64] ss:$16 sps:$4 sm:$0xff]   ;;  %v5923_v8 = vld [vmem:[%s7974_s1 + $0xd6c] ss:$16 sps:$4 sm:$0xff]  }
 0x173   :  { %3463 = vmatpush1.bf16.msra.mxu0 %v5828_v9  ;;  %3807 = vmatpush1.bf16.msra.mxu1 %v5831_v10  ;;  %v5918_v9 = vld [vmem:[%s7974_s1 + $0xd60] ss:$16 sps:$4 sm:$0xff]   ;;  %v5921_v10 = vld [vmem:[%s7974_s1 + $0xd68] ss:$16 sps:$4 sm:$0xff]  }
 0x174   :  { %3464 = vmatprep.subr.bf16.mxu0 %v5836_v11  ;;  %3808 = vmatprep.subr.bf16.mxu1 %v5839_v12  ;;  %v5926_v11 = vld [vmem:[%s7974_s1 + $0xd84] ss:$16 sps:$4 sm:$0xff]   ;;  %v5929_v12 = vld [vmem:[%s7974_s1 + $0xd8c] ss:$16 sps:$4 sm:$0xff]  }
 0x177   :  { %3465 = vmatpush1.bf16.msra.mxu0 %v5834_v13  ;;  %3809 = vmatpush1.bf16.msra.mxu1 %v5837_v16  ;;  %v5924_v13 = vld [vmem:[%s7974_s1 + $0xd80] ss:$16 sps:$4 sm:$0xff]   ;;  %v5927_v16 = vld [vmem:[%s7974_s1 + $0xd88] ss:$16 sps:$4 sm:$0xff]  }
 0x178   :  { %3466 = vmatprep.subr.bf16.mxu0 %v5842_v17  ;;  %3810 = vmatprep.subr.bf16.mxu1 %v5845_v20  ;;  %v5932_v17 = vld [vmem:[%s7974_s1 + $0xda4] ss:$16 sps:$4 sm:$0xff]   ;;  %v5935_v20 = vld [vmem:[%s7974_s1 + $0xdac] ss:$16 sps:$4 sm:$0xff]  }
 0x17b   :  { %3467 = vmatpush1.bf16.msra.mxu0 %v5840_v15  ;;  %3811 = vmatpush1.bf16.msra.mxu1 %v5843_v22  ;;  %v5930_v15 = vld [vmem:[%s7974_s1 + $0xda0] ss:$16 sps:$4 sm:$0xff]   ;;  %v5933_v22 = vld [vmem:[%s7974_s1 + $0xda8] ss:$16 sps:$4 sm:$0xff]  }
 0x17c   :  { %3468 = vmatprep.subr.bf16.mxu0 %v5848_v23  ;;  %3812 = vmatprep.subr.bf16.mxu1 %v5851_v18  ;;  %v5938_v23 = vld [vmem:[%s7974_s1 + $0xdc4] ss:$16 sps:$4 sm:$0xff]   ;;  %v5941_v18 = vld [vmem:[%s7974_s1 + $0xdcc] ss:$16 sps:$4 sm:$0xff]  }
 0x17f   :  { %3469 = vmatpush1.bf16.msra.mxu0 %v5846_v25  ;;  %3813 = vmatpush1.bf16.msra.mxu1 %v5849_v26  ;;  %v5936_v25 = vld [vmem:[%s7974_s1 + $0xdc0] ss:$16 sps:$4 sm:$0xff]   ;;  %v5939_v26 = vld [vmem:[%s7974_s1 + $0xdc8] ss:$16 sps:$4 sm:$0xff]  }
 0x180   :  { %3481 = vmatprep.subr.bf16.mxu0 %v5854_v27  ;;  %3825 = vmatprep.subr.bf16.mxu1 %v5857_v28  ;;  %v5944_v27 = vld [vmem:[%s7974_s1 + $0xde4] ss:$16 sps:$4 sm:$0xff]   ;;  %v5947_v28 = vld [vmem:[%s7974_s1 + $0xdec] ss:$16 sps:$4 sm:$0xff]  }
 0x182   :  { %3471 = vmatmul.mubr.bf16.vlgmr.msra.gmra.mrb[0].mxu0 %v4539_v14  ;;  %3815 = vmatmul.mubr.bf16.vlgmr.msra.gmra.mrb[0].mxu1 %v4539_v14  ;;  %v5942_v14 = vld [vmem:[%s7974_s1 + $0xde0] ss:$16 sps:$4 sm:$0xff]  }
 0x183   :  { %3482 = vmatpush1.bf16.msra.mxu0 %v5852_v30  ;;  %3826 = vmatpush1.bf16.msra.mxu1 %v5855_v19  ;;  %v5945_v30 = vld [vmem:[%s7974_s1 + $0xde8] ss:$16 sps:$4 sm:$0xff]   ;;  %v5950_v19 = vld [vmem:[%s7974_s1 + $0xe04] ss:$16 sps:$4 sm:$0xff]  }
 0x184   :  { %3483 = vmatprep.subr.bf16.mxu0 %v5860_v24  ;;  %3827 = vmatprep.subr.bf16.mxu1 %v5863_v31  ;;  %v5953_v24 = vld [vmem:[%s7974_s1 + $0xe0c] ss:$16 sps:$4 sm:$0xff]   ;;  %v4541_v31 = vcombine.low %v7389_v21, %v7394_v29  ;;  %v5951_v21 = vld [vmem:[%s7974_s1 + $0xe08] ss:$16 sps:$4 sm:$0xff]   ;;  %v5956_v29 = vld [vmem:[%s7974_s1 + $0xe24] ss:$16 sps:$4 sm:$0xff]  }
 0x185   :  { %3513 = vmatprep.mubr.bf16.mxu0 %v4542_v32  ;;  %3857 = vmatprep.mubr.bf16.mxu1 %v4542_v32  ;;  %v7595_v32 = vld [vmem:[%s7975_s0 + $0x38] sm:$0xff] }
 0x187   :  { %3484 = vmatpush1.bf16.msra.mxu0 %v5858_v33  ;;  %3828 = vmatpush1.bf16.msra.mxu1 %v5861_v34  ;;  %v7600_v33 = vld [vmem:[%s7975_s0 + $0x78] sm:$0xff]  ;;  %v5948_v34 = vld [vmem:[%s7974_s1 + $0xe00] ss:$16 sps:$4 sm:$0xff]  }
 0x188   :  { %3485 = vmatprep.subr.bf16.mxu0 %v5866_v35  ;;  %3829 = vmatprep.subr.bf16.mxu1 %v5869_v36  ;;  %v5959_v35 = vld [vmem:[%s7974_s1 + $0xe2c] ss:$16 sps:$4 sm:$0xff]   ;;  %v4544_v36 = vcombine.high %v7595_v32, %v7600_v33 }
 0x18b   :  { %3486 = vmatpush1.bf16.msra.mxu0 %v5864_v37  ;;  %3830 = vmatpush1.bf16.msra.mxu1 %v5867_v38  ;;  %v5954_v37 = vld [vmem:[%s7974_s1 + $0xe20] ss:$16 sps:$4 sm:$0xff]   ;;  %v5957_v38 = vld [vmem:[%s7974_s1 + $0xe28] ss:$16 sps:$4 sm:$0xff]  }
 0x18c   :  { %3487 = vmatprep.subr.bf16.mxu0 %v5872_v39  ;;  %3831 = vmatprep.subr.bf16.mxu1 %v5875_v40  ;;  %v5962_v39 = vld [vmem:[%s7974_s1 + $0xe44] ss:$16 sps:$4 sm:$0xff]   ;;  %v5965_v40 = vld [vmem:[%s7974_s1 + $0xe4c] ss:$16 sps:$4 sm:$0xff]  }
 0x18f   :  { %3488 = vmatpush1.bf16.msra.mxu0 %v5870_v41  ;;  %3832 = vmatpush1.bf16.msra.mxu1 %v5873_v42  ;;  %v5960_v41 = vld [vmem:[%s7974_s1 + $0xe40] ss:$16 sps:$4 sm:$0xff]   ;;  %v5963_v42 = vld [vmem:[%s7974_s1 + $0xe48] ss:$16 sps:$4 sm:$0xff]  }
 0x190   :  { %3489 = vmatprep.subr.bf16.mxu0 %v5878_v43  ;;  %3833 = vmatprep.subr.bf16.mxu1 %v5881_v44  ;;  %v5968_v43 = vld [vmem:[%s7974_s1 + $0xe64] ss:$16 sps:$4 sm:$0xff]   ;;  %v5971_v44 = vld [vmem:[%s7974_s1 + $0xe6c] ss:$16 sps:$4 sm:$0xff]  }
 0x193   :  { %3490 = vmatpush1.bf16.msra.mxu0 %v5876_v45  ;;  %3834 = vmatpush1.bf16.msra.mxu1 %v5879_v46  ;;  %v5966_v45 = vld [vmem:[%s7974_s1 + $0xe60] ss:$16 sps:$4 sm:$0xff]   ;;  %v5969_v46 = vld [vmem:[%s7974_s1 + $0xe68] ss:$16 sps:$4 sm:$0xff]  }
 0x194   :  { %3491 = vmatprep.subr.bf16.mxu0 %v5884_v47  ;;  %3835 = vmatprep.subr.bf16.mxu1 %v5887_v48  ;;  %v5974_v47 = vld [vmem:[%s7974_s1 + $0xe84] ss:$16 sps:$4 sm:$0xff]   ;;  %v5977_v48 = vld [vmem:[%s7974_s1 + $0xe8c] ss:$16 sps:$4 sm:$0xff]  }
 0x197   :  { %3492 = vmatpush1.bf16.msra.mxu0 %v5882_v49  ;;  %3836 = vmatpush1.bf16.msra.mxu1 %v5885_v50  ;;  %v5972_v49 = vld [vmem:[%s7974_s1 + $0xe80] ss:$16 sps:$4 sm:$0xff]   ;;  %v5975_v50 = vld [vmem:[%s7974_s1 + $0xe88] ss:$16 sps:$4 sm:$0xff]  }
 0x198   :  { %3493 = vmatprep.subr.bf16.mxu0 %v5890_v51  ;;  %3837 = vmatprep.subr.bf16.mxu1 %v5893_v52  ;;  %v5980_v51 = vld [vmem:[%s7974_s1 + $0xea4] ss:$16 sps:$4 sm:$0xff]   ;;  %v5983_v52 = vld [vmem:[%s7974_s1 + $0xeac] ss:$16 sps:$4 sm:$0xff]  }
 0x19b   :  { %3494 = vmatpush1.bf16.msra.mxu0 %v5888_v53  ;;  %3838 = vmatpush1.bf16.msra.mxu1 %v5891_v54  ;;  %v5978_v53 = vld [vmem:[%s7974_s1 + $0xea0] ss:$16 sps:$4 sm:$0xff]   ;;  %v5981_v54 = vld [vmem:[%s7974_s1 + $0xea8] ss:$16 sps:$4 sm:$0xff]  }
 0x19c   :  { %3495 = vmatprep.subr.bf16.mxu0 %v5896_v55  ;;  %3839 = vmatprep.subr.bf16.mxu1 %v5899_v56  ;;  %v5986_v55 = vld [vmem:[%s7974_s1 + $0xec4] ss:$16 sps:$4 sm:$0xff]   ;;  %v5989_v56 = vld [vmem:[%s7974_s1 + $0xecc] ss:$16 sps:$4 sm:$0xff]  }
 0x19f   :  { %3496 = vmatpush1.bf16.msra.mxu0 %v5894_v57  ;;  %3840 = vmatpush1.bf16.msra.mxu1 %v5897_v58  ;;  %v5984_v57 = vld [vmem:[%s7974_s1 + $0xec0] ss:$16 sps:$4 sm:$0xff]   ;;  %v5987_v58 = vld [vmem:[%s7974_s1 + $0xec8] ss:$16 sps:$4 sm:$0xff]  }
 0x1a0   :  { %3497 = vmatprep.subr.bf16.mxu0 %v5902_v59  ;;  %3841 = vmatprep.subr.bf16.mxu1 %v5905_v60  ;;  %v5992_v59 = vld [vmem:[%s7974_s1 + $0xee4] ss:$16 sps:$4 sm:$0xff]   ;;  %v5995_v60 = vld [vmem:[%s7974_s1 + $0xeec] ss:$16 sps:$4 sm:$0xff]  }
 0x1a3   :  { %3498 = vmatpush1.bf16.msra.mxu0 %v5900_v61  ;;  %3842 = vmatpush1.bf16.msra.mxu1 %v5903_v62  ;;  %v5990_v61 = vld [vmem:[%s7974_s1 + $0xee0] ss:$16 sps:$4 sm:$0xff]   ;;  %v5993_v62 = vld [vmem:[%s7974_s1 + $0xee8] ss:$16 sps:$4 sm:$0xff]  }
 0x1a4   :  { %3499 = vmatprep.subr.bf16.mxu0 %v5908_v63  ;;  %3843 = vmatprep.subr.bf16.mxu1 %v5911_v0  ;;  %v5998_v63 = vld [vmem:[%s7974_s1 + $0xf04] ss:$16 sps:$4 sm:$0xff]   ;;  %v6001_v0 = vld [vmem:[%s7974_s1 + $0xf0c] ss:$16 sps:$4 sm:$0xff]  }
 0x1a7   :  { %3500 = vmatpush1.bf16.msra.mxu0 %v5906_v1  ;;  %3844 = vmatpush1.bf16.msra.mxu1 %v5909_v2  ;;  %v5996_v1 = vld [vmem:[%s7974_s1 + $0xf00] ss:$16 sps:$4 sm:$0xff]   ;;  %v5999_v2 = vld [vmem:[%s7974_s1 + $0xf08] ss:$16 sps:$4 sm:$0xff]  }
 0x1a8   :  { %3501 = vmatprep.subr.bf16.mxu0 %v5914_v3  ;;  %3845 = vmatprep.subr.bf16.mxu1 %v5917_v4  ;;  %v6004_v3 = vld [vmem:[%s7974_s1 + $0xf24] ss:$16 sps:$4 sm:$0xff]   ;;  %v6007_v4 = vld [vmem:[%s7974_s1 + $0xf2c] ss:$16 sps:$4 sm:$0xff]  }
 0x1ab   :  { %3502 = vmatpush1.bf16.msra.mxu0 %v5912_v5  ;;  %3846 = vmatpush1.bf16.msra.mxu1 %v5915_v6  ;;  %v6002_v5 = vld [vmem:[%s7974_s1 + $0xf20] ss:$16 sps:$4 sm:$0xff]   ;;  %v6005_v6 = vld [vmem:[%s7974_s1 + $0xf28] ss:$16 sps:$4 sm:$0xff]  }
 0x1ac   :  { %3503 = vmatprep.subr.bf16.mxu0 %v5920_v7  ;;  %3847 = vmatprep.subr.bf16.mxu1 %v5923_v8  ;;  %v6010_v7 = vld [vmem:[%s7974_s1 + $0xf44] ss:$16 sps:$4 sm:$0xff]   ;;  %v6013_v8 = vld [vmem:[%s7974_s1 + $0xf4c] ss:$16 sps:$4 sm:$0xff]  }
 0x1af   :  { %3504 = vmatpush1.bf16.msra.mxu0 %v5918_v9  ;;  %3848 = vmatpush1.bf16.msra.mxu1 %v5921_v10  ;;  %v6008_v9 = vld [vmem:[%s7974_s1 + $0xf40] ss:$16 sps:$4 sm:$0xff]   ;;  %v6011_v10 = vld [vmem:[%s7974_s1 + $0xf48] ss:$16 sps:$4 sm:$0xff]  }
 0x1b0   :  { %3505 = vmatprep.subr.bf16.mxu0 %v5926_v11  ;;  %3849 = vmatprep.subr.bf16.mxu1 %v5929_v12  ;;  %v6016_v11 = vld [vmem:[%s7974_s1 + $0xf64] ss:$16 sps:$4 sm:$0xff]   ;;  %v6019_v12 = vld [vmem:[%s7974_s1 + $0xf6c] ss:$16 sps:$4 sm:$0xff]  }
 0x1b3   :  { %3506 = vmatpush1.bf16.msra.mxu0 %v5924_v13  ;;  %3850 = vmatpush1.bf16.msra.mxu1 %v5927_v16  ;;  %v6014_v13 = vld [vmem:[%s7974_s1 + $0xf60] ss:$16 sps:$4 sm:$0xff]   ;;  %v6017_v16 = vld [vmem:[%s7974_s1 + $0xf68] ss:$16 sps:$4 sm:$0xff]  }
 0x1b4   :  { %3507 = vmatprep.subr.bf16.mxu0 %v5932_v17  ;;  %3851 = vmatprep.subr.bf16.mxu1 %v5935_v20  ;;  %v6022_v17 = vld [vmem:[%s7974_s1 + $0xf84] ss:$16 sps:$4 sm:$0xff]   ;;  %v6025_v20 = vld [vmem:[%s7974_s1 + $0xf8c] ss:$16 sps:$4 sm:$0xff]  }
 0x1b7   :  { %3508 = vmatpush1.bf16.msra.mxu0 %v5930_v15  ;;  %3852 = vmatpush1.bf16.msra.mxu1 %v5933_v22  ;;  %v6020_v15 = vld [vmem:[%s7974_s1 + $0xf80] ss:$16 sps:$4 sm:$0xff]   ;;  %v6023_v22 = vld [vmem:[%s7974_s1 + $0xf88] ss:$16 sps:$4 sm:$0xff]  }
 0x1b8   :  { %3509 = vmatprep.subr.bf16.mxu0 %v5938_v23  ;;  %3853 = vmatprep.subr.bf16.mxu1 %v5941_v18  ;;  %v6028_v23 = vld [vmem:[%s7974_s1 + $0xfa4] ss:$16 sps:$4 sm:$0xff]   ;;  %v6031_v18 = vld [vmem:[%s7974_s1 + $0xfac] ss:$16 sps:$4 sm:$0xff]  }
 0x1bb   :  { %3510 = vmatpush1.bf16.msra.mxu0 %v5936_v25  ;;  %3854 = vmatpush1.bf16.msra.mxu1 %v5939_v26  ;;  %v6026_v25 = vld [vmem:[%s7974_s1 + $0xfa0] ss:$16 sps:$4 sm:$0xff]   ;;  %v6029_v26 = vld [vmem:[%s7974_s1 + $0xfa8] ss:$16 sps:$4 sm:$0xff]  }
 0x1bc   :  { %3511 = vmatprep.subr.bf16.mxu0 %v5944_v27  ;;  %3855 = vmatprep.subr.bf16.mxu1 %v5947_v28  ;;  %v6034_v27 = vld [vmem:[%s7974_s1 + $0xfc4] ss:$16 sps:$4 sm:$0xff]   ;;  %v6037_v28 = vld [vmem:[%s7974_s1 + $0xfcc] ss:$16 sps:$4 sm:$0xff]  }
 0x1bf   :  { %3512 = vmatpush1.bf16.msra.mxu0 %v5942_v14  ;;  %3856 = vmatpush1.bf16.msra.mxu1 %v5945_v30  ;;  %v6032_v14 = vld [vmem:[%s7974_s1 + $0xfc0] ss:$16 sps:$4 sm:$0xff]   ;;  %v6035_v30 = vld [vmem:[%s7974_s1 + $0xfc8] ss:$16 sps:$4 sm:$0xff]  }
 0x1c0   :  { %3524 = vmatprep.subr.bf16.mxu0 %v5950_v19  ;;  %3868 = vmatprep.subr.bf16.mxu1 %v5953_v24  ;;  %v6040_v19 = vld [vmem:[%s7974_s1 + $0xfe4] ss:$16 sps:$4 sm:$0xff]   ;;  %v6043_v24 = vld [vmem:[%s7974_s1 + $0xfec] ss:$16 sps:$4 sm:$0xff]  }
 0x1c2   :  { %3514 = vmatmul.mubr.bf16.vlgmr.msra.gmra.mrb[0].mxu0 %v4541_v31  ;;  %3858 = vmatmul.mubr.bf16.vlgmr.msra.gmra.mrb[0].mxu1 %v4541_v31  ;;  %v6038_v31 = vld [vmem:[%s7974_s1 + $0xfe0] ss:$16 sps:$4 sm:$0xff]  }
 0x1c3   :  { %3525 = vmatpush1.bf16.msra.mxu0 %v5948_v34  ;;  %3869 = vmatpush1.bf16.msra.mxu1 %v5951_v21  ;;  %v6041_v34 = vld [vmem:[%s7974_s1 + $0xfe8] ss:$16 sps:$4 sm:$0xff]   ;;  %v6044_v21 = vld [vmem:[%s7976_s3 + $0x40] sm:$0xff]  }
 0x1c4   :  { %3526 = vmatprep.subr.bf16.mxu0 %v5956_v29  ;;  %3870 = vmatprep.subr.bf16.mxu1 %v5959_v35  ;;  %v6045_v29 = vld [vmem:[%s7976_s3 + $0xc0] sm:$0xff]   ;;  %v4543_v35 = vcombine.low %v7595_v32, %v7600_v33  ;;  %v6049_v32 = vld [vmem:[%s7976_s3 + $0xc8] sm:$0xff]  }
 0x1c5   :  { %3556 = vmatprep.mubr.bf16.mxu0 %v4544_v36  ;;  %3900 = vmatprep.mubr.bf16.mxu1 %v4544_v36  ;;  %v6046_v36 = vld [vmem:[%s7976_s3] sm:$0xff]   ;;  %v6050_v33 = vld [vmem:[%s7976_s3 + $0x8] sm:$0xff]  }
 0x1c7   :  { %3527 = vmatpush1.bf16.msra.mxu0 %v5954_v37  ;;  %3871 = vmatpush1.bf16.msra.mxu1 %v5957_v38  ;;  %v6047_v37 = vld [vmem:[%s7976_s3 + $0x80] sm:$0xff]   ;;  %v6048_v38 = vld [vmem:[%s7976_s3 + $0x48] sm:$0xff]  }
 0x1c8   :  { %3528 = vmatprep.subr.bf16.mxu0 %v5962_v39  ;;  %3872 = vmatprep.subr.bf16.mxu1 %v5965_v40  ;;  %v6051_v39 = vld [vmem:[%s7976_s3 + $0x88] sm:$0xff]   ;;  %v6052_v40 = vld [vmem:[%s7976_s3 + $0x50] sm:$0xff]  }
 0x1cb   :  { %3529 = vmatpush1.bf16.msra.mxu0 %v5960_v41  ;;  %3873 = vmatpush1.bf16.msra.mxu1 %v5963_v42  ;;  %v6053_v41 = vld [vmem:[%s7976_s3 + $0xd0] sm:$0xff]  }
 0x1cc   :  { %3530 = vmatprep.subr.bf16.mxu0 %v5968_v43  ;;  %3874 = vmatprep.subr.bf16.mxu1 %v5971_v44  ;;  %v6054_v42 = vld [vmem:[%s7976_s3 + $0x10] sm:$0xff]   ;;  %v6056_v44 = vld [vmem:[%s7976_s3 + $0x58] sm:$0xff]  }
 0x1cd   :  { %v6055_v43 = vld [vmem:[%s7976_s3 + $0x90] sm:$0xff]  }
 0x1cf   :  { %3531 = vmatpush1.bf16.msra.mxu0 %v5966_v45  ;;  %3875 = vmatpush1.bf16.msra.mxu1 %v5969_v46  ;;  %v6057_v45 = vld [vmem:[%s7976_s3 + $0xd8] sm:$0xff]  }
 0x1d0   :  { %3532 = vmatprep.subr.bf16.mxu0 %v5974_v47  ;;  %3876 = vmatprep.subr.bf16.mxu1 %v5977_v48  ;;  %v6058_v46 = vld [vmem:[%s7976_s3 + $0x18] sm:$0xff]   ;;  %v6060_v48 = vld [vmem:[%s7976_s3 + $0x60] sm:$0xff]  }
 0x1d1   :  { %v6059_v47 = vld [vmem:[%s7976_s3 + $0x98] sm:$0xff]  }
 0x1d3   :  { %3533 = vmatpush1.bf16.msra.mxu0 %v5972_v49  ;;  %3877 = vmatpush1.bf16.msra.mxu1 %v5975_v50  ;;  %v6061_v49 = vld [vmem:[%s7976_s3 + $0xe0] sm:$0xff]  }
 0x1d4   :  { %3534 = vmatprep.subr.bf16.mxu0 %v5980_v51  ;;  %3878 = vmatprep.subr.bf16.mxu1 %v5983_v52  ;;  %v6062_v50 = vld [vmem:[%s7976_s3 + $0x20] sm:$0xff]   ;;  %v6064_v52 = vld [vmem:[%s7976_s3 + $0x68] sm:$0xff]  }
 0x1d5   :  { %v6063_v51 = vld [vmem:[%s7976_s3 + $0xa0] sm:$0xff]  }
 0x1d7   :  { %3535 = vmatpush1.bf16.msra.mxu0 %v5978_v53  ;;  %3879 = vmatpush1.bf16.msra.mxu1 %v5981_v54  ;;  %v6065_v53 = vld [vmem:[%s7976_s3 + $0xe8] sm:$0xff]  }
 0x1d8   :  { %3536 = vmatprep.subr.bf16.mxu0 %v5986_v55  ;;  %3880 = vmatprep.subr.bf16.mxu1 %v5989_v56  ;;  %v6066_v54 = vld [vmem:[%s7976_s3 + $0x28] sm:$0xff]   ;;  %v6068_v56 = vld [vmem:[%s7976_s3 + $0x70] sm:$0xff]  }
 0x1d9   :  { %v6067_v55 = vld [vmem:[%s7976_s3 + $0xa8] sm:$0xff]  }
 0x1db   :  { %3537 = vmatpush1.bf16.msra.mxu0 %v5984_v57  ;;  %3881 = vmatpush1.bf16.msra.mxu1 %v5987_v58  ;;  %v6069_v57 = vld [vmem:[%s7976_s3 + $0xf0] sm:$0xff]  }
 0x1dc   :  { %3538 = vmatprep.subr.bf16.mxu0 %v5992_v59  ;;  %3882 = vmatprep.subr.bf16.mxu1 %v5995_v60  ;;  %v6070_v58 = vld [vmem:[%s7976_s3 + $0x30] sm:$0xff]   ;;  %v6072_v60 = vld [vmem:[%s7976_s3 + $0x78] sm:$0xff]  }
 0x1dd   :  { %v6071_v59 = vld [vmem:[%s7976_s3 + $0xb0] sm:$0xff]  }
 0x1df   :  { %3539 = vmatpush1.bf16.msra.mxu0 %v5990_v61  ;;  %3883 = vmatpush1.bf16.msra.mxu1 %v5993_v62  ;;  %v6073_v61 = vld [vmem:[%s7976_s3 + $0xf8] sm:$0xff]  }
 0x1e0   :  { %3540 = vmatprep.subr.bf16.mxu0 %v5998_v63  ;;  %3884 = vmatprep.subr.bf16.mxu1 %v6001_v0  ;;  %v6074_v62 = vld [vmem:[%s7976_s3 + $0x38] sm:$0xff]   ;;  %v6100_v0 = vmov 0.0  }
 0x1e1   :  { %v6075_v63 = vld [vmem:[%s7976_s3 + $0xb8] sm:$0xff]  }
 0x1e3   :  { %3541 = vmatpush1.bf16.msra.mxu0 %v5996_v1  ;;  %3885 = vmatpush1.bf16.msra.mxu1 %v5999_v2  ;;  %v563_v1 = vlaneseq }
 0x1e4   :  { %3542 = vmatprep.subr.bf16.mxu0 %v6004_v3  ;;  %3886 = vmatprep.subr.bf16.mxu1 %v6007_v4 }
 0x1e5   :  { %v564_v2 = vshrl.u32 %v563_v1, 7 }
 0x1e7   :  { %3543 = vmatpush1.bf16.msra.mxu0 %v6002_v5  ;;  %3887 = vmatpush1.bf16.msra.mxu1 %v6005_v6  ;;  %v565_v3 = vsub.s32 0, %v564_v2  ;;  %v573_v4 = vsub.s32 2, %v564_v2  ;;  %v561_v5 = vld [vmem:[%s7978_s2] sm:$0xf]  ;;  %v569_v6 = vsub.s32 1, %v564_v2 }
 0x1e8   :  { %3544 = vmatprep.subr.bf16.mxu0 %v6010_v7  ;;  %3888 = vmatprep.subr.bf16.mxu1 %v6013_v8  ;;  %v577_v7 = vsub.s32 3, %v564_v2 }
 0x1e9   :  { %v566_v8 = vrot.slane %v561_v5, %v565_v3 }
 0x1eb   :  { %3545 = vmatpush1.bf16.msra.mxu0 %v6008_v9  ;;  %3889 = vmatpush1.bf16.msra.mxu1 %v6011_v10  ;;  %v574_v9 = vrot.slane %v561_v5, %v573_v4  ;;  %v570_v10 = vrot.slane %v561_v5, %v569_v6 }
 0x1ec   :  { %3546 = vmatprep.subr.bf16.mxu0 %v6016_v11  ;;  %3890 = vmatprep.subr.bf16.mxu1 %v6019_v12  ;;  %v578_v11 = vrot.slane %v561_v5, %v577_v7 }
 0x1ef   :  { %3547 = vmatpush1.bf16.msra.mxu0 %v6014_v13  ;;  %3891 = vmatpush1.bf16.msra.mxu1 %v6017_v16 }
 0x1f0   :  { %3548 = vmatprep.subr.bf16.mxu0 %v6022_v17  ;;  %3892 = vmatprep.subr.bf16.mxu1 %v6025_v20 }
 0x1f3   :  { %3549 = vmatpush1.bf16.msra.mxu0 %v6020_v15  ;;  %3893 = vmatpush1.bf16.msra.mxu1 %v6023_v22 }
 0x1f4   :  { %3550 = vmatprep.subr.bf16.mxu0 %v6028_v23  ;;  %3894 = vmatprep.subr.bf16.mxu1 %v6031_v18 }
 0x1f7   :  { %3551 = vmatpush1.bf16.msra.mxu0 %v6026_v25  ;;  %3895 = vmatpush1.bf16.msra.mxu1 %v6029_v26 }
 0x1f8   :  { %3552 = vmatprep.subr.bf16.mxu0 %v6034_v27  ;;  %3896 = vmatprep.subr.bf16.mxu1 %v6037_v28 }
 0x1fb   :  { %3553 = vmatpush1.bf16.msra.mxu0 %v6032_v14  ;;  %3897 = vmatpush1.bf16.msra.mxu1 %v6035_v30 }
 0x1fc   :  { %3554 = vmatprep.subr.bf16.mxu0 %v6040_v19  ;;  %3898 = vmatprep.subr.bf16.mxu1 %v6043_v24 }
 0x1ff   :  { %3555 = vmatpush1.bf16.msra.mxu0 %v6038_v31  ;;  %3899 = vmatpush1.bf16.msra.mxu1 %v6041_v34 }
 0x200   :  { %5108 = vmatprep.subr.bf16.mxu0 %v6044_v21  ;;  %5130 = vmatprep.subr.bf16.mxu1 %v6045_v29 }
 0x202   :  { %3557 = vmatmul.mubr.bf16.vlgmr.msra.gmra.mrb[0].mxu0 %v4543_v35  ;;  %3901 = vmatmul.mubr.bf16.vlgmr.msra.gmra.mrb[0].mxu1 %v4543_v35 }
 0x203   :  { %5109 = vmatpush3.bf16.msra.mxu0 %v6046_v36  ;;  %5131 = vmatpush3.bf16.msra.mxu1 %v6047_v37 }
 0x204   :  { %5110 = vmatprep.subr.bf16.mxu0 %v6048_v38  ;;  %5132 = vmatprep.subr.bf16.mxu1 %v6049_v32 }
 0x207   :  { %5111 = vmatpush3.bf16.msra.mxu0 %v6050_v33  ;;  %5133 = vmatpush3.bf16.msra.mxu1 %v6051_v39 }
 0x208   :  { %5112 = vmatprep.subr.bf16.mxu0 %v6052_v40  ;;  %5134 = vmatprep.subr.bf16.mxu1 %v6053_v41  ;;  %v6076_v40 = vld [vmem:[%s7977_s5] sm:$0xff]   ;;  %v6077_v41 = vld [vmem:[%s7977_s5 + $0x8] sm:$0xff]  }
 0x20b   :  { %5113 = vmatpush3.bf16.msra.mxu0 %v6054_v42  ;;  %5135 = vmatpush3.bf16.msra.mxu1 %v6055_v43  ;;  %v6078_v42 = vld [vmem:[%s7977_s5 + $0x10] sm:$0xff]   ;;  %v6079_v43 = vld [vmem:[%s7977_s5 + $0x18] sm:$0xff]  }
 0x20c   :  { %5114 = vmatprep.subr.bf16.mxu0 %v6056_v44  ;;  %5136 = vmatprep.subr.bf16.mxu1 %v6057_v45  ;;  %v6080_v44 = vld [vmem:[%s7977_s5 + $0x20] sm:$0xff]   ;;  %v6081_v45 = vld [vmem:[%s7977_s5 + $0x28] sm:$0xff]  }
 0x20f   :  { %5115 = vmatpush3.bf16.msra.mxu0 %v6058_v46  ;;  %5137 = vmatpush3.bf16.msra.mxu1 %v6059_v47  ;;  %v6082_v46 = vld [vmem:[%s7977_s5 + $0x30] sm:$0xff]   ;;  %v6083_v47 = vld [vmem:[%s7977_s5 + $0x38] sm:$0xff]  }
 0x210   :  { %5116 = vmatprep.subr.bf16.mxu0 %v6060_v48  ;;  %5138 = vmatprep.subr.bf16.mxu1 %v6061_v49  ;;  %v6084_v48 = vld [vmem:[%s7979_s7] sm:$0xff]   ;;  %v6085_v49 = vld [vmem:[%s7979_s7 + $0x8] sm:$0xff]  }
 0x213   :  { %5117 = vmatpush3.bf16.msra.mxu0 %v6062_v50  ;;  %5139 = vmatpush3.bf16.msra.mxu1 %v6063_v51  ;;  %v6086_v50 = vld [vmem:[%s7979_s7 + $0x10] sm:$0xff]   ;;  %v6087_v51 = vld [vmem:[%s7979_s7 + $0x18] sm:$0xff]  }
 0x214   :  { %5118 = vmatprep.subr.bf16.mxu0 %v6064_v52  ;;  %5140 = vmatprep.subr.bf16.mxu1 %v6065_v53  ;;  %v6088_v52 = vld [vmem:[%s7979_s7 + $0x20] sm:$0xff]   ;;  %v6089_v53 = vld [vmem:[%s7979_s7 + $0x28] sm:$0xff]  }
 0x217   :  { %5119 = vmatpush3.bf16.msra.mxu0 %v6066_v54  ;;  %5141 = vmatpush3.bf16.msra.mxu1 %v6067_v55 }
 0x218   :  { %5120 = vmatprep.subr.bf16.mxu0 %v6068_v56  ;;  %5142 = vmatprep.subr.bf16.mxu1 %v6069_v57  ;;  %v5057_v56 = vld [vmem:[%s7980_s4] ss:$0 sm:$0xff] }
 0x21b   :  { %5121 = vmatpush3.bf16.msra.mxu0 %v6070_v58  ;;  %5143 = vmatpush3.bf16.msra.mxu1 %v6071_v59 }
 0x21c   :  { %5122 = vmatprep.subr.bf16.mxu0 %v6072_v60  ;;  %5144 = vmatprep.subr.bf16.mxu1 %v6073_v61 }
 0x21f   :  { %5123 = vmatpush3.bf16.msra.mxu0 %v6074_v62  ;;  %5145 = vmatpush3.bf16.msra.mxu1 %v6075_v63 }
 0x220   :  { %5170 = vmatprep.subr.bf16.mxu0 %v6100_v0  ;;  %5190 = vmatprep.subr.bf16.mxu1 %v6100_v0 }
 0x2d5   :  { %v3558_v12 = vpop.f32.mrb[0].mxu0  ;;  %v3902_v13 = vpop.f32.mrb[0].mxu1 }
 0x2d6   :  { %v5210_v16 = vadd.f32 %v3558_v12, %v566_v8  ;;  %v5214_v17 = vadd.f32 %v3902_v13, %v574_v9  ;;  %v3560_v20 = vpop.f32.mrb[1].mxu0  ;;  %v3904_v15 = vpop.f32.mrb[1].mxu1  ;;  %v6090_v12 = vld [vmem:[%s7979_s7 + $0x30] sm:$0xff]   ;;  %v6091_v13 = vld [vmem:[%s7979_s7 + $0x38] sm:$0xff]  }
 0x2d7   :  { %v5211_v22 = vadd.f32 %v3560_v20, %v570_v10  ;;  %v5215_v23 = vadd.f32 %v3904_v15, %v578_v11  ;;  %v3562_v18 = vpop.f32.mrb[2].mxu0  ;;  %v3906_v25 = vpop.f32.mrb[2].mxu1 }
 0x2d8   :  { %v5212_v26 = vadd.f32 %v3562_v18, %v566_v8  ;;  %v5216_v27 = vadd.f32 %v3906_v25, %v574_v9  ;;  %v3564_v28 = vpop.f32.mrb[3].mxu0  ;;  %v3908_v14 = vpop.f32.mrb[3].mxu1  ;;  %v3911_v24 = vmax.f32 %v5210_v16, 0.0  ;;  %v3913_v31 = vmax.f32 %v5214_v17, 0.0  ;;  %v5090_v16 = vld [vmem:[%s7981_s6] ss:$0 sm:$0xff] }
 0x2d9   :  { %v5213_v30 = vadd.f32 %v3564_v28, %v570_v10  ;;  %v5217_v19 = vadd.f32 %v3908_v14, %v578_v11  ;;  %v3912_v29 = vmax.f32 %v5211_v22, 0.0  ;;  %v3914_v35 = vmax.f32 %v5215_v23, 0.0  ;;  %v5099_v28 = vld [vmem:[%s7982_s8] ss:$0 sm:$0xff] }
 0x2da   :  { %v3915_v34 = vmax.f32 %v5212_v26, 0.0  ;;  %v3917_v21 = vmax.f32 %v5216_v27, 0.0 }
 0x2db   :  { %v3916_v36 = vmax.f32 %v5213_v30, 0.0  ;;  %v3918_v37 = vmax.f32 %v5217_v19, 0.0 }
 0x2dc   :  { %v3919_v38 = vpack.c.bf16 %v3915_v34, %v3911_v24  ;;  %v3921_v32 = vpack.c.bf16 %v3917_v21, %v3913_v31 }
 0x2dd   :  { %v3920_v33 = vpack.c.bf16 %v3916_v36, %v3912_v29  ;;  %v3922_v39 = vpack.c.bf16 %v3918_v37, %v3914_v35 }
 0x2df   :  { %4218 = vmatprep.mubr.bf16.mxu0 %v3920_v33  ;;  %4259 = vmatprep.mubr.bf16.mxu1 %v3922_v39 }
 0x2e0   :  { %4219 = vmatmul.mubr.bf16.vlgmr.msra.gmra.mrb[4].mxu0 %v3919_v38  ;;  %4260 = vmatmul.mubr.bf16.vlgmr.msra.gmra.mrb[4].mxu1 %v3921_v32 }
 0x2e1   :  { %5171 = vmatpush3.bf16.msra.mxu0 %v6076_v40  ;;  %5186 = vmatprep.mubr.msk.bf16.mxu0 %vm6101_vm0, %v6100_v0 }
 0x2e2   :  { %5172 = vmatprep.subr.bf16.mxu0 %v6100_v0  ;;  %5206 = vmatprep.mubr.msk.bf16.mxu1 %vm6101_vm0, %v6100_v0 }
 0x2e3   :  { %5191 = vmatpush3.bf16.msra.mxu1 %v6084_v48 }
 0x2e4   :  { %5192 = vmatprep.subr.bf16.mxu1 %v6100_v0 }
 0x2e5   :  { %5173 = vmatpush3.bf16.msra.mxu0 %v6077_v41 }
 0x2e6   :  { %5174 = vmatprep.subr.bf16.mxu0 %v6100_v0 }
 0x2e7   :  { %5193 = vmatpush3.bf16.msra.mxu1 %v6085_v49 }
 0x2e8   :  { %5194 = vmatprep.subr.bf16.mxu1 %v6100_v0 }
 0x2e9   :  { %5175 = vmatpush3.bf16.msra.mxu0 %v6078_v42 }
 0x2ea   :  { %5176 = vmatprep.subr.bf16.mxu0 %v6100_v0 }
 0x2eb   :  { %5195 = vmatpush3.bf16.msra.mxu1 %v6086_v50 }
 0x2ec   :  { %5196 = vmatprep.subr.bf16.mxu1 %v6100_v0 }
 0x2ed   :  { %5177 = vmatpush3.bf16.msra.mxu0 %v6079_v43 }
 0x2ee   :  { %5178 = vmatprep.subr.bf16.mxu0 %v6100_v0 }
 0x2ef   :  { %5197 = vmatpush3.bf16.msra.mxu1 %v6087_v51 }
 0x2f0   :  { %5198 = vmatprep.subr.bf16.mxu1 %v6100_v0 }
 0x2f1   :  { %5179 = vmatpush3.bf16.msra.mxu0 %v6080_v44 }
 0x2f2   :  { %5180 = vmatprep.subr.bf16.mxu0 %v6100_v0 }
 0x2f3   :  { %5199 = vmatpush3.bf16.msra.mxu1 %v6088_v52 }
 0x2f4   :  { %5200 = vmatprep.subr.bf16.mxu1 %v6100_v0 }
 0x2f5   :  { %5181 = vmatpush3.bf16.msra.mxu0 %v6081_v45 }
 0x2f6   :  { %5182 = vmatprep.subr.bf16.mxu0 %v6100_v0 }
 0x2f7   :  { %5201 = vmatpush3.bf16.msra.mxu1 %v6089_v53 }
 0x2f8   :  { %5202 = vmatprep.subr.bf16.mxu1 %v6100_v0 }
 0x2f9   :  { %5183 = vmatpush3.bf16.msra.mxu0 %v6082_v46 }
 0x2fa   :  { %5184 = vmatprep.subr.bf16.mxu0 %v6100_v0 }
 0x2fb   :  { %5203 = vmatpush3.bf16.msra.mxu1 %v6090_v12 }
 0x2fc   :  { %5204 = vmatprep.subr.bf16.mxu1 %v6100_v0  ;;  %v4499_v0 = vand.u32 127, %v563_v1 }
 0x2fd   :  { %5185 = vmatpush3.bf16.msra.mxu0 %v6083_v47 }
 0x2fe   :  { %vm4500_vm1 = vcmp.lt.s32.totalorder %v4499_v0, 10 }
 0x2ff   :  { %5205 = vmatpush3.bf16.msra.mxu1 %v6091_v13 }
 0x3b3   :  { %v5124_v54 = vpop.f32.mrb[4].mxu0  ;;  %v5146_v55 = vpop.f32.mrb[4].mxu1 }
 0x3b4   :  { %v5125_v57 = vpop.f32.mrb[5].mxu0  ;;  %v5147_v58 = vpop.f32.mrb[5].mxu1 }
 0x3b5   :  { %v5126_v59 = vadd.f32 %v5125_v57, %v5124_v54  ;;  %v5148_v60 = vadd.f32 %v5147_v58, %v5146_v55  ;;  %v5127_v61 = vpop.f32.mrb[6].mxu0  ;;  %v5149_v62 = vpop.f32.mrb[6].mxu1 }
 0x3b6   :  { %v5128_v63 = vpop.f32.mrb[7].mxu0  ;;  %v5150_v2 = vpop.f32.mrb[7].mxu1 }
 0x3b7   :  { %v4221_v3 = vadd.f32 %v5126_v59, %v5057_v56  ;;  %v5129_v4 = vadd.f32 %v5128_v63, %v5127_v61  ;;  %v5151_v5 = vadd.f32 %v5150_v2, %v5149_v62 }
 0x3b9   :  { %v4262_v6 = vadd.f32 %v5148_v60, %v4221_v3  ;;  %v4224_v7 = vadd.f32 %v5129_v4, %v5057_v56 }
 0x3bb   :  { %v4265_v8 = vadd.f32 %v5151_v5, %v4224_v7  ;;  %v4268_v9 = vmax.f32 %v4262_v6, 0.0 }
 0x3bd   :  { %v4269_v10 = vmax.f32 %v4265_v8, 0.0 }
 0x3bf   :  { %v4270_v11 = vpack.c.bf16 %v4269_v10, %v4268_v9 }
 0x3c1   :  { %5187 = vmatmul.mubr.bf16.vlgmr.msra.gmra.mrb[8].mxu0 %v4270_v11 }
 0x494   :  { %v4376_v17 = vpop.f32.mrb[8].mxu0 }
 0x495   :  { %v4377_v20 = vadd.f32 %v5090_v16, %v4376_v17  ;;  %v5188_v15 = vpop.f32.mrb[9].mxu0 }
 0x496   :  { %v4379_v22 = vpop.f32.mrb[10].mxu0 }
 0x497   :  { %v4380_v23 = vadd.f32 %v5090_v16, %v4379_v22  ;;  %v5189_v18 = vpop.f32.mrb[11].mxu0  ;;  %v4383_v25 = vmax.f32 %v4377_v20, 0.0 }
 0x499   :  { %v4384_v26 = vmax.f32 %v4380_v23, 0.0 }
 0x49b   :  { %v4385_v27 = vpack.c.bf16 %v4384_v26, %v4383_v25 }
 0x49d   :  { %5207 = vmatmul.mubr.bf16.vlgmr.msra.gmra.mrb[8].mxu1 %v4385_v27 }
 0x570   :  { %v4491_v14 = vpop.f32.mrb[8].mxu1 }
 0x571   :  { %v4492_v30 = vadd.f32 %v5099_v28, %v4491_v14  ;;  %v5208_v19 = vpop.f32.mrb[9].mxu1 }
 0x572   :  { %v4494_v24 = vpop.f32.mrb[10].mxu1 }
 0x573   :  { %v4495_v31 = vadd.f32 %v5099_v28, %v4494_v24  ;;  %v5209_v34 = vpop.f32.mrb[11].mxu1  ;;  %v4501_v21 = vsel %vm4500_vm1, %v4492_v30, -1e+30 }
 0x574   :  { %4503 = vmax.xlane.f32.xlu0 %v4501_v21 }
 0x575   :  { %v4502_v29 = vsel %vm4500_vm1, %v4495_v31, -1e+30 }
 0x578   :  { %4505 = vmax.xlane.f32.xlu0 %v4502_v29 }
 0x601   :  { %v4504_v35 = vpop.xlane.xlu0 %4503 }
 0x602   :  { %v4507_v36 = vsub.f32 %v4501_v21, %v4504_v35 }
 0x604   :  { %v4509_v37 = vmul.f32 1.442695, %v4507_v36 }
 0x605   :  { %v4506_v38 = vpop.xlane.xlu0 %4505 }
 0x606   :  { %v4508_v1 = vsub.f32 %v4502_v29, %v4506_v38  ;;  %6092 = vpow2.f32 %v4509_v37 }
 0x608   :  { %v4511_v32 = vmul.f32 1.442695, %v4508_v1 }
 0x60a   :  { %6094 = vpow2.f32 %v4511_v32 }
 0x610   :  { %v6093_v33 = vpop.eup %6092 }
 0x611   :  { %4513 = vadd.xlane.f32.xlu1 %v6093_v33 }
 0x614   :  { %v6095_v39 = vpop.eup %6094 }
 0x615   :  { %4515 = vadd.xlane.f32.xlu1 %v6095_v39 }
 0x69e   :  { %v4514_v40 = vpop.xlane.xlu1 %4513 }
 0x69f   :  { %6096 = vlog2.f32 %v4514_v40 }
 0x6a2   :  { %v4516_v41 = vpop.xlane.xlu1 %4515 }
 0x6a3   :  { %6098 = vlog2.f32 %v4516_v41 }
 0x6a9   :  { %v6097_v42 = vpop.eup %6096 }
 0x6aa   :  { %v4518_v43 = vmul.f32 0.6931472, %v6097_v42 }
 0x6ac   :  { %v4521_v44 = vsub.f32 %v4507_v36, %v4518_v43 }
 0x6ad   :  { %v6099_v45 = vpop.eup %6098 }
 0x6ae   :  { %4523 = vst [vmem:[%s7983_s9] sm:$0xff] %v4521_v44  ;;  %v4520_v46 = vmul.f32 0.6931472, %v6099_v45 }
 0x6b0   :  { %v4522_v47 = vsub.f32 %v4508_v1, %v4520_v46 }
 0x6b2   :  { %4524 = vst [vmem:[%s7983_s9 + $0x8] sm:$0xff] %v4522_v47 }

</bundles_post_ra>
